<compile_context>
chip_gen: v7x
topology: tpu7x:2x2x1
jax: 0.10.0
libtpu: 0.0.40
codegen_flags: <defaults>
</compile_context>

<pallas_src>
import functools

import jax
import jax.numpy as jnp
from jax.experimental import pallas as pl
from jax.experimental.pallas import tpu as pltpu

EPS = 1e-5


def _round_up(x, m):
    return (x + m - 1) // m * m


def _sepconv_kernel(xp_ref, wdw1_ref, wpw1_ref, sb1_ref,
                    wdw2_ref, wpw2_ref, sb2_ref, out_ref, h1_ref, *,
                    K, S, d, Ho1, Wo1, Wo1_pad, Ho2, Wo2, Wo2_pad, p2):
    """Fused DARTsSepConv = 2 x (ReLU -> depthwise -> 1x1 (MXU) -> folded BN).

    xp_ref  : [Hp, Wp, C]   f32   zero-padded NHWC input (batch squeezed)
    wdw*_ref: [K*K, C]      f32   depthwise weights, channel-last (resident)
    wpw*_ref: [C, C*]       bf16  pointwise weights, MXU-ready (resident)
    sb*_ref : [2, C*]       f32   folded BN scale (row 0) / bias (row 1)
    out_ref : [Ho2, Wo2, Co] f32  NHWC output block
    h1_ref  : [Ho1+2*p2, Wo2_pad+K-1, C] f32 VMEM scratch: zero-haloed, ReLU'd
              block-1 output (block-2 input) — never touches HBM.
    """
    C = xp_ref.shape[-1]
    Co = out_ref.shape[-1]

    # ------------- Block 1: ReLU -> depthwise (VPU taps) -> 1x1 (MXU) -> BN --
    wdw1 = wdw1_ref[...]                                   # hoisted weight load
    acc1 = jnp.zeros((Ho1, Wo1_pad, C), jnp.float32)
    if S == 1:
        for kh in range(K):
            for kw in range(K):
                # Per-tap ReLU: never materializes a ReLU'd copy of the whole
                # padded image (ReLU(0) == 0 keeps the zero padding valid).
                tap = xp_ref[kh * d:kh * d + Ho1, kw * d:kw * d + Wo1_pad, :]
                acc1 = acc1 + jnp.maximum(tap, 0.0) * wdw1[kh * K + kw]
    else:
        # TODO(synk): replace strided slices with S*S stride-phase planes
        # pre-extracted in the wrapper (DARTS reduction cells, stride=2).
        x = xp_ref[...]
        for kh in range(K):
            for kw in range(K):
                tap = jax.lax.slice(
                    x, (kh * d, kw * d, 0),
                    (kh * d + (Ho1 - 1) * S + 1,
                     kw * d + (Wo1_pad - 1) * S + 1, C),
                    (S, S, 1))
                acc1 = acc1 + jnp.maximum(tap, 0.0) * wdw1[kh * K + kw]

    # Pointwise 1x1 as a single bf16 MXU matmul with f32 accumulation.
    # Wo1_pad is a multiple of 8, so both reshapes are free relayouts.
    h1 = jnp.dot(acc1.reshape(Ho1 * Wo1_pad, C).astype(jnp.bfloat16),
                 wpw1_ref[...], preferred_element_type=jnp.float32)
    sb1 = sb1_ref[...]
    h1 = (h1 * sb1[0] + sb1[1]).reshape(Ho1, Wo1_pad, C)

    # -------- hand off to block 2 through a zero-haloed VMEM scratch ---------
    # (replaces the HBM round trip + wrapper jnp.pad between the two blocks)
    Hs, Ws, _ = h1_ref.shape
    if p2 > 0:                                             # halo bands
        h1_ref[:p2, :, :] = jnp.zeros((p2, Ws, C), jnp.float32)
        h1_ref[p2 + Ho1:, :, :] = jnp.zeros((Hs - p2 - Ho1, Ws, C), jnp.float32)
        h1_ref[p2:p2 + Ho1, :p2, :] = jnp.zeros((Ho1, p2, C), jnp.float32)
    if Ws - p2 - Wo1 > 0:
        h1_ref[p2:p2 + Ho1, p2 + Wo1:, :] = jnp.zeros(
            (Ho1, Ws - p2 - Wo1, C), jnp.float32)
    # Block-2 ReLU folded in here (ReLU(0) == 0 keeps the zero halo valid).
    h1_ref[p2:p2 + Ho1, p2:p2 + Wo1, :] = jnp.maximum(h1[:, :Wo1, :], 0.0)

    # ------------- Block 2: depthwise (stride 1, dil 1) -> 1x1 (MXU) -> BN ---
    wdw2 = wdw2_ref[...]
    acc2 = jnp.zeros((Ho2, Wo2_pad, C), jnp.float32)
    for kh in range(K):
        for kw in range(K):
            tap = h1_ref[kh:kh + Ho2, kw:kw + Wo2_pad, :]
            acc2 = acc2 + tap * wdw2[kh * K + kw]

    y2 = jnp.dot(acc2.reshape(Ho2 * Wo2_pad, C).astype(jnp.bfloat16),
                 wpw2_ref[...], preferred_element_type=jnp.float32)
    sb2 = sb2_ref[...]
    y2 = (y2 * sb2[0] + sb2[1]).reshape(Ho2, Wo2_pad, Co)
    out_ref[...] = y2[:, :Wo2, :]


def _fold_bn(g, b, rm, rv):
    scale = g / jnp.sqrt(rv + EPS)
    return jnp.stack([scale, b - rm * scale], axis=0).astype(jnp.float32)


def darts_sepconv_forward(x_nchw, params, *, kernel_size, stride, dilation=1):
    """DARTsSepConv forward (eval-mode BN).  x: [N, C, H, W] -> [N, Co, Ho, Wo]."""
    N, C, H, W = x_nchw.shape
    K, S, d = kernel_size, stride, dilation
    Co = params["pw2_w"].shape[0]

    # Block-1 (stride S, dilation d) and block-2 (stride 1, dilation 1) geometry.
    p1 = ((K - 1) * d + 1) // 2
    Ho1 = (H + 2 * p1 - (d * (K - 1) + 1)) // S + 1
    Wo1 = (W + 2 * p1 - (d * (K - 1) + 1)) // S + 1
    p2 = K // 2
    Ho2 = Ho1 + 2 * p2 - K + 1
    Wo2 = Wo1 + 2 * p2 - K + 1
    # Pad output-column counts to multiples of 8 (sublane tile) so the
    # in-kernel reshapes around the MXU matmuls are free relayouts.
    Wo1_pad = _round_up(Wo1, 8)
    Wo2_pad = _round_up(Wo2, 8)

    # NCHW -> NHWC once; zero-pad spatially (extra right columns only feed the
    # Wo1_pad slack, computed from zeros and sliced off in-kernel).
    x = jnp.transpose(x_nchw, (0, 2, 3, 1)).astype(jnp.float32)
    Hp = H + 2 * p1
    Wp = max(W + 2 * p1, (Wo1_pad - 1) * S + d * (K - 1) + 1)
    xp = jnp.pad(x, ((0, 0), (p1, p1), (p1, Wp - W - p1), (0, 0)))

    # Channel-last weight layouts (depthwise f32 for the VPU, pointwise bf16
    # for single-pass MXU matmuls) and folded eval-mode BatchNorm.
    wdw1 = params["dw1_w"].reshape(C, K * K).T.astype(jnp.float32)   # [K*K, C]
    wpw1 = params["pw1_w"].reshape(C, C).T.astype(jnp.bfloat16)      # [C, C]
    sb1 = _fold_bn(params["bn1_g"], params["bn1_b"],
                   params["bn1_rm"], params["bn1_rv"])               # [2, C]
    wdw2 = params["dw2_w"].reshape(C, K * K).T.astype(jnp.float32)   # [K*K, C]
    wpw2 = params["pw2_w"].reshape(Co, C).T.astype(jnp.bfloat16)     # [C, Co]
    sb2 = _fold_bn(params["bn2_g"], params["bn2_b"],
                   params["bn2_rm"], params["bn2_rv"])               # [2, Co]

    # Chip-conditional VMEM limit: ~96 MiB on v5e/v6e (128 MiB physical),
    # ~48 MiB on v7x (64 MiB physical).
    try:
        vmem_cap = pltpu.get_tpu_info().vmem_capacity_bytes
    except Exception:
        vmem_cap = 64 * 1024 * 1024          # conservative (v7x-sized) fallback
    vmem_limit = int(min(100 * 1024 * 1024, (vmem_cap * 3) // 4))

    kernel = functools.partial(
        _sepconv_kernel, K=K, S=S, d=d, Ho1=Ho1, Wo1=Wo1, Wo1_pad=Wo1_pad,
        Ho2=Ho2, Wo2=Wo2, Wo2_pad=Wo2_pad, p2=p2)

    # NOTE: the six weight/BN operands have constant index maps; with
    # pipeline_mode=pl.Buffered(1) their second buffers could be reclaimed
    # (only relevant once C/Co become large).
    y = pl.pallas_call(
        kernel,
        grid=(N,),
        in_specs=[
            pl.BlockSpec((None, Hp, Wp, C), lambda n: (n, 0, 0, 0)),
            pl.BlockSpec((K * K, C), lambda n: (0, 0)),   # resident weights
            pl.BlockSpec((C, C), lambda n: (0, 0)),
            pl.BlockSpec((2, C), lambda n: (0, 0)),
            pl.BlockSpec((K * K, C), lambda n: (0, 0)),
            pl.BlockSpec((C, Co), lambda n: (0, 0)),
            pl.BlockSpec((2, Co), lambda n: (0, 0)),
        ],
        out_specs=pl.BlockSpec((None, Ho2, Wo2, Co), lambda n: (n, 0, 0, 0)),
        out_shape=jax.ShapeDtypeStruct((N, Ho2, Wo2, Co), jnp.float32),
        scratch_shapes=[
            pltpu.VMEM((Ho1 + 2 * p2, Wo2_pad + K - 1, C), jnp.float32)],
        compiler_params=pltpu.CompilerParams(
            dimension_semantics=("parallel",),
            vmem_limit_bytes=vmem_limit),
    )(xp, wdw1, wpw1, sb1, wdw2, wpw2, sb2)

    return jnp.transpose(y, (0, 3, 1, 2))                  # NHWC -> NCHW once


# ----------------------------- reference ---------------------------------

def _dilconv_reference(x, dw_w, pw_w, g, b, rm, rv, *, K, S, d):
    C = x.shape[1]
    p = ((K - 1) * d + 1) // 2
    dn = ("NCHW", "OIHW", "NCHW")
    h = jnp.maximum(x, 0.0)
    h = jax.lax.conv_general_dilated(
        h, dw_w, window_strides=(S, S), padding=[(p, p), (p, p)],
        rhs_dilation=(d, d), feature_group_count=C, dimension_numbers=dn,
        precision=jax.lax.Precision.HIGHEST)
    h = jax.lax.conv_general_dilated(
        h, pw_w, window_strides=(1, 1), padding=[(0, 0), (0, 0)],
        dimension_numbers=dn, precision=jax.lax.Precision.HIGHEST)
    scale = g / jnp.sqrt(rv + EPS)
    return h * scale[None, :, None, None] + (b - rm * scale)[None, :, None, None]


def darts_sepconv_reference(x, params, *, kernel_size, stride, dilation=1):
    h = _dilconv_reference(
        x, params["dw1_w"], params["pw1_w"],
        params["bn1_g"], params["bn1_b"], params["bn1_rm"], params["bn1_rv"],
        K=kernel_size, S=stride, d=dilation)
    return _dilconv_reference(
        h, params["dw2_w"], params["pw2_w"],
        params["bn2_g"], params["bn2_b"], params["bn2_rm"], params["bn2_rv"],
        K=kernel_size, S=1, d=1)


def make_params(key, c_in, c_out, kernel_size):
    ks = jax.random.split(key, 12)
    f32 = jnp.float32
    return {
        "dw1_w": (jax.random.normal(ks[0], (c_in, 1, kernel_size, kernel_size)) * 0.3).astype(f32),
        "pw1_w": (jax.random.normal(ks[1], (c_in, c_in, 1, 1)) * 0.3).astype(f32),
        "bn1_g": jax.random.uniform(ks[2], (c_in,), minval=0.5, maxval=1.5).astype(f32),
        "bn1_b": (jax.random.normal(ks[3], (c_in,)) * 0.1).astype(f32),
        "bn1_rm": (jax.random.normal(ks[4], (c_in,)) * 0.1).astype(f32),
        "bn1_rv": jax.random.uniform(ks[5], (c_in,), minval=0.5, maxval=1.5).astype(f32),
        "dw2_w": (jax.random.normal(ks[6], (c_in, 1, kernel_size, kernel_size)) * 0.3).astype(f32),
        "pw2_w": (jax.random.normal(ks[7], (c_out, c_in, 1, 1)) * 0.3).astype(f32),
        "bn2_g": jax.random.uniform(ks[8], (c_out,), minval=0.5, maxval=1.5).astype(f32),
        "bn2_b": (jax.random.normal(ks[9], (c_out,)) * 0.1).astype(f32),
        "bn2_rm": (jax.random.normal(ks[10], (c_out,)) * 0.1).astype(f32),
        "bn2_rv": jax.random.uniform(ks[11], (c_out,), minval=0.5, maxval=1.5).astype(f32),
    }


if __name__ == "__main__":
    N, C_IN, C_OUT, H, W = 2, 4, 8, 16, 16
    K, STRIDE, DIL = 3, 1, 1

    key = jax.random.PRNGKey(0)
    kx, kp = jax.random.split(key)
    x = jax.random.normal(kx, (N, C_IN, H, W), dtype=jnp.float32)
    params = make_params(kp, C_IN, C_OUT, K)

    out = jax.block_until_ready(
        darts_sepconv_forward(x, params, kernel_size=K, stride=STRIDE, dilation=DIL))
    ref = jax.block_until_ready(
        darts_sepconv_reference(x, params, kernel_size=K, stride=STRIDE, dilation=DIL))

    assert out.shape == ref.shape, (out.shape, ref.shape)
    max_err = float(jnp.max(jnp.abs(out - ref)))
    # bf16 MXU operands (per perf review) => looser tolerance than pure f32.
    assert jnp.allclose(out, ref, atol=5e-2, rtol=5e-2), max_err

    print("KERNEL_OK")
</pallas_src>

<mosaic_0001>
module attributes {stable_mosaic.version = 11 : i64} {
  func.func @_sepconv_kernel(%arg0: i32, %arg1: memref<1x18x18x4xf32, #tpu.memory_space<vmem>>, %arg2: memref<9x4xf32, #tpu.memory_space<vmem>>, %arg3: memref<4x4xbf16, #tpu.memory_space<vmem>>, %arg4: memref<2x4xf32, #tpu.memory_space<vmem>>, %arg5: memref<9x4xf32, #tpu.memory_space<vmem>>, %arg6: memref<4x8xbf16, #tpu.memory_space<vmem>>, %arg7: memref<2x8xf32, #tpu.memory_space<vmem>>, %arg8: memref<1x16x16x8xf32, #tpu.memory_space<vmem>>, %arg9: memref<18x18x4xf32, #tpu.memory_space<vmem>>) attributes {dimension_semantics = [#tpu.dimension_semantics<parallel>], iteration_bounds = array<i64: 2>, scalar_prefetch = 0 : i64, scratch_operands = 1 : i64, tpu.core_type = #tpu.core_type<tc>, window_params = [{transform_indices = @transform_0, window_bounds = array<i64: 1, 18, 18, 4>}, {pipeline_mode = #tpu.pipeline_mode<synchronous>, transform_indices = @transform_1, window_bounds = array<i64: 9, 4>}, {pipeline_mode = #tpu.pipeline_mode<synchronous>, transform_indices = @transform_2, window_bounds = array<i64: 4, 4>}, {pipeline_mode = #tpu.pipeline_mode<synchronous>, transform_indices = @transform_3, window_bounds = array<i64: 2, 4>}, {pipeline_mode = #tpu.pipeline_mode<synchronous>, transform_indices = @transform_4, window_bounds = array<i64: 9, 4>}, {pipeline_mode = #tpu.pipeline_mode<synchronous>, transform_indices = @transform_5, window_bounds = array<i64: 4, 8>}, {pipeline_mode = #tpu.pipeline_mode<synchronous>, transform_indices = @transform_6, window_bounds = array<i64: 2, 8>}, {transform_indices = @transform_7, window_bounds = array<i64: 1, 16, 16, 8>}]} {
    %c0 = arith.constant 0 : index
    %c0_0 = arith.constant 0 : index
    %0 = vector.load %arg2[%c0, %c0_0] : memref<9x4xf32, #tpu.memory_space<vmem>>, vector<9x4xf32>
    %cst = arith.constant 0.000000e+00 : f32
    %1 = vector.broadcast %cst : f32 to vector<16x16x4xf32>
    %c0_1 = arith.constant 0 : index
    %c0_2 = arith.constant 0 : index
    %c0_3 = arith.constant 0 : index
    %c0_4 = arith.constant 0 : index
    %2 = vector.load %arg1[%c0_1, %c0_2, %c0_3, %c0_4] : memref<1x18x18x4xf32, #tpu.memory_space<vmem>>, vector<1x16x16x4xf32>
    %3 = vector.shape_cast %2 : vector<1x16x16x4xf32> to vector<16x16x4xf32>
    %cst_5 = arith.constant 0.000000e+00 : f32
    %4 = vector.broadcast %cst_5 : f32 to vector<16x16x4xf32>
    %5 = arith.maximumf %3, %4 : vector<16x16x4xf32>
    %6 = vector.extract_strided_slice %0 {offsets = [0, 0], sizes = [1, 4], strides = [1, 1]} : vector<9x4xf32> to vector<1x4xf32>
    %7 = vector.shape_cast %6 : vector<1x4xf32> to vector<4xf32>
    %8 = vector.shape_cast %7 : vector<4xf32> to vector<1x1x4xf32>
    %9 = vector.broadcast %8 : vector<1x1x4xf32> to vector<16x16x4xf32>
    %10 = arith.mulf %5, %9 : vector<16x16x4xf32>
    %11 = arith.addf %1, %10 : vector<16x16x4xf32>
    %c0_6 = arith.constant 0 : index
    %c0_7 = arith.constant 0 : index
    %c1 = arith.constant 1 : index
    %c0_8 = arith.constant 0 : index
    %12 = vector.load %arg1[%c0_6, %c0_7, %c1, %c0_8] : memref<1x18x18x4xf32, #tpu.memory_space<vmem>>, vector<1x16x16x4xf32>
    %13 = vector.shape_cast %12 : vector<1x16x16x4xf32> to vector<16x16x4xf32>
    %cst_9 = arith.constant 0.000000e+00 : f32
    %14 = vector.broadcast %cst_9 : f32 to vector<16x16x4xf32>
    %15 = arith.maximumf %13, %14 : vector<16x16x4xf32>
    %16 = vector.extract_strided_slice %0 {offsets = [1, 0], sizes = [1, 4], strides = [1, 1]} : vector<9x4xf32> to vector<1x4xf32>
    %17 = vector.shape_cast %16 : vector<1x4xf32> to vector<4xf32>
    %18 = vector.shape_cast %17 : vector<4xf32> to vector<1x1x4xf32>
    %19 = vector.broadcast %18 : vector<1x1x4xf32> to vector<16x16x4xf32>
    %20 = arith.mulf %15, %19 : vector<16x16x4xf32>
    %21 = arith.addf %11, %20 : vector<16x16x4xf32>
    %c0_10 = arith.constant 0 : index
    %c0_11 = arith.constant 0 : index
    %c2 = arith.constant 2 : index
    %c0_12 = arith.constant 0 : index
    %22 = vector.load %arg1[%c0_10, %c0_11, %c2, %c0_12] : memref<1x18x18x4xf32, #tpu.memory_space<vmem>>, vector<1x16x16x4xf32>
    %23 = vector.shape_cast %22 : vector<1x16x16x4xf32> to vector<16x16x4xf32>
    %cst_13 = arith.constant 0.000000e+00 : f32
    %24 = vector.broadcast %cst_13 : f32 to vector<16x16x4xf32>
    %25 = arith.maximumf %23, %24 : vector<16x16x4xf32>
    %26 = vector.extract_strided_slice %0 {offsets = [2, 0], sizes = [1, 4], strides = [1, 1]} : vector<9x4xf32> to vector<1x4xf32>
    %27 = vector.shape_cast %26 : vector<1x4xf32> to vector<4xf32>
    %28 = vector.shape_cast %27 : vector<4xf32> to vector<1x1x4xf32>
    %29 = vector.broadcast %28 : vector<1x1x4xf32> to vector<16x16x4xf32>
    %30 = arith.mulf %25, %29 : vector<16x16x4xf32>
    %31 = arith.addf %21, %30 : vector<16x16x4xf32>
    %c0_14 = arith.constant 0 : index
    %c1_15 = arith.constant 1 : index
    %c0_16 = arith.constant 0 : index
    %c0_17 = arith.constant 0 : index
    %32 = vector.load %arg1[%c0_14, %c1_15, %c0_16, %c0_17] : memref<1x18x18x4xf32, #tpu.memory_space<vmem>>, vector<1x16x16x4xf32>
    %33 = vector.shape_cast %32 : vector<1x16x16x4xf32> to vector<16x16x4xf32>
    %cst_18 = arith.constant 0.000000e+00 : f32
    %34 = vector.broadcast %cst_18 : f32 to vector<16x16x4xf32>
    %35 = arith.maximumf %33, %34 : vector<16x16x4xf32>
    %36 = vector.extract_strided_slice %0 {offsets = [3, 0], sizes = [1, 4], strides = [1, 1]} : vector<9x4xf32> to vector<1x4xf32>
    %37 = vector.shape_cast %36 : vector<1x4xf32> to vector<4xf32>
    %38 = vector.shape_cast %37 : vector<4xf32> to vector<1x1x4xf32>
    %39 = vector.broadcast %38 : vector<1x1x4xf32> to vector<16x16x4xf32>
    %40 = arith.mulf %35, %39 : vector<16x16x4xf32>
    %41 = arith.addf %31, %40 : vector<16x16x4xf32>
    %c0_19 = arith.constant 0 : index
    %c1_20 = arith.constant 1 : index
    %c1_21 = arith.constant 1 : index
    %c0_22 = arith.constant 0 : index
    %42 = vector.load %arg1[%c0_19, %c1_20, %c1_21, %c0_22] : memref<1x18x18x4xf32, #tpu.memory_space<vmem>>, vector<1x16x16x4xf32>
    %43 = vector.shape_cast %42 : vector<1x16x16x4xf32> to vector<16x16x4xf32>
    %cst_23 = arith.constant 0.000000e+00 : f32
    %44 = vector.broadcast %cst_23 : f32 to vector<16x16x4xf32>
    %45 = arith.maximumf %43, %44 : vector<16x16x4xf32>
    %46 = vector.extract_strided_slice %0 {offsets = [4, 0], sizes = [1, 4], strides = [1, 1]} : vector<9x4xf32> to vector<1x4xf32>
    %47 = vector.shape_cast %46 : vector<1x4xf32> to vector<4xf32>
    %48 = vector.shape_cast %47 : vector<4xf32> to vector<1x1x4xf32>
    %49 = vector.broadcast %48 : vector<1x1x4xf32> to vector<16x16x4xf32>
    %50 = arith.mulf %45, %49 : vector<16x16x4xf32>
    %51 = arith.addf %41, %50 : vector<16x16x4xf32>
    %c0_24 = arith.constant 0 : index
    %c1_25 = arith.constant 1 : index
    %c2_26 = arith.constant 2 : index
    %c0_27 = arith.constant 0 : index
    %52 = vector.load %arg1[%c0_24, %c1_25, %c2_26, %c0_27] : memref<1x18x18x4xf32, #tpu.memory_space<vmem>>, vector<1x16x16x4xf32>
    %53 = vector.shape_cast %52 : vector<1x16x16x4xf32> to vector<16x16x4xf32>
    %cst_28 = arith.constant 0.000000e+00 : f32
    %54 = vector.broadcast %cst_28 : f32 to vector<16x16x4xf32>
    %55 = arith.maximumf %53, %54 : vector<16x16x4xf32>
    %56 = vector.extract_strided_slice %0 {offsets = [5, 0], sizes = [1, 4], strides = [1, 1]} : vector<9x4xf32> to vector<1x4xf32>
    %57 = vector.shape_cast %56 : vector<1x4xf32> to vector<4xf32>
    %58 = vector.shape_cast %57 : vector<4xf32> to vector<1x1x4xf32>
    %59 = vector.broadcast %58 : vector<1x1x4xf32> to vector<16x16x4xf32>
    %60 = arith.mulf %55, %59 : vector<16x16x4xf32>
    %61 = arith.addf %51, %60 : vector<16x16x4xf32>
    %c0_29 = arith.constant 0 : index
    %c2_30 = arith.constant 2 : index
    %c0_31 = arith.constant 0 : index
    %c0_32 = arith.constant 0 : index
    %62 = vector.load %arg1[%c0_29, %c2_30, %c0_31, %c0_32] : memref<1x18x18x4xf32, #tpu.memory_space<vmem>>, vector<1x16x16x4xf32>
    %63 = vector.shape_cast %62 : vector<1x16x16x4xf32> to vector<16x16x4xf32>
    %cst_33 = arith.constant 0.000000e+00 : f32
    %64 = vector.broadcast %cst_33 : f32 to vector<16x16x4xf32>
    %65 = arith.maximumf %63, %64 : vector<16x16x4xf32>
    %66 = vector.extract_strided_slice %0 {offsets = [6, 0], sizes = [1, 4], strides = [1, 1]} : vector<9x4xf32> to vector<1x4xf32>
    %67 = vector.shape_cast %66 : vector<1x4xf32> to vector<4xf32>
    %68 = vector.shape_cast %67 : vector<4xf32> to vector<1x1x4xf32>
    %69 = vector.broadcast %68 : vector<1x1x4xf32> to vector<16x16x4xf32>
    %70 = arith.mulf %65, %69 : vector<16x16x4xf32>
    %71 = arith.addf %61, %70 : vector<16x16x4xf32>
    %c0_34 = arith.constant 0 : index
    %c2_35 = arith.constant 2 : index
    %c1_36 = arith.constant 1 : index
    %c0_37 = arith.constant 0 : index
    %72 = vector.load %arg1[%c0_34, %c2_35, %c1_36, %c0_37] : memref<1x18x18x4xf32, #tpu.memory_space<vmem>>, vector<1x16x16x4xf32>
    %73 = vector.shape_cast %72 : vector<1x16x16x4xf32> to vector<16x16x4xf32>
    %cst_38 = arith.constant 0.000000e+00 : f32
    %74 = vector.broadcast %cst_38 : f32 to vector<16x16x4xf32>
    %75 = arith.maximumf %73, %74 : vector<16x16x4xf32>
    %76 = vector.extract_strided_slice %0 {offsets = [7, 0], sizes = [1, 4], strides = [1, 1]} : vector<9x4xf32> to vector<1x4xf32>
    %77 = vector.shape_cast %76 : vector<1x4xf32> to vector<4xf32>
    %78 = vector.shape_cast %77 : vector<4xf32> to vector<1x1x4xf32>
    %79 = vector.broadcast %78 : vector<1x1x4xf32> to vector<16x16x4xf32>
    %80 = arith.mulf %75, %79 : vector<16x16x4xf32>
    %81 = arith.addf %71, %80 : vector<16x16x4xf32>
    %c0_39 = arith.constant 0 : index
    %c2_40 = arith.constant 2 : index
    %c2_41 = arith.constant 2 : index
    %c0_42 = arith.constant 0 : index
    %82 = vector.load %arg1[%c0_39, %c2_40, %c2_41, %c0_42] : memref<1x18x18x4xf32, #tpu.memory_space<vmem>>, vector<1x16x16x4xf32>
    %83 = vector.shape_cast %82 : vector<1x16x16x4xf32> to vector<16x16x4xf32>
    %cst_43 = arith.constant 0.000000e+00 : f32
    %84 = vector.broadcast %cst_43 : f32 to vector<16x16x4xf32>
    %85 = arith.maximumf %83, %84 : vector<16x16x4xf32>
    %86 = vector.extract_strided_slice %0 {offsets = [8, 0], sizes = [1, 4], strides = [1, 1]} : vector<9x4xf32> to vector<1x4xf32>
    %87 = vector.shape_cast %86 : vector<1x4xf32> to vector<4xf32>
    %88 = vector.shape_cast %87 : vector<4xf32> to vector<1x1x4xf32>
    %89 = vector.broadcast %88 : vector<1x1x4xf32> to vector<16x16x4xf32>
    %90 = arith.mulf %85, %89 : vector<16x16x4xf32>
    %91 = arith.addf %81, %90 : vector<16x16x4xf32>
    %92 = vector.shape_cast %91 : vector<16x16x4xf32> to vector<256x4xf32>
    %93 = arith.truncf %92 : vector<256x4xf32> to vector<256x4xbf16>
    %c0_44 = arith.constant 0 : index
    %c0_45 = arith.constant 0 : index
    %94 = vector.load %arg3[%c0_44, %c0_45] : memref<4x4xbf16, #tpu.memory_space<vmem>>, vector<4x4xbf16>
    %cst_46 = arith.constant dense<0.000000e+00> : vector<256x4xf32>
    %95 = tpu.matmul %93, %94, %cst_46 {dimension_numbers = #tpu.dot_dimension_numbers<[1], [0], [0], [1], [0, 0, 1, 1], [], []>} : vector<256x4xbf16>, vector<4x4xbf16>, vector<256x4xf32> -> vector<256x4xf32>
    %c0_47 = arith.constant 0 : index
    %c0_48 = arith.constant 0 : index
    %96 = vector.load %arg4[%c0_47, %c0_48] : memref<2x4xf32, #tpu.memory_space<vmem>>, vector<2x4xf32>
    %97 = vector.extract_strided_slice %96 {offsets = [0, 0], sizes = [1, 4], strides = [1, 1]} : vector<2x4xf32> to vector<1x4xf32>
    %98 = vector.shape_cast %97 : vector<1x4xf32> to vector<4xf32>
    %99 = vector.shape_cast %98 : vector<4xf32> to vector<1x4xf32>
    %100 = vector.broadcast %99 : vector<1x4xf32> to vector<256x4xf32>
    %101 = arith.mulf %95, %100 : vector<256x4xf32>
    %102 = vector.extract_strided_slice %96 {offsets = [1, 0], sizes = [1, 4], strides = [1, 1]} : vector<2x4xf32> to vector<1x4xf32>
    %103 = vector.shape_cast %102 : vector<1x4xf32> to vector<4xf32>
    %104 = vector.shape_cast %103 : vector<4xf32> to vector<1x4xf32>
    %105 = vector.broadcast %104 : vector<1x4xf32> to vector<256x4xf32>
    %106 = arith.addf %101, %105 : vector<256x4xf32>
    %107 = vector.shape_cast %106 : vector<256x4xf32> to vector<16x16x4xf32>
    %cst_49 = arith.constant 0.000000e+00 : f32
    %108 = vector.broadcast %cst_49 : f32 to vector<1x18x4xf32>
    %c0_50 = arith.constant 0 : index
    %c0_51 = arith.constant 0 : index
    %c0_52 = arith.constant 0 : index
    %109 = vector.load %arg9[%c0_50, %c0_51, %c0_52] : memref<18x18x4xf32, #tpu.memory_space<vmem>>, vector<1x18x4xf32>
    tpu.vector_store %arg9[%c0_50, %c0_51, %c0_52], %108 {strides = array<i32>} : memref<18x18x4xf32, #tpu.memory_space<vmem>>, vector<1x18x4xf32>,
    %cst_53 = arith.constant 0.000000e+00 : f32
    %110 = vector.broadcast %cst_53 : f32 to vector<1x18x4xf32>
    %c17 = arith.constant 17 : index
    %c0_54 = arith.constant 0 : index
    %c0_55 = arith.constant 0 : index
    %111 = vector.load %arg9[%c17, %c0_54, %c0_55] : memref<18x18x4xf32, #tpu.memory_space<vmem>>, vector<1x18x4xf32>
    tpu.vector_store %arg9[%c17, %c0_54, %c0_55], %110 {strides = array<i32>} : memref<18x18x4xf32, #tpu.memory_space<vmem>>, vector<1x18x4xf32>,
    %cst_56 = arith.constant 0.000000e+00 : f32
    %112 = vector.broadcast %cst_56 : f32 to vector<16x1x4xf32>
    %c1_57 = arith.constant 1 : index
    %c0_58 = arith.constant 0 : index
    %c0_59 = arith.constant 0 : index
    %113 = vector.load %arg9[%c1_57, %c0_58, %c0_59] : memref<18x18x4xf32, #tpu.memory_space<vmem>>, vector<16x1x4xf32>
    tpu.vector_store %arg9[%c1_57, %c0_58, %c0_59], %112 {strides = array<i32>} : memref<18x18x4xf32, #tpu.memory_space<vmem>>, vector<16x1x4xf32>,
    %cst_60 = arith.constant 0.000000e+00 : f32
    %114 = vector.broadcast %cst_60 : f32 to vector<16x1x4xf32>
    %c1_61 = arith.constant 1 : index
    %c17_62 = arith.constant 17 : index
    %c0_63 = arith.constant 0 : index
    %115 = vector.load %arg9[%c1_61, %c17_62, %c0_63] : memref<18x18x4xf32, #tpu.memory_space<vmem>>, vector<16x1x4xf32>
    tpu.vector_store %arg9[%c1_61, %c17_62, %c0_63], %114 {strides = array<i32>} : memref<18x18x4xf32, #tpu.memory_space<vmem>>, vector<16x1x4xf32>,
    %cst_64 = arith.constant 0.000000e+00 : f32
    %116 = vector.broadcast %cst_64 : f32 to vector<16x16x4xf32>
    %117 = arith.maximumf %107, %116 : vector<16x16x4xf32>
    %c1_65 = arith.constant 1 : index
    %c1_66 = arith.constant 1 : index
    %c0_67 = arith.constant 0 : index
    %118 = vector.load %arg9[%c1_65, %c1_66, %c0_67] : memref<18x18x4xf32, #tpu.memory_space<vmem>>, vector<16x16x4xf32>
    tpu.vector_store %arg9[%c1_65, %c1_66, %c0_67], %117 {strides = array<i32>} : memref<18x18x4xf32, #tpu.memory_space<vmem>>, vector<16x16x4xf32>,
    %c0_68 = arith.constant 0 : index
    %c0_69 = arith.constant 0 : index
    %119 = vector.load %arg5[%c0_68, %c0_69] : memref<9x4xf32, #tpu.memory_space<vmem>>, vector<9x4xf32>
    %cst_70 = arith.constant 0.000000e+00 : f32
    %120 = vector.broadcast %cst_70 : f32 to vector<16x16x4xf32>
    %c0_71 = arith.constant 0 : index
    %c0_72 = arith.constant 0 : index
    %c0_73 = arith.constant 0 : index
    %121 = vector.load %arg9[%c0_71, %c0_72, %c0_73] : memref<18x18x4xf32, #tpu.memory_space<vmem>>, vector<16x16x4xf32>
    %122 = vector.extract_strided_slice %119 {offsets = [0, 0], sizes = [1, 4], strides = [1, 1]} : vector<9x4xf32> to vector<1x4xf32>
    %123 = vector.shape_cast %122 : vector<1x4xf32> to vector<4xf32>
    %124 = vector.shape_cast %123 : vector<4xf32> to vector<1x1x4xf32>
    %125 = vector.broadcast %124 : vector<1x1x4xf32> to vector<16x16x4xf32>
    %126 = arith.mulf %121, %125 : vector<16x16x4xf32>
    %127 = arith.addf %120, %126 : vector<16x16x4xf32>
    %c0_74 = arith.constant 0 : index
    %c1_75 = arith.constant 1 : index
    %c0_76 = arith.constant 0 : index
    %128 = vector.load %arg9[%c0_74, %c1_75, %c0_76] : memref<18x18x4xf32, #tpu.memory_space<vmem>>, vector<16x16x4xf32>
    %129 = vector.extract_strided_slice %119 {offsets = [1, 0], sizes = [1, 4], strides = [1, 1]} : vector<9x4xf32> to vector<1x4xf32>
    %130 = vector.shape_cast %129 : vector<1x4xf32> to vector<4xf32>
    %131 = vector.shape_cast %130 : vector<4xf32> to vector<1x1x4xf32>
    %132 = vector.broadcast %131 : vector<1x1x4xf32> to vector<16x16x4xf32>
    %133 = arith.mulf %128, %132 : vector<16x16x4xf32>
    %134 = arith.addf %127, %133 : vector<16x16x4xf32>
    %c0_77 = arith.constant 0 : index
    %c2_78 = arith.constant 2 : index
    %c0_79 = arith.constant 0 : index
    %135 = vector.load %arg9[%c0_77, %c2_78, %c0_79] : memref<18x18x4xf32, #tpu.memory_space<vmem>>, vector<16x16x4xf32>
    %136 = vector.extract_strided_slice %119 {offsets = [2, 0], sizes = [1, 4], strides = [1, 1]} : vector<9x4xf32> to vector<1x4xf32>
    %137 = vector.shape_cast %136 : vector<1x4xf32> to vector<4xf32>
    %138 = vector.shape_cast %137 : vector<4xf32> to vector<1x1x4xf32>
    %139 = vector.broadcast %138 : vector<1x1x4xf32> to vector<16x16x4xf32>
    %140 = arith.mulf %135, %139 : vector<16x16x4xf32>
    %141 = arith.addf %134, %140 : vector<16x16x4xf32>
    %c1_80 = arith.constant 1 : index
    %c0_81 = arith.constant 0 : index
    %c0_82 = arith.constant 0 : index
    %142 = vector.load %arg9[%c1_80, %c0_81, %c0_82] : memref<18x18x4xf32, #tpu.memory_space<vmem>>, vector<16x16x4xf32>
    %143 = vector.extract_strided_slice %119 {offsets = [3, 0], sizes = [1, 4], strides = [1, 1]} : vector<9x4xf32> to vector<1x4xf32>
    %144 = vector.shape_cast %143 : vector<1x4xf32> to vector<4xf32>
    %145 = vector.shape_cast %144 : vector<4xf32> to vector<1x1x4xf32>
    %146 = vector.broadcast %145 : vector<1x1x4xf32> to vector<16x16x4xf32>
    %147 = arith.mulf %142, %146 : vector<16x16x4xf32>
    %148 = arith.addf %141, %147 : vector<16x16x4xf32>
    %c1_83 = arith.constant 1 : index
    %c1_84 = arith.constant 1 : index
    %c0_85 = arith.constant 0 : index
    %149 = vector.load %arg9[%c1_83, %c1_84, %c0_85] : memref<18x18x4xf32, #tpu.memory_space<vmem>>, vector<16x16x4xf32>
    %150 = vector.extract_strided_slice %119 {offsets = [4, 0], sizes = [1, 4], strides = [1, 1]} : vector<9x4xf32> to vector<1x4xf32>
    %151 = vector.shape_cast %150 : vector<1x4xf32> to vector<4xf32>
    %152 = vector.shape_cast %151 : vector<4xf32> to vector<1x1x4xf32>
    %153 = vector.broadcast %152 : vector<1x1x4xf32> to vector<16x16x4xf32>
    %154 = arith.mulf %149, %153 : vector<16x16x4xf32>
    %155 = arith.addf %148, %154 : vector<16x16x4xf32>
    %c1_86 = arith.constant 1 : index
    %c2_87 = arith.constant 2 : index
    %c0_88 = arith.constant 0 : index
    %156 = vector.load %arg9[%c1_86, %c2_87, %c0_88] : memref<18x18x4xf32, #tpu.memory_space<vmem>>, vector<16x16x4xf32>
    %157 = vector.extract_strided_slice %119 {offsets = [5, 0], sizes = [1, 4], strides = [1, 1]} : vector<9x4xf32> to vector<1x4xf32>
    %158 = vector.shape_cast %157 : vector<1x4xf32> to vector<4xf32>
    %159 = vector.shape_cast %158 : vector<4xf32> to vector<1x1x4xf32>
    %160 = vector.broadcast %159 : vector<1x1x4xf32> to vector<16x16x4xf32>
    %161 = arith.mulf %156, %160 : vector<16x16x4xf32>
    %162 = arith.addf %155, %161 : vector<16x16x4xf32>
    %c2_89 = arith.constant 2 : index
    %c0_90 = arith.constant 0 : index
    %c0_91 = arith.constant 0 : index
    %163 = vector.load %arg9[%c2_89, %c0_90, %c0_91] : memref<18x18x4xf32, #tpu.memory_space<vmem>>, vector<16x16x4xf32>
    %164 = vector.extract_strided_slice %119 {offsets = [6, 0], sizes = [1, 4], strides = [1, 1]} : vector<9x4xf32> to vector<1x4xf32>
    %165 = vector.shape_cast %164 : vector<1x4xf32> to vector<4xf32>
    %166 = vector.shape_cast %165 : vector<4xf32> to vector<1x1x4xf32>
    %167 = vector.broadcast %166 : vector<1x1x4xf32> to vector<16x16x4xf32>
    %168 = arith.mulf %163, %167 : vector<16x16x4xf32>
    %169 = arith.addf %162, %168 : vector<16x16x4xf32>
    %c2_92 = arith.constant 2 : index
    %c1_93 = arith.constant 1 : index
    %c0_94 = arith.constant 0 : index
    %170 = vector.load %arg9[%c2_92, %c1_93, %c0_94] : memref<18x18x4xf32, #tpu.memory_space<vmem>>, vector<16x16x4xf32>
    %171 = vector.extract_strided_slice %119 {offsets = [7, 0], sizes = [1, 4], strides = [1, 1]} : vector<9x4xf32> to vector<1x4xf32>
    %172 = vector.shape_cast %171 : vector<1x4xf32> to vector<4xf32>
    %173 = vector.shape_cast %172 : vector<4xf32> to vector<1x1x4xf32>
    %174 = vector.broadcast %173 : vector<1x1x4xf32> to vector<16x16x4xf32>
    %175 = arith.mulf %170, %174 : vector<16x16x4xf32>
    %176 = arith.addf %169, %175 : vector<16x16x4xf32>
    %c2_95 = arith.constant 2 : index
    %c2_96 = arith.constant 2 : index
    %c0_97 = arith.constant 0 : index
    %177 = vector.load %arg9[%c2_95, %c2_96, %c0_97] : memref<18x18x4xf32, #tpu.memory_space<vmem>>, vector<16x16x4xf32>
    %178 = vector.extract_strided_slice %119 {offsets = [8, 0], sizes = [1, 4], strides = [1, 1]} : vector<9x4xf32> to vector<1x4xf32>
    %179 = vector.shape_cast %178 : vector<1x4xf32> to vector<4xf32>
    %180 = vector.shape_cast %179 : vector<4xf32> to vector<1x1x4xf32>
    %181 = vector.broadcast %180 : vector<1x1x4xf32> to vector<16x16x4xf32>
    %182 = arith.mulf %177, %181 : vector<16x16x4xf32>
    %183 = arith.addf %176, %182 : vector<16x16x4xf32>
    %184 = vector.shape_cast %183 : vector<16x16x4xf32> to vector<256x4xf32>
    %185 = arith.truncf %184 : vector<256x4xf32> to vector<256x4xbf16>
    %c0_98 = arith.constant 0 : index
    %c0_99 = arith.constant 0 : index
    %186 = vector.load %arg6[%c0_98, %c0_99] : memref<4x8xbf16, #tpu.memory_space<vmem>>, vector<4x8xbf16>
    %cst_100 = arith.constant dense<0.000000e+00> : vector<256x8xf32>
    %187 = tpu.matmul %185, %186, %cst_100 {dimension_numbers = #tpu.dot_dimension_numbers<[1], [0], [0], [1], [0, 0, 1, 1], [], []>} : vector<256x4xbf16>, vector<4x8xbf16>, vector<256x8xf32> -> vector<256x8xf32>
    %c0_101 = arith.constant 0 : index
    %c0_102 = arith.constant 0 : index
    %188 = vector.load %arg7[%c0_101, %c0_102] : memref<2x8xf32, #tpu.memory_space<vmem>>, vector<2x8xf32>
    %189 = vector.extract_strided_slice %188 {offsets = [0, 0], sizes = [1, 8], strides = [1, 1]} : vector<2x8xf32> to vector<1x8xf32>
    %190 = vector.shape_cast %189 : vector<1x8xf32> to vector<8xf32>
    %191 = vector.shape_cast %190 : vector<8xf32> to vector<1x8xf32>
    %192 = vector.broadcast %191 : vector<1x8xf32> to vector<256x8xf32>
    %193 = arith.mulf %187, %192 : vector<256x8xf32>
    %194 = vector.extract_strided_slice %188 {offsets = [1, 0], sizes = [1, 8], strides = [1, 1]} : vector<2x8xf32> to vector<1x8xf32>
    %195 = vector.shape_cast %194 : vector<1x8xf32> to vector<8xf32>
    %196 = vector.shape_cast %195 : vector<8xf32> to vector<1x8xf32>
    %197 = vector.broadcast %196 : vector<1x8xf32> to vector<256x8xf32>
    %198 = arith.addf %193, %197 : vector<256x8xf32>
    %199 = vector.shape_cast %198 : vector<256x8xf32> to vector<16x16x8xf32>
    %c0_103 = arith.constant 0 : index
    %c0_104 = arith.constant 0 : index
    %c0_105 = arith.constant 0 : index
    %c0_106 = arith.constant 0 : index
    %200 = vector.load %arg8[%c0_103, %c0_104, %c0_105, %c0_106] : memref<1x16x16x8xf32, #tpu.memory_space<vmem>>, vector<1x16x16x8xf32>
    %201 = vector.shape_cast %200 : vector<1x16x16x8xf32> to vector<16x16x8xf32>
    %202 = vector.shape_cast %199 : vector<16x16x8xf32> to vector<1x16x16x8xf32>
    tpu.vector_store %arg8[%c0_103, %c0_104, %c0_105, %c0_106], %202 {strides = array<i32>} : memref<1x16x16x8xf32, #tpu.memory_space<vmem>>, vector<1x16x16x8xf32>,
    return
  }
  func.func @transform_0(%arg0: i32) -> (i32, i32, i32, i32) {
    %c0_i32 = arith.constant 0 : i32
    %c0_i32_0 = arith.constant 0 : i32
    %c0_i32_1 = arith.constant 0 : i32
    %c0_i32_2 = arith.constant 0 : i32
    return %arg0, %c0_i32, %c0_i32_0, %c0_i32_1 : i32, i32, i32, i32
  }
  func.func @transform_1(%arg0: i32) -> (i32, i32) {
    %c0_i32 = arith.constant 0 : i32
    %c0_i32_0 = arith.constant 0 : i32
    %c0_i32_1 = arith.constant 0 : i32
    return %c0_i32, %c0_i32_0 : i32, i32
  }
  func.func @transform_2(%arg0: i32) -> (i32, i32) {
    %c0_i32 = arith.constant 0 : i32
    %c0_i32_0 = arith.constant 0 : i32
    %c0_i32_1 = arith.constant 0 : i32
    return %c0_i32, %c0_i32_0 : i32, i32
  }
  func.func @transform_3(%arg0: i32) -> (i32, i32) {
    %c0_i32 = arith.constant 0 : i32
    %c0_i32_0 = arith.constant 0 : i32
    %c0_i32_1 = arith.constant 0 : i32
    return %c0_i32, %c0_i32_0 : i32, i32
  }
  func.func @transform_4(%arg0: i32) -> (i32, i32) {
    %c0_i32 = arith.constant 0 : i32
    %c0_i32_0 = arith.constant 0 : i32
    %c0_i32_1 = arith.constant 0 : i32
    return %c0_i32, %c0_i32_0 : i32, i32
  }
  func.func @transform_5(%arg0: i32) -> (i32, i32) {
    %c0_i32 = arith.constant 0 : i32
    %c0_i32_0 = arith.constant 0 : i32
    %c0_i32_1 = arith.constant 0 : i32
    return %c0_i32, %c0_i32_0 : i32, i32
  }
  func.func @transform_6(%arg0: i32) -> (i32, i32) {
    %c0_i32 = arith.constant 0 : i32
    %c0_i32_0 = arith.constant 0 : i32
    %c0_i32_1 = arith.constant 0 : i32
    return %c0_i32, %c0_i32_0 : i32, i32
  }
  func.func @transform_7(%arg0: i32) -> (i32, i32, i32, i32) {
    %c0_i32 = arith.constant 0 : i32
    %c0_i32_0 = arith.constant 0 : i32
    %c0_i32_1 = arith.constant 0 : i32
    %c0_i32_2 = arith.constant 0 : i32
    return %arg0, %c0_i32, %c0_i32_0, %c0_i32_1 : i32, i32, i32, i32
  }
}

</mosaic_0001>

<bundles_post_ra>
// kernel: tpu_custom_call.1
= control target key start
LH: loop header
LB: loop body
LE: loop exit
PB: predicated region body
PF: predicated region fallthrough
CT: control target
= control target key end

     0   :  { %s3577_s24 = smov 0   ;;  %s5235_s0 = inlined_call_operand.vmem [shape: f32[2,18,18,4], index: 0, kind: input, shape index: {}]   ;;  %s5236_s1 = inlined_call_operand.vmem [shape: f32[9,4], index: 1, kind: input, shape index: {}]   ;;  %s5237_s2 = inlined_call_operand.vmem [shape: bf16[4,4], index: 2, kind: input, shape index: {}]   ;;  %s5238_s3 = inlined_call_operand.vmem [shape: f32[2,4], index: 3, kind: input, shape index: {}]   ;;  %s5239_s4 = inlined_call_operand.vmem [shape: f32[9,4], index: 4, kind: input, shape index: {}]   ;;  %s5240_s5 = inlined_call_operand.vmem [shape: bf16[4,8], index: 5, kind: input, shape index: {}]   ;;  %s5241_s6 = inlined_call_operand.vmem [shape: f32[2,8], index: 6, kind: input, shape index: {}]   ;;  %s5242_s7 = inlined_call_operand.vmem [shape: f32[2,16,16,8], index: 7, kind: output, shape index: {}]  }
   0x1 LB: > { %s3175_s25 = sadd.s32 4294967295, %s3534_s24   ;;  %p3179_p0 = scmp.ge.s32.totalorder %s3534_s24, 1  ;;  %s3534_s24 = sphi %s3577_s24, %s17_s24  }
   0x2   : > { %p237_p1 = scmp.lt.s32.totalorder %s3534_s24, 3 }
   0x4   : > { %p238_p2 = pnand %p3179_p0, %p237_p1 }
   0x5   : > { %v1488_v0 = vld [vmem:[%s5237_s2] sm:$0x3] (!%p238_p2)  ;;  %vm1538_vm0 = vcmask (!%p238_p2), 1041408   ;;  %p269_p3 = scmp.lt.s32.totalorder (!%p238_p2), %s3175_s25, 1  ;;  %v346_v1 = vlaneseq (!%p238_p2)  ;;  %vm1489_vm1 = vcmask (!%p238_p2), 31744   ;;  %vm1778_vm2 = vcmask (!%p238_p2), 25600  }
   0x6   : > { %241 = sbr.rel (%p238_p2) target bundleno = 669 (0x29d), region = 48  ;;  %3514 = vmatprep.subr.msk.bf16.mxu0 (!%p238_p2), %vm1538_vm0, %v1488_v0  ;;  %v1540_v2 = vsel (!%p238_p2), %vm1538_vm0, %v1488_v0, 0  ;;  %v280_v4 = vld [vmem:[%s5236_s1] sm:$0xff] (!%p238_p2)  ;;  %vm1785_vm3 = vcmask (!%p238_p2), 24576   ;;  %vm3087_vm4 = vcmask (!%p238_p2), 64512  }
   0x7   : > { %3447 = vmatpush3.bf16.msra.mxu0 (!%p238_p2), %v1540_v2  ;;  %v3592_v3 = vshrl.u32 (!%p238_p2), %v346_v1, 7 }
   0x9   : > { %v3599_v5 = vsub.s32 (!%p238_p2), 0, %v3592_v3  ;;  %v3602_v6 = vsub.s32 (!%p238_p2), 1, %v3592_v3  ;;  %v612_v7 = vsub.s32 (!%p238_p2), 2, %v3592_v3  ;;  %v745_v8 = vsub.s32 (!%p238_p2), 3, %v3592_v3 }
   0xa   : > { %v877_v9 = vsub.s32 (!%p238_p2), 4, %v3592_v3  ;;  %v1009_v10 = vsub.s32 (!%p238_p2), 5, %v3592_v3  ;;  %v1142_v11 = vsub.s32 (!%p238_p2), 6, %v3592_v3  ;;  %v1274_v12 = vsub.s32 (!%p238_p2), 7, %v3592_v3 }
   0xb   : > { %v3616_v13 = vrot.slane (!%p238_p2), %v280_v4, %v3599_v5  ;;  %v3619_v14 = vrot.slane (!%p238_p2), %v280_v4, %v3602_v6  ;;  %v3626_v18 = vrot.slane (!%p238_p2), %v280_v4, %v612_v7  ;;  %v3630_v19 = vrot.slane (!%p238_p2), %v280_v4, %v745_v8 }
   0xc   : > { %v3634_v20 = vrot.slane (!%p238_p2), %v280_v4, %v877_v9  ;;  %v3638_v21 = vrot.slane (!%p238_p2), %v280_v4, %v1009_v10  ;;  %v3645_v28 = vrot.slane (!%p238_p2), %v280_v4, %v1142_v11  ;;  %v3652_v35 = vrot.slane (!%p238_p2), %v280_v4, %v1274_v12 }
   0xd   : > { %s5244_s25 = smov (!%p269_p3, %s3175_s25), 1 }
   0xe   : > { %s3516_s30 = smul.u32 432, %s5244_s25  ;;  %s3411_s29 = sshll.u32 %s5244_s25, 8 }
   0xf   : > { %s5103_s9 = scalar_lea.vmem %s5242_s7, %s3411_s29 }
  0x10   : > { %s3613_s10 = scalar_lea.vmem %s5235_s0, %s3516_s30 }
  0x11   : > { %v282_v15 = vld [vmem:[%s3613_s10] sm:$0xff]  ;;  %v283_v16 = vld [vmem:[%s3613_s10 + $0x8] sm:$0xff]  ;;  %v3183_v32 = vld [vmem:[%s3613_s10 + $0x18] sm:$0xff] }
  0x12   : > { %v414_v17 = vld [vmem:[%s3613_s10 + $0x1] sm:$0xff]  ;;  %v314_v22 = vmax.f32 %v282_v15, 0.0  ;;  %v315_v23 = vmax.f32 %v283_v16, 0.0  ;;  %v415_v24 = vld [vmem:[%s3613_s10 + $0x9] sm:$0xff]  ;;  %v3215_v34 = vld [vmem:[%s3613_s10 + $0x19] sm:$0xff]  ;;  %v711_v39 = vmax.f32 %v3183_v32, 0.0 }
  0x13   : > { %v446_v25 = vmax.f32 %v414_v17, 0.0  ;;  %v546_v26 = vld [vmem:[%s3613_s10 + $0x2] sm:$0xff]  ;;  %v547_v27 = vld [vmem:[%s3613_s10 + $0xa] sm:$0xff]  ;;  %v447_v29 = vmax.f32 %v415_v24, 0.0  ;;  %v3247_v41 = vld [vmem:[%s3613_s10 + $0x1a] sm:$0xff]  ;;  %v843_v50 = vmax.f32 %v3215_v34, 0.0 }
  0x14   : > { %v578_v30 = vmax.f32 %v546_v26, 0.0  ;;  %v579_v31 = vmax.f32 %v547_v27, 0.0  ;;  %v3184_v33 = vld [vmem:[%s3613_s10 + $0x20] sm:$0xff]  ;;  %v350_v36 = vmul.f32 %v3616_v13, %v314_v22  ;;  %v351_v37 = vmul.f32 %v3616_v13, %v315_v23  ;;  %v3279_v47 = vld [vmem:[%s3613_s10 + $0x30] sm:$0xff]  ;;  %v3280_v52 = vld [vmem:[%s3613_s10 + $0x38] sm:$0xff] }
  0x15   : > { %v482_v38 = vmul.f32 %v3619_v14, %v446_v25  ;;  %v3216_v40 = vld [vmem:[%s3613_s10 + $0x21] sm:$0xff]  ;;  %v483_v43 = vmul.f32 %v3619_v14, %v447_v29  ;;  %v712_v46 = vmax.f32 %v3184_v33, 0.0  ;;  %v747_v49 = vmul.f32 %v3630_v19, %v711_v39  ;;  %v3311_v57 = vld [vmem:[%s3613_s10 + $0x31] sm:$0xff]  ;;  %v3312_v58 = vld [vmem:[%s3613_s10 + $0x39] sm:$0xff] }
  0x16   : > { %v3248_v42 = vld [vmem:[%s3613_s10 + $0x22] sm:$0xff]  ;;  %v614_v44 = vmul.f32 %v3626_v18, %v578_v30  ;;  %v615_v45 = vmul.f32 %v3626_v18, %v579_v31  ;;  %v844_v51 = vmax.f32 %v3216_v40, 0.0  ;;  %v975_v55 = vmax.f32 %v3247_v41, 0.0  ;;  %v3343_v63 = vld [vmem:[%s3613_s10 + $0x32] sm:$0xff]  ;;  %v3344_v0 = vld [vmem:[%s3613_s10 + $0x3a] sm:$0xff] }
  0x17   : > { %v514_v48 = vadd.f32 %v482_v38, %v350_v36  ;;  %v515_v53 = vadd.f32 %v483_v43, %v351_v37  ;;  %v748_v54 = vmul.f32 %v3630_v19, %v712_v46  ;;  %v976_v56 = vmax.f32 %v3248_v42, 0.0  ;;  %v3682_v16 = vld [vmem:[%s5236_s1 + $0x8] ss:$0 sm:$0xff] }
  0x18   : > { %v879_v60 = vmul.f32 %v3634_v20, %v843_v50  ;;  %v880_v61 = vmul.f32 %v3634_v20, %v844_v51  ;;  %v3671_v62 = vmax.f32 %v3279_v47, 0.0  ;;  %v1011_v2 = vmul.f32 %v3638_v21, %v975_v55 }
  0x19   : > { %v646_v59 = vadd.f32 %v614_v44, %v514_v48  ;;  %v647_v1 = vadd.f32 %v615_v45, %v515_v53  ;;  %v1012_v4 = vmul.f32 %v3638_v21, %v976_v56  ;;  %v3677_v15 = vmax.f32 %v3280_v52, 0.0 }
  0x1a   : > { %v1144_v22 = vmul.f32 %v3645_v28, %v3671_v62  ;;  %v1240_v23 = vmax.f32 %v3311_v57, 0.0  ;;  %v3686_v24 = vmax.f32 %v3312_v58, 0.0  ;;  %v3690_v27 = vmax.f32 %v3343_v63, 0.0 }
  0x1b   : > { %v779_v17 = vadd.f32 %v747_v49, %v646_v59  ;;  %v780_v25 = vadd.f32 %v748_v54, %v647_v1  ;;  %v1145_v26 = vmul.f32 %v3645_v28, %v3677_v15  ;;  %v3692_v29 = vmax.f32 %v3344_v0, 0.0  ;;  %v3314_v54 = vld [vmem:[%s3613_s10 + $0x51] sm:$0xff] }
  0x1c   : > { %v1276_v31 = vmul.f32 %v3652_v35, %v1240_v23  ;;  %v1277_v32 = vmul.f32 %v3652_v35, %v3686_v24  ;;  %v352_v33 = vmul.f32 %v711_v39, %v3616_v13  ;;  %v1408_v36 = vmul.f32 %v3682_v16, %v3690_v27 }
  0x1d   : > { %v911_v30 = vadd.f32 %v879_v60, %v779_v17  ;;  %v912_v34 = vadd.f32 %v880_v61, %v780_v25  ;;  %v1409_v37 = vmul.f32 %v3682_v16, %v3692_v29  ;;  %v353_v38 = vmul.f32 %v712_v46, %v3616_v13  ;;  %v3281_v46 = vld [vmem:[%s3613_s10 + $0x48] sm:$0xff] }
  0x1e   : > { %v484_v41 = vmul.f32 %v843_v50, %v3619_v14  ;;  %v485_v42 = vmul.f32 %v844_v51, %v3619_v14  ;;  %v616_v39 = vmul.f32 %v975_v55, %v3626_v18  ;;  %v617_v44 = vmul.f32 %v976_v56, %v3626_v18  ;;  %v3282_v50 = vld [vmem:[%s3613_s10 + $0x50] sm:$0xff] }
  0x1f   : > { %v1043_v40 = vadd.f32 %v1011_v2, %v911_v30  ;;  %v1044_v43 = vadd.f32 %v1012_v4, %v912_v34  ;;  %v749_v45 = vmul.f32 %v3671_v62, %v3630_v19  ;;  %v750_v47 = vmul.f32 %v3677_v15, %v3630_v19  ;;  %v3313_v51 = vld [vmem:[%s3613_s10 + $0x49] sm:$0xff] }
  0x20   : > { %v516_v49 = vadd.f32 %v484_v41, %v352_v33  ;;  %v517_v52 = vadd.f32 %v485_v42, %v353_v38  ;;  %v881_v53 = vmul.f32 %v1240_v23, %v3634_v20  ;;  %v882_v56 = vmul.f32 %v3686_v24, %v3634_v20  ;;  %v3345_v17 = vld [vmem:[%s3613_s10 + $0x4a] sm:$0xff] }
  0x21   : > { %v1176_v48 = vadd.f32 %v1144_v22, %v1043_v40  ;;  %v1177_v55 = vadd.f32 %v1145_v26, %v1044_v43  ;;  %v1013_v57 = vmul.f32 %v3690_v27, %v3638_v21  ;;  %v1014_v58 = vmul.f32 %v3692_v29, %v3638_v21  ;;  %v3346_v22 = vld [vmem:[%s3613_s10 + $0x52] sm:$0xff] }
  0x22   : > { %v648_v60 = vadd.f32 %v616_v39, %v516_v49  ;;  %v649_v61 = vadd.f32 %v617_v44, %v517_v52  ;;  %v3722_v63 = vmax.f32 %v3281_v46, 0.0  ;;  %v3724_v1 = vmax.f32 %v3282_v50, 0.0 }
  0x23   : > { %v1308_v59 = vadd.f32 %v1276_v31, %v1176_v48  ;;  %v1309_v0 = vadd.f32 %v1277_v32, %v1177_v55  ;;  %v3726_v2 = vmax.f32 %v3313_v51, 0.0  ;;  %v3728_v4 = vmax.f32 %v3314_v54, 0.0  ;;  %v3283_v54 = vld [vmem:[%s3613_s10 + $0x60] sm:$0xff]  ;;  %v3284_v55 = vld [vmem:[%s3613_s10 + $0x68] sm:$0xff] }
  0x24   : > { %v781_v26 = vadd.f32 %v749_v45, %v648_v60  ;;  %v782_v30 = vadd.f32 %v750_v47, %v649_v61  ;;  %v1146_v33 = vmul.f32 %v3645_v28, %v3722_v63  ;;  %v1147_v34 = vmul.f32 %v3645_v28, %v3724_v1 }
  0x25   : > { %v1440_v25 = vadd.f32 %v1408_v36, %v1308_v59  ;;  %v1441_v31 = vadd.f32 %v1409_v37, %v1309_v0  ;;  %v1278_v32 = vmul.f32 %v3652_v35, %v3726_v2  ;;  %v1279_v38 = vmul.f32 %v3652_v35, %v3728_v4 }
  0x26   : > { %v913_v40 = vadd.f32 %v881_v53, %v781_v26  ;;  %v914_v41 = vadd.f32 %v882_v56, %v782_v30  ;;  %v1374_v42 = vmax.f32 %v3345_v17, 0.0  ;;  %v3740_v39 = vmax.f32 %v3346_v22, 0.0  ;;  %v3347_v30 = vld [vmem:[%s3613_s10 + $0x62] sm:$0xff] }
  0x27   : > { %v1472_v36 = vpack.c.bf16 %v1441_v31, %v1440_v25  ;;  %v354_v43 = vmul.f32 %v3671_v62, %v3616_v13  ;;  %v355_v37 = vmul.f32 %v3677_v15, %v3616_v13  ;;  %v486_v44 = vmul.f32 %v1240_v23, %v3619_v14 }
  0x28   : > { %v1045_v45 = vadd.f32 %v1013_v57, %v913_v40  ;;  %v1046_v47 = vadd.f32 %v1014_v58, %v914_v41  ;;  %v1410_v46 = vmul.f32 %v3682_v16, %v1374_v42  ;;  %v1411_v48 = vmul.f32 %v3682_v16, %v3740_v39  ;;  %v3316_v58 = vld [vmem:[%s3613_s10 + $0x69] sm:$0xff] }
  0x29   : > { %3448 = vmatprep.mubr.msk.bf16.mxu0 %vm1489_vm1, %v1472_v36  ;;  %v487_v62 = vmul.f32 %v3686_v24, %v3619_v14  ;;  %v518_v49 = vadd.f32 %v486_v44, %v354_v43  ;;  %v618_v15 = vmul.f32 %v3690_v27, %v3626_v18  ;;  %v619_v23 = vmul.f32 %v3692_v29, %v3626_v18  ;;  %v3315_v29 = vld [vmem:[%s3613_s10 + $0x61] sm:$0xff] }
  0x2a   : > { %v1178_v52 = vadd.f32 %v1146_v33, %v1045_v45  ;;  %v1179_v53 = vadd.f32 %v1147_v34, %v1046_v47  ;;  %v751_v50 = vmul.f32 %v3722_v63, %v3630_v19  ;;  %v752_v51 = vmul.f32 %v3724_v1, %v3630_v19 }
  0x2b   : > { %v519_v56 = vadd.f32 %v487_v62, %v355_v37  ;;  %v650_v24 = vadd.f32 %v618_v15, %v518_v49  ;;  %v883_v57 = vmul.f32 %v3726_v2, %v3634_v20  ;;  %v884_v27 = vmul.f32 %v3728_v4, %v3634_v20 }
  0x2c   : > { %v1310_v59 = vadd.f32 %v1278_v32, %v1178_v52  ;;  %v1311_v60 = vadd.f32 %v1279_v38, %v1179_v53  ;;  %v1015_v61 = vmul.f32 %v1374_v42, %v3638_v21  ;;  %v1016_v0 = vmul.f32 %v3740_v39, %v3638_v21  ;;  %v3348_v32 = vld [vmem:[%s3613_s10 + $0x6a] sm:$0xff] }
  0x2d   : > { %v651_v17 = vadd.f32 %v619_v23, %v519_v56  ;;  %v783_v22 = vadd.f32 %v751_v50, %v650_v24  ;;  %v3772_v25 = vmax.f32 %v3283_v54, 0.0  ;;  %v3774_v26 = vmax.f32 %v3284_v55, 0.0  ;;  %v3285_v24 = vld [vmem:[%s3613_s10 + $0x78] sm:$0xff] }
  0x2e   : > { %v1442_v33 = vadd.f32 %v1410_v46, %v1310_v59  ;;  %v1443_v31 = vadd.f32 %v1411_v48, %v1311_v60  ;;  %v3777_v34 = vmax.f32 %v3315_v29, 0.0  ;;  %v3779_v40 = vmax.f32 %v3316_v58, 0.0  ;;  %v3317_v58 = vld [vmem:[%s3613_s10 + $0x79] sm:$0xff] }
  0x2f   : > { %v784_v38 = vadd.f32 %v752_v51, %v651_v17  ;;  %v915_v41 = vadd.f32 %v883_v57, %v783_v22  ;;  %v1148_v36 = vmul.f32 %v3645_v28, %v3772_v25  ;;  %v1149_v43 = vmul.f32 %v3645_v28, %v3774_v26  ;;  %v3349_v17 = vld [vmem:[%s3613_s10 + $0x7a] sm:$0xff] }
  0x30   : > { %v1473_v37 = vpack.c.bf16 %v1443_v31, %v1442_v33  ;;  %v1280_v44 = vmul.f32 %v3652_v35, %v3777_v34  ;;  %v1281_v45 = vmul.f32 %v3652_v35, %v3779_v40  ;;  %v1376_v47 = vmax.f32 %v3347_v30, 0.0 }
  0x31   : > { %v916_v46 = vadd.f32 %v884_v27, %v784_v38  ;;  %v1047_v48 = vadd.f32 %v1015_v61, %v915_v41  ;;  %v1377_v62 = vmax.f32 %v3348_v32, 0.0  ;;  %v356_v49 = vmul.f32 %v3722_v63, %v3616_v13 }
  0x32   : > { %3449 = vmatmul.mubr.msk.bf16.vlgmr.msra.gmra.mrb[0].mxu0 %vm1489_vm1, %v1473_v37  ;;  %v1412_v15 = vmul.f32 %v3682_v16, %v1376_v47  ;;  %v357_v23 = vmul.f32 %v3724_v1, %v3616_v13  ;;  %v488_v52 = vmul.f32 %v3726_v2, %v3619_v14  ;;  %v489_v53 = vmul.f32 %v3728_v4, %v3619_v14 }
  0x33   : > { %v1048_v50 = vadd.f32 %v1016_v0, %v916_v46  ;;  %v1180_v51 = vadd.f32 %v1148_v36, %v1047_v48  ;;  %v1413_v54 = vmul.f32 %v3682_v16, %v1377_v62  ;;  %v620_v63 = vmul.f32 %v1374_v42, %v3626_v18  ;;  %v3286_v42 = vld [vmem:[%s3613_s10 + $0x80] sm:$0xff] }
  0x34   : > { %v520_v55 = vadd.f32 %v488_v52, %v356_v49  ;;  %v521_v56 = vadd.f32 %v489_v53, %v357_v23  ;;  %v621_v1 = vmul.f32 %v3740_v39, %v3626_v18  ;;  %v753_v2 = vmul.f32 %v3772_v25, %v3630_v19  ;;  %v3318_v0 = vld [vmem:[%s3613_s10 + $0x81] sm:$0xff] }
  0x35   : > { %v1181_v57 = vadd.f32 %v1149_v43, %v1048_v50  ;;  %v1312_v27 = vadd.f32 %v1280_v44, %v1180_v51  ;;  %v754_v4 = vmul.f32 %v3774_v26, %v3630_v19  ;;  %v885_v29 = vmul.f32 %v3777_v34, %v3634_v20  ;;  %v3350_v43 = vld [vmem:[%s3613_s10 + $0x82] sm:$0xff] }
  0x36   : > { %v652_v59 = vadd.f32 %v620_v63, %v520_v55  ;;  %v653_v60 = vadd.f32 %v621_v1, %v521_v56  ;;  %v886_v39 = vmul.f32 %v3779_v40, %v3634_v20  ;;  %v1017_v61 = vmul.f32 %v1376_v47, %v3638_v21 }
  0x37   : > { %v1313_v22 = vadd.f32 %v1281_v45, %v1181_v57  ;;  %v1444_v30 = vadd.f32 %v1412_v15, %v1312_v27  ;;  %v1018_v33 = vmul.f32 %v1377_v62, %v3638_v21  ;;  %v3819_v31 = vmax.f32 %v3285_v24, 0.0 }
  0x38   : > { %v785_v32 = vadd.f32 %v753_v2, %v652_v59  ;;  %v786_v38 = vadd.f32 %v754_v4, %v653_v60  ;;  %v3821_v41 = vmax.f32 %v3286_v42, 0.0  ;;  %v3823_v36 = vmax.f32 %v3317_v58, 0.0  ;;  %v3288_v59 = vld [vmem:[%s3613_s10 + $0x98] sm:$0xff] }
  0x39   : > { %v1445_v37 = vadd.f32 %v1413_v54, %v1313_v22  ;;  %v1150_v44 = vmul.f32 %v3645_v28, %v3819_v31  ;;  %v3828_v46 = vmax.f32 %v3318_v0, 0.0  ;;  %v3830_v48 = vmax.f32 %v3349_v17, 0.0  ;;  %v3320_v0 = vld [vmem:[%s3613_s10 + $0x99] sm:$0xff] }
  0x3a   : > { %v917_v45 = vadd.f32 %v885_v29, %v785_v32  ;;  %v918_v49 = vadd.f32 %v886_v39, %v786_v38  ;;  %v1151_v15 = vmul.f32 %v3645_v28, %v3821_v41  ;;  %v1282_v23 = vmul.f32 %v3652_v35, %v3823_v36  ;;  %v3287_v29 = vld [vmem:[%s3613_s10 + $0x90] sm:$0xff] }
  0x3b   : > { %v1474_v52 = vpack.c.bf16 %v1445_v37, %v1444_v30  ;;  %v1283_v53 = vmul.f32 %v3652_v35, %v3828_v46  ;;  %v1379_v50 = vmax.f32 %v3350_v43, 0.0  ;;  %v1414_v51 = vmul.f32 %v3682_v16, %v3830_v48  ;;  %v3351_v32 = vld [vmem:[%s3613_s10 + $0x92] sm:$0xff] }
  0x3c   : > { %v1049_v54 = vadd.f32 %v1017_v61, %v917_v45  ;;  %v1050_v63 = vadd.f32 %v1018_v33, %v918_v49  ;;  %v358_v55 = vmul.f32 %v3772_v25, %v3616_v13  ;;  %v359_v56 = vmul.f32 %v3774_v26, %v3616_v13  ;;  %v3352_v45 = vld [vmem:[%s3613_s10 + $0x9a] sm:$0xff] }
  0x3d   : > { %3452 = vmatprep.mubr.msk.bf16.mxu0 %vm1489_vm1, %v1474_v52  ;;  %v1415_v1 = vmul.f32 %v3682_v16, %v1379_v50  ;;  %v490_v2 = vmul.f32 %v3777_v34, %v3619_v14  ;;  %v491_v24 = vmul.f32 %v3779_v40, %v3619_v14  ;;  %v622_v57 = vmul.f32 %v1376_v47, %v3626_v18  ;;  %v3319_v47 = vld [vmem:[%s3613_s10 + $0x91] sm:$0xff] }
  0x3e   : > { %v1182_v27 = vadd.f32 %v1150_v44, %v1049_v54  ;;  %v1183_v25 = vadd.f32 %v1151_v15, %v1050_v63  ;;  %v623_v4 = vmul.f32 %v1377_v62, %v3626_v18  ;;  %v755_v26 = vmul.f32 %v3819_v31, %v3630_v19 }
  0x3f   : > { %v522_v42 = vadd.f32 %v490_v2, %v358_v55  ;;  %v523_v58 = vadd.f32 %v491_v24, %v359_v56  ;;  %v756_v34 = vmul.f32 %v3821_v41, %v3630_v19  ;;  %v887_v40 = vmul.f32 %v3823_v36, %v3634_v20 }
  0x40   : > { %v1314_v60 = vadd.f32 %v1282_v23, %v1182_v27  ;;  %v1315_v39 = vadd.f32 %v1283_v53, %v1183_v25  ;;  %v888_v62 = vmul.f32 %v3828_v46, %v3634_v20  ;;  %v1019_v61 = vmul.f32 %v3830_v48, %v3638_v21 }
  0x41   : > { %v654_v17 = vadd.f32 %v622_v57, %v522_v42  ;;  %v655_v22 = vadd.f32 %v623_v4, %v523_v58  ;;  %v1020_v30 = vmul.f32 %v1379_v50, %v3638_v21  ;;  %v3867_v33 = vmax.f32 %v3287_v29, 0.0 }
  0x42   : > { %v1446_v38 = vadd.f32 %v1414_v51, %v1314_v60  ;;  %v1447_v43 = vadd.f32 %v1415_v1, %v1315_v39  ;;  %v3870_v37 = vmax.f32 %v3288_v59, 0.0  ;;  %v3872_v44 = vmax.f32 %v3319_v47, 0.0  ;;  %v3289_v60 = vld [vmem:[%s3613_s10 + $0xa8] sm:$0xff]  ;;  %v3290_v39 = vld [vmem:[%s3613_s10 + $0xb0] sm:$0xff] }
  0x43   : > { %v787_v49 = vadd.f32 %v755_v26, %v654_v17  ;;  %v788_v15 = vadd.f32 %v756_v34, %v655_v22  ;;  %v1152_v23 = vmul.f32 %v3645_v28, %v3867_v33  ;;  %v3877_v52 = vmax.f32 %v3320_v0, 0.0  ;;  %v3322_v0 = vld [vmem:[%s3613_s10 + $0xb1] sm:$0xff] }
  0x44   : > { %v1475_v53 = vpack.c.bf16 %v1447_v43, %v1446_v38  ;;  %v1153_v54 = vmul.f32 %v3645_v28, %v3870_v37  ;;  %v1284_v51 = vmul.f32 %v3652_v35, %v3872_v44  ;;  %v3883_v63 = vmax.f32 %v3351_v32, 0.0 }
  0x45   : > { %v919_v55 = vadd.f32 %v887_v40, %v787_v49  ;;  %v920_v56 = vadd.f32 %v888_v62, %v788_v15  ;;  %v1285_v1 = vmul.f32 %v3652_v35, %v3877_v52  ;;  %v1381_v2 = vmax.f32 %v3352_v45, 0.0  ;;  %v3353_v15 = vld [vmem:[%s3613_s10 + $0xaa] sm:$0xff] }
  0x46   : > { %3453 = vmatmul.mubr.msk.bf16.gmra.mrb[4].mxu0 %vm1489_vm1, %v1475_v53  ;;  %v1416_v24 = vmul.f32 %v3682_v16, %v3883_v63  ;;  %v360_v57 = vmul.f32 %v3819_v31, %v3616_v13  ;;  %v361_v27 = vmul.f32 %v3821_v41, %v3616_v13  ;;  %v492_v25 = vmul.f32 %v3823_v36, %v3619_v14 }
  0x47   : > { %v1051_v4 = vadd.f32 %v1019_v61, %v919_v55  ;;  %v1052_v26 = vadd.f32 %v1020_v30, %v920_v56  ;;  %v1417_v29 = vmul.f32 %v3682_v16, %v1381_v2  ;;  %v493_v42 = vmul.f32 %v3828_v46, %v3619_v14  ;;  %v3321_v46 = vld [vmem:[%s3613_s10 + $0xa9] sm:$0xff]  ;;  %v3354_v56 = vld [vmem:[%s3613_s10 + $0xb2] sm:$0xff] }
  0x48   : > { %v524_v58 = vadd.f32 %v492_v25, %v360_v57  ;;  %v624_v31 = vmul.f32 %v3830_v48, %v3626_v18  ;;  %v625_v34 = vmul.f32 %v1379_v50, %v3626_v18  ;;  %v757_v41 = vmul.f32 %v3867_v33, %v3630_v19 }
  0x49   : > { %v1184_v40 = vadd.f32 %v1152_v23, %v1051_v4  ;;  %v1185_v59 = vadd.f32 %v1153_v54, %v1052_v26  ;;  %v525_v36 = vadd.f32 %v493_v42, %v361_v27  ;;  %v758_v47 = vmul.f32 %v3870_v37, %v3630_v19 }
  0x4a   : > { %v656_v62 = vadd.f32 %v624_v31, %v524_v58  ;;  %v889_v61 = vmul.f32 %v3872_v44, %v3634_v20  ;;  %v890_v48 = vmul.f32 %v3877_v52, %v3634_v20  ;;  %v1021_v50 = vmul.f32 %v3883_v63, %v3638_v21 }
  0x4b   : > { %v1316_v17 = vadd.f32 %v1284_v51, %v1184_v40  ;;  %v1317_v22 = vadd.f32 %v1285_v1, %v1185_v59  ;;  %v657_v30 = vadd.f32 %v625_v34, %v525_v36  ;;  %v1022_v32 = vmul.f32 %v1381_v2, %v3638_v21 }
  0x4c   : > { %v789_v38 = vadd.f32 %v757_v41, %v656_v62  ;;  %v3917_v43 = vmax.f32 %v3289_v60, 0.0  ;;  %v3919_v45 = vmax.f32 %v3290_v39, 0.0  ;;  %v3921_v49 = vmax.f32 %v3321_v46, 0.0  ;;  %v3291_v62 = vld [vmem:[%s3613_s10 + $0xc0] sm:$0xff] }
  0x4d   : > { %v1448_v23 = vadd.f32 %v1416_v24, %v1316_v17  ;;  %v1449_v53 = vadd.f32 %v1417_v29, %v1317_v22  ;;  %v790_v54 = vadd.f32 %v758_v47, %v657_v30  ;;  %v3924_v55 = vmax.f32 %v3322_v0, 0.0 }
  0x4e   : > { %v921_v57 = vadd.f32 %v889_v61, %v789_v38  ;;  %v1154_v51 = vmul.f32 %v3645_v28, %v3917_v43  ;;  %v1155_v1 = vmul.f32 %v3645_v28, %v3919_v45  ;;  %v1286_v27 = vmul.f32 %v3652_v35, %v3921_v49  ;;  %v3292_v61 = vld [vmem:[%s3613_s10 + $0xc8] sm:$0xff] }
  0x4f   : > { %v1476_v25 = vpack.c.bf16 %v1449_v53, %v1448_v23  ;;  %v922_v4 = vadd.f32 %v890_v48, %v790_v54  ;;  %v1287_v24 = vmul.f32 %v3652_v35, %v3924_v55  ;;  %v1382_v26 = vmax.f32 %v3353_v15, 0.0  ;;  %v3355_v38 = vld [vmem:[%s3613_s10 + $0xc2] sm:$0xff] }
  0x50   : > { %v1053_v29 = vadd.f32 %v1021_v50, %v921_v57  ;;  %v1383_v42 = vmax.f32 %v3354_v56, 0.0  ;;  %v362_v58 = vmul.f32 %v3867_v33, %v3616_v13  ;;  %v363_v31 = vmul.f32 %v3870_v37, %v3616_v13 }
  0x51   : > { %3456 = vmatprep.mubr.msk.bf16.mxu0 %vm1489_vm1, %v1476_v25  ;;  %v1054_v34 = vadd.f32 %v1022_v32, %v922_v4  ;;  %v1418_v41 = vmul.f32 %v3682_v16, %v1382_v26  ;;  %v494_v40 = vmul.f32 %v3872_v44, %v3619_v14  ;;  %v495_v59 = vmul.f32 %v3877_v52, %v3619_v14  ;;  %v3324_v32 = vld [vmem:[%s3613_s10 + $0xc9] sm:$0xff] }
  0x52   : > { %v1186_v36 = vadd.f32 %v1154_v51, %v1053_v29  ;;  %v1419_v47 = vmul.f32 %v3682_v16, %v1383_v42  ;;  %v626_v33 = vmul.f32 %v3883_v63, %v3626_v18  ;;  %v627_v37 = vmul.f32 %v1381_v2, %v3626_v18  ;;  %v3323_v2 = vld [vmem:[%s3613_s10 + $0xc1] sm:$0xff] }
  0x53   : > { %v1187_v60 = vadd.f32 %v1155_v1, %v1054_v34  ;;  %v526_v39 = vadd.f32 %v494_v40, %v362_v58  ;;  %v527_v46 = vadd.f32 %v495_v59, %v363_v31  ;;  %v759_v44 = vmul.f32 %v3917_v43, %v3630_v19 }
  0x54   : > { %v1318_v48 = vadd.f32 %v1286_v27, %v1186_v36  ;;  %v760_v52 = vmul.f32 %v3919_v45, %v3630_v19  ;;  %v891_v50 = vmul.f32 %v3921_v49, %v3634_v20  ;;  %v892_v63 = vmul.f32 %v3924_v55, %v3634_v20  ;;  %v3356_v27 = vld [vmem:[%s3613_s10 + $0xca] sm:$0xff] }
  0x55   : > { %v1319_v0 = vadd.f32 %v1287_v24, %v1187_v60  ;;  %v658_v17 = vadd.f32 %v626_v33, %v526_v39  ;;  %v659_v22 = vadd.f32 %v627_v37, %v527_v46  ;;  %v1023_v30 = vmul.f32 %v1382_v26, %v3638_v21 }
  0x56   : > { %v1450_v15 = vadd.f32 %v1418_v41, %v1318_v48  ;;  %v1024_v23 = vmul.f32 %v1383_v42, %v3638_v21  ;;  %v3964_v53 = vmax.f32 %v3291_v62, 0.0  ;;  %v3966_v54 = vmax.f32 %v3292_v61, 0.0 }
  0x57   : > { %v1451_v56 = vadd.f32 %v1419_v47, %v1319_v0  ;;  %v791_v57 = vadd.f32 %v759_v44, %v658_v17  ;;  %v792_v51 = vadd.f32 %v760_v52, %v659_v22  ;;  %v3968_v1 = vmax.f32 %v3323_v2, 0.0 }
  0x58   : > { %v1156_v25 = vmul.f32 %v3645_v28, %v3964_v53  ;;  %v1157_v4 = vmul.f32 %v3645_v28, %v3966_v54  ;;  %v3975_v24 = vmax.f32 %v3324_v32, 0.0  ;;  %v3977_v29 = vmax.f32 %v3355_v38, 0.0  ;;  %v3326_v32 = vld [vmem:[%s3613_s10 + $0xe1] sm:$0xff] }
  0x59   : > { %v1477_v58 = vpack.c.bf16 %v1451_v56, %v1450_v15  ;;  %v923_v31 = vadd.f32 %v891_v50, %v791_v57  ;;  %v924_v34 = vadd.f32 %v892_v63, %v792_v51  ;;  %v1288_v41 = vmul.f32 %v3652_v35, %v3968_v1  ;;  %v3293_v50 = vld [vmem:[%s3613_s10 + $0xd8] sm:$0xff]  ;;  %v3294_v63 = vld [vmem:[%s3613_s10 + $0xe0] sm:$0xff] }
  0x5a   : > { %v1289_v40 = vmul.f32 %v3652_v35, %v3975_v24  ;;  %v1385_v59 = vmax.f32 %v3356_v27, 0.0  ;;  %v1420_v36 = vmul.f32 %v3682_v16, %v3977_v29  ;;  %v364_v47 = vmul.f32 %v3917_v43, %v3616_v13  ;;  %v3357_v57 = vld [vmem:[%s3613_s10 + $0xda] sm:$0xff] }
  0x5b   : > { %3457 = vmatmul.mubr.msk.bf16.gmra.mrb[8].mxu0 %vm1489_vm1, %v1477_v58  ;;  %v1055_v33 = vadd.f32 %v1023_v30, %v923_v31  ;;  %v1056_v37 = vadd.f32 %v1024_v23, %v924_v34  ;;  %v365_v60 = vmul.f32 %v3919_v45, %v3616_v13  ;;  %v496_v39 = vmul.f32 %v3921_v49, %v3619_v14  ;;  %v3358_v58 = vld [vmem:[%s3613_s10 + $0xe2] sm:$0xff] }
  0x5c   : > { %v1421_v46 = vmul.f32 %v3682_v16, %v1385_v59  ;;  %v497_v44 = vmul.f32 %v3924_v55, %v3619_v14  ;;  %v628_v62 = vmul.f32 %v1382_v26, %v3626_v18  ;;  %v629_v43 = vmul.f32 %v1383_v42, %v3626_v18  ;;  %v3325_v42 = vld [vmem:[%s3613_s10 + $0xd9] sm:$0xff] }
  0x5d   : > { %v1188_v61 = vadd.f32 %v1156_v25, %v1055_v33  ;;  %v1189_v48 = vadd.f32 %v1157_v4, %v1056_v37  ;;  %v528_v52 = vadd.f32 %v496_v39, %v364_v47  ;;  %v761_v45 = vmul.f32 %v3964_v53, %v3630_v19 }
  0x5e   : > { %v529_v49 = vadd.f32 %v497_v44, %v365_v60  ;;  %v762_v2 = vmul.f32 %v3966_v54, %v3630_v19  ;;  %v893_v55 = vmul.f32 %v3968_v1, %v3634_v20  ;;  %v894_v26 = vmul.f32 %v3975_v24, %v3634_v20 }
  0x5f   : > { %v1320_v0 = vadd.f32 %v1288_v41, %v1188_v61  ;;  %v1321_v17 = vadd.f32 %v1289_v40, %v1189_v48  ;;  %v660_v22 = vadd.f32 %v628_v62, %v528_v52  ;;  %v1025_v30 = vmul.f32 %v3977_v29, %v3638_v21 }
  0x60   : > { %v661_v38 = vadd.f32 %v629_v43, %v529_v49  ;;  %v1026_v15 = vmul.f32 %v1385_v59, %v3638_v21  ;;  %v4012_v23 = vmax.f32 %v3293_v50, 0.0  ;;  %v4014_v56 = vmax.f32 %v3294_v63, 0.0 }
  0x61   : > { %v1452_v51 = vadd.f32 %v1420_v36, %v1320_v0  ;;  %v1453_v27 = vadd.f32 %v1421_v46, %v1321_v17  ;;  %v793_v25 = vadd.f32 %v761_v45, %v660_v22  ;;  %v4017_v4 = vmax.f32 %v3325_v42, 0.0  ;;  %v3296_v0 = vld [vmem:[%s3613_s10 + $0xf8] sm:$0xff] }
  0x62   : > { %v794_v31 = vadd.f32 %v762_v2, %v661_v38  ;;  %v1158_v34 = vmul.f32 %v3645_v28, %v4012_v23  ;;  %v1159_v41 = vmul.f32 %v3645_v28, %v4014_v56  ;;  %v4024_v40 = vmax.f32 %v3326_v32, 0.0  ;;  %v3328_v32 = vld [vmem:[%s3613_s10 + $0xf9] sm:$0xff] }
  0x63   : > { %v1478_v47 = vpack.c.bf16 %v1453_v27, %v1452_v51  ;;  %v925_v33 = vadd.f32 %v893_v55, %v793_v25  ;;  %v1290_v37 = vmul.f32 %v3652_v35, %v4017_v4  ;;  %v1386_v36 = vmax.f32 %v3357_v57, 0.0  ;;  %v3295_v55 = vld [vmem:[%s3613_s10 + $0xf0] sm:$0xff] }
  0x64   : > { %v926_v60 = vadd.f32 %v894_v26, %v794_v31  ;;  %v1291_v39 = vmul.f32 %v3652_v35, %v4024_v40  ;;  %v1387_v46 = vmax.f32 %v3358_v58, 0.0  ;;  %v366_v44 = vmul.f32 %v3964_v53, %v3616_v13  ;;  %v3359_v27 = vld [vmem:[%s3613_s10 + $0xf2] sm:$0xff] }
  0x65   : > { %3460 = vmatprep.mubr.msk.bf16.mxu0 %vm1489_vm1, %v1478_v47  ;;  %v1057_v62 = vadd.f32 %v1025_v30, %v925_v33  ;;  %v1422_v43 = vmul.f32 %v3682_v16, %v1386_v36  ;;  %v367_v61 = vmul.f32 %v3966_v54, %v3616_v13  ;;  %v498_v48 = vmul.f32 %v3968_v1, %v3619_v14 }
  0x66   : > { %v1058_v52 = vadd.f32 %v1026_v15, %v926_v60  ;;  %v1423_v45 = vmul.f32 %v3682_v16, %v1387_v46  ;;  %v499_v50 = vmul.f32 %v3975_v24, %v3619_v14  ;;  %v630_v53 = vmul.f32 %v3977_v29, %v3626_v18  ;;  %v3327_v29 = vld [vmem:[%s3613_s10 + $0xf1] sm:$0xff] }
  0x67   : > { %v1190_v63 = vadd.f32 %v1158_v34, %v1057_v62  ;;  %v530_v49 = vadd.f32 %v498_v48, %v366_v44  ;;  %v631_v2 = vmul.f32 %v1385_v59, %v3626_v18  ;;  %v763_v54 = vmul.f32 %v4012_v23, %v3630_v19 }
  0x68   : > { %v1191_v1 = vadd.f32 %v1159_v41, %v1058_v52  ;;  %v531_v26 = vadd.f32 %v499_v50, %v367_v61  ;;  %v764_v42 = vmul.f32 %v4014_v56, %v3630_v19  ;;  %v895_v24 = vmul.f32 %v4017_v4, %v3634_v20  ;;  %v3360_v41 = vld [vmem:[%s3613_s10 + $0xfa] sm:$0xff] }
  0x69   : > { %v1322_v17 = vadd.f32 %v1290_v37, %v1190_v63  ;;  %v662_v22 = vadd.f32 %v630_v53, %v530_v49  ;;  %v896_v59 = vmul.f32 %v4024_v40, %v3634_v20  ;;  %v1027_v30 = vmul.f32 %v1386_v36, %v3638_v21 }
  0x6a   : > { %v1323_v38 = vadd.f32 %v1291_v39, %v1191_v1  ;;  %v663_v15 = vadd.f32 %v631_v2, %v531_v26  ;;  %v1028_v57 = vmul.f32 %v1387_v46, %v3638_v21  ;;  %v4058_v51 = vmax.f32 %v3295_v55, 0.0 }
  0x6b   : > { %v1454_v25 = vadd.f32 %v1422_v43, %v1322_v17  ;;  %v795_v58 = vadd.f32 %v763_v54, %v662_v22  ;;  %v4061_v31 = vmax.f32 %v3296_v0, 0.0  ;;  %v4063_v34 = vmax.f32 %v3327_v29, 0.0  ;;  %v3298_v22 = vld [vmem:[%s3613_s10 + $0x110] sm:$0xff] }
  0x6c   : > { %v1455_v47 = vadd.f32 %v1423_v45, %v1323_v38  ;;  %v796_v33 = vadd.f32 %v764_v42, %v663_v15  ;;  %v1160_v37 = vmul.f32 %v3645_v28, %v4058_v51  ;;  %v4068_v60 = vmax.f32 %v3328_v32, 0.0  ;;  %v3330_v32 = vld [vmem:[%s3613_s10 + $0x111] sm:$0xff] }
  0x6d   : > { %v927_v39 = vadd.f32 %v895_v24, %v795_v58  ;;  %v1161_v44 = vmul.f32 %v3645_v28, %v4061_v31  ;;  %v1292_v62 = vmul.f32 %v3652_v35, %v4063_v34  ;;  %v1388_v43 = vmax.f32 %v3359_v27, 0.0 }
  0x6e   : > { %v1479_v61 = vpack.c.bf16 %v1455_v47, %v1454_v25  ;;  %v928_v48 = vadd.f32 %v896_v59, %v796_v33  ;;  %v1293_v52 = vmul.f32 %v3652_v35, %v4068_v60  ;;  %v1389_v45 = vmax.f32 %v3360_v41, 0.0  ;;  %v3329_v59 = vld [vmem:[%s3613_s10 + $0x109] sm:$0xff] }
  0x6f   : > { %v1059_v50 = vadd.f32 %v1027_v30, %v927_v39  ;;  %v1424_v53 = vmul.f32 %v3682_v16, %v1388_v43  ;;  %v368_v63 = vmul.f32 %v4012_v23, %v3616_v13  ;;  %v369_v49 = vmul.f32 %v4014_v56, %v3616_v13  ;;  %v3361_v25 = vld [vmem:[%s3613_s10 + $0x10a] sm:$0xff] }
  0x70   : > { %3461 = vmatmul.mubr.msk.bf16.gmra.mrb[12].mxu0 %vm1489_vm1, %v1479_v61  ;;  %v1060_v2 = vadd.f32 %v1028_v57, %v928_v48  ;;  %v1425_v54 = vmul.f32 %v3682_v16, %v1389_v45  ;;  %v500_v55 = vmul.f32 %v4017_v4, %v3619_v14  ;;  %v501_v1 = vmul.f32 %v4024_v40, %v3619_v14  ;;  %v3297_v4 = vld [vmem:[%s3613_s10 + $0x108] sm:$0xff]  ;;  %v3362_v61 = vld [vmem:[%s3613_s10 + $0x112] sm:$0xff] }
  0x71   : > { %v1192_v26 = vadd.f32 %v1160_v37, %v1059_v50  ;;  %v632_v23 = vmul.f32 %v1386_v36, %v3626_v18  ;;  %v633_v42 = vmul.f32 %v1387_v46, %v3626_v18  ;;  %v765_v56 = vmul.f32 %v4058_v51, %v3630_v19 }
  0x72   : > { %v1193_v24 = vadd.f32 %v1161_v44, %v1060_v2  ;;  %v532_v0 = vadd.f32 %v500_v55, %v368_v63  ;;  %v533_v29 = vadd.f32 %v501_v1, %v369_v49  ;;  %v766_v17 = vmul.f32 %v4061_v31, %v3630_v19 }
  0x73   : > { %v1324_v40 = vadd.f32 %v1292_v62, %v1192_v26  ;;  %v897_v30 = vmul.f32 %v4063_v34, %v3634_v20  ;;  %v898_v36 = vmul.f32 %v4068_v60, %v3634_v20  ;;  %v1029_v46 = vmul.f32 %v1388_v43, %v3638_v21 }
  0x74   : > { %v1325_v38 = vadd.f32 %v1293_v52, %v1193_v24  ;;  %v664_v15 = vadd.f32 %v632_v23, %v532_v0  ;;  %v665_v57 = vadd.f32 %v633_v42, %v533_v29  ;;  %v1030_v27 = vmul.f32 %v1389_v45, %v3638_v21 }
  0x75   : > { %v1456_v58 = vadd.f32 %v1424_v53, %v1324_v40  ;;  %v4104_v41 = vmax.f32 %v3297_v4, 0.0  ;;  %v4106_v47 = vmax.f32 %v3298_v22, 0.0  ;;  %v4108_v33 = vmax.f32 %v3329_v59, 0.0 }
  0x76   : > { %v1457_v37 = vadd.f32 %v1425_v54, %v1325_v38  ;;  %v797_v39 = vadd.f32 %v765_v56, %v664_v15  ;;  %v798_v44 = vadd.f32 %v766_v17, %v665_v57  ;;  %v4110_v62 = vmax.f32 %v3330_v32, 0.0 }
  0x77   : > { %v1162_v48 = vmul.f32 %v3645_v28, %v4104_v41  ;;  %v1163_v52 = vmul.f32 %v3645_v28, %v4106_v47  ;;  %v1294_v50 = vmul.f32 %v3652_v35, %v4108_v33  ;;  %v4119_v53 = vmax.f32 %v3361_v25, 0.0 }
  0x78   : > { %v1480_v63 = vpack.c.bf16 %v1457_v37, %v1456_v58  ;;  %v929_v49 = vadd.f32 %v897_v30, %v797_v39  ;;  %v930_v2 = vadd.f32 %v898_v36, %v798_v44  ;;  %v1295_v54 = vmul.f32 %v3652_v35, %v4110_v62  ;;  %v3299_v30 = vld [vmem:[%s3613_s10 + $0x120] sm:$0xff] }
  0x79   : > { %v1391_v55 = vmax.f32 %v3362_v61, 0.0  ;;  %v1426_v1 = vmul.f32 %v3682_v16, %v4119_v53  ;;  %v370_v26 = vmul.f32 %v4058_v51, %v3616_v13  ;;  %v371_v23 = vmul.f32 %v4061_v31, %v3616_v13  ;;  %v3331_v36 = vld [vmem:[%s3613_s10 + $0x121] sm:$0xff] }
  0x7a   : > { %3464 = vmatprep.mubr.msk.bf16.mxu0 %vm1489_vm1, %v1480_v63  ;;  %v1061_v42 = vadd.f32 %v1029_v46, %v929_v49  ;;  %v1062_v56 = vadd.f32 %v1030_v27, %v930_v2  ;;  %v502_v24 = vmul.f32 %v4063_v34, %v3619_v14  ;;  %v503_v0 = vmul.f32 %v4068_v60, %v3619_v14  ;;  %v3300_v34 = vld [vmem:[%s3613_s10 + $0x128] sm:$0xff] }
  0x7b   : > { %v1427_v29 = vmul.f32 %v3682_v16, %v1391_v55  ;;  %v634_v17 = vmul.f32 %v1388_v43, %v3626_v18  ;;  %v635_v51 = vmul.f32 %v1389_v45, %v3626_v18  ;;  %v767_v31 = vmul.f32 %v4104_v41, %v3630_v19  ;;  %v3332_v27 = vld [vmem:[%s3613_s10 + $0x129] sm:$0xff] }
  0x7c   : > { %v1194_v4 = vadd.f32 %v1162_v48, %v1061_v42  ;;  %v1195_v22 = vadd.f32 %v1163_v52, %v1062_v56  ;;  %v534_v59 = vadd.f32 %v502_v24, %v370_v26  ;;  %v535_v40 = vadd.f32 %v503_v0, %v371_v23  ;;  %v3363_v44 = vld [vmem:[%s3613_s10 + $0x122] sm:$0xff]  ;;  %v3364_v49 = vld [vmem:[%s3613_s10 + $0x12a] sm:$0xff] }
  0x7d   : > { %v768_v60 = vmul.f32 %v4106_v47, %v3630_v19  ;;  %v899_v43 = vmul.f32 %v4108_v33, %v3634_v20  ;;  %v900_v45 = vmul.f32 %v4110_v62, %v3634_v20  ;;  %v1031_v46 = vmul.f32 %v4119_v53, %v3638_v21 }
  0x7e   : > { %v1326_v32 = vadd.f32 %v1294_v50, %v1194_v4  ;;  %v1327_v38 = vadd.f32 %v1295_v54, %v1195_v22  ;;  %v666_v15 = vadd.f32 %v634_v17, %v534_v59  ;;  %v667_v57 = vadd.f32 %v635_v51, %v535_v40 }
  0x7f   : > { %v1032_v25 = vmul.f32 %v1391_v55, %v3638_v21  ;;  %v4152_v58 = vmax.f32 %v3299_v30, 0.0  ;;  %v4154_v37 = vmax.f32 %v3300_v34, 0.0  ;;  %v4156_v39 = vmax.f32 %v3331_v36, 0.0 }
  0x80   : > { %v1458_v61 = vadd.f32 %v1426_v1, %v1326_v32  ;;  %v1459_v48 = vadd.f32 %v1427_v29, %v1327_v38  ;;  %v799_v52 = vadd.f32 %v767_v31, %v666_v15  ;;  %v800_v63 = vadd.f32 %v768_v60, %v667_v57  ;;  %v3334_v57 = vld [vmem:[%s3613_s10 + $0x141] sm:$0xff] }
  0x81   : > { %v1164_v50 = vmul.f32 %v3645_v28, %v4152_v58  ;;  %v1165_v2 = vmul.f32 %v3645_v28, %v4154_v37  ;;  %v4164_v54 = vmax.f32 %v3332_v27, 0.0  ;;  %v1296_v26 = vmul.f32 %v3652_v35, %v4156_v39 }
  0x82   : > { %v1481_v23 = vpack.c.bf16 %v1459_v48, %v1458_v61  ;;  %v931_v42 = vadd.f32 %v899_v43, %v799_v52  ;;  %v932_v56 = vadd.f32 %v900_v45, %v800_v63  ;;  %v1392_v24 = vmax.f32 %v3363_v44, 0.0  ;;  %v3301_v43 = vld [vmem:[%s3613_s10 + $0x138] sm:$0xff] }
  0x83   : > { %v1297_v1 = vmul.f32 %v3652_v35, %v4164_v54  ;;  %v1393_v0 = vmax.f32 %v3364_v49, 0.0  ;;  %v372_v29 = vmul.f32 %v4104_v41, %v3616_v13  ;;  %v373_v17 = vmul.f32 %v4106_v47, %v3616_v13  ;;  %v3365_v48 = vld [vmem:[%s3613_s10 + $0x13a] sm:$0xff] }
  0x84   : > { %3465 = vmatmul.mubr.msk.bf16.gmra.mrb[16].mxu0 %vm1489_vm1, %v1481_v23  ;;  %v1063_v51 = vadd.f32 %v1031_v46, %v931_v42  ;;  %v1064_v31 = vadd.f32 %v1032_v25, %v932_v56  ;;  %v1428_v4 = vmul.f32 %v3682_v16, %v1392_v24  ;;  %v504_v22 = vmul.f32 %v4108_v33, %v3619_v14  ;;  %v3302_v33 = vld [vmem:[%s3613_s10 + $0x140] sm:$0xff] }
  0x85   : > { %v1429_v59 = vmul.f32 %v3682_v16, %v1393_v0  ;;  %v505_v40 = vmul.f32 %v4110_v62, %v3619_v14  ;;  %v636_v41 = vmul.f32 %v4119_v53, %v3626_v18  ;;  %v637_v47 = vmul.f32 %v1391_v55, %v3626_v18  ;;  %v3333_v55 = vld [vmem:[%s3613_s10 + $0x139] sm:$0xff] }
  0x86   : > { %v1196_v30 = vadd.f32 %v1164_v50, %v1063_v51  ;;  %v1197_v34 = vadd.f32 %v1165_v2, %v1064_v31  ;;  %v536_v36 = vadd.f32 %v504_v22, %v372_v29  ;;  %v769_v60 = vmul.f32 %v4152_v58, %v3630_v19  ;;  %v3366_v2 = vld [vmem:[%s3613_s10 + $0x142] sm:$0xff] }
  0x87   : > { %v537_v45 = vadd.f32 %v505_v40, %v373_v17  ;;  %v770_v16 = vmul.f32 %v4154_v37, %v3630_v19  ;;  %v901_v62 = vmul.f32 %v4156_v39, %v3634_v20  ;;  %v902_v53 = vmul.f32 %v4164_v54, %v3634_v20 }
  0x88   : > { %v1328_v46 = vadd.f32 %v1296_v26, %v1196_v30  ;;  %v1329_v32 = vadd.f32 %v1297_v1, %v1197_v34  ;;  %v668_v38 = vadd.f32 %v636_v41, %v536_v36  ;;  %v1033_v15 = vmul.f32 %v1392_v24, %v3638_v21  ;;  %v4224_v41 = vld [vmem:[%s5236_s1 + $0x8] ss:$0 sm:$0xff] }
  0x89   : > { %v669_v27 = vadd.f32 %v637_v47, %v537_v45  ;;  %v1034_v25 = vmul.f32 %v1393_v0, %v3638_v21  ;;  %v4198_v44 = vmax.f32 %v3301_v43, 0.0  ;;  %v4200_v61 = vmax.f32 %v3302_v33, 0.0 }
  0x8a   : > { %v1460_v52 = vadd.f32 %v1428_v4, %v1328_v46  ;;  %v1461_v63 = vadd.f32 %v1429_v59, %v1329_v32  ;;  %v801_v49 = vadd.f32 %v769_v60, %v668_v38  ;;  %v4203_v50 = vmax.f32 %v3333_v55, 0.0  ;;  %v3304_v46 = vld [vmem:[%s3613_s10 + $0x158] sm:$0xff] }
  0x8b   : > { %v802_v26 = vadd.f32 %v770_v16, %v669_v27  ;;  %v1166_v23 = vmul.f32 %v3645_v28, %v4198_v44  ;;  %v1167_v42 = vmul.f32 %v3645_v28, %v4200_v61  ;;  %v4210_v56 = vmax.f32 %v3334_v57, 0.0  ;;  %v3336_v57 = vld [vmem:[%s3613_s10 + $0x159] sm:$0xff] }
  0x8c   : > { %v1482_v1 = vpack.c.bf16 %v1461_v63, %v1460_v52  ;;  %v933_v29 = vadd.f32 %v901_v62, %v801_v49  ;;  %v1298_v17 = vmul.f32 %v3652_v35, %v4203_v50  ;;  %v4214_v51 = vmax.f32 %v3365_v48, 0.0  ;;  %v3303_v62 = vld [vmem:[%s3613_s10 + $0x150] sm:$0xff] }
  0x8d   : > { %v934_v31 = vadd.f32 %v902_v53, %v802_v26  ;;  %v1299_v4 = vmul.f32 %v3652_v35, %v4210_v56  ;;  %v1395_v22 = vmax.f32 %v3366_v2, 0.0  ;;  %v374_v59 = vmul.f32 %v4152_v58, %v3616_v13  ;;  %v3367_v63 = vld [vmem:[%s3613_s10 + $0x152] sm:$0xff] }
  0x8e   : > { %3468 = vmatprep.mubr.msk.bf16.mxu0 %vm1489_vm1, %v1482_v1  ;;  %v1065_v40 = vadd.f32 %v1033_v15, %v933_v29  ;;  %v1430_v47 = vmul.f32 %v4224_v41, %v4214_v51  ;;  %v375_v30 = vmul.f32 %v4154_v37, %v3616_v13  ;;  %v506_v34 = vmul.f32 %v4156_v39, %v3619_v14 }
  0x8f   : > { %v1066_v58 = vadd.f32 %v1034_v25, %v934_v31  ;;  %v1431_v36 = vmul.f32 %v4224_v41, %v1395_v22  ;;  %v507_v60 = vmul.f32 %v4164_v54, %v3619_v14  ;;  %v638_v43 = vmul.f32 %v1392_v24, %v3626_v18  ;;  %v3335_v24 = vld [vmem:[%s3613_s10 + $0x151] sm:$0xff] }
  0x90   : > { %v1198_v33 = vadd.f32 %v1166_v23, %v1065_v40  ;;  %v538_v45 = vadd.f32 %v506_v34, %v374_v59  ;;  %v639_v16 = vmul.f32 %v1393_v0, %v3626_v18  ;;  %v771_v37 = vmul.f32 %v4198_v44, %v3630_v19 }
  0x91   : > { %v1199_v53 = vadd.f32 %v1167_v42, %v1066_v58  ;;  %v539_v39 = vadd.f32 %v507_v60, %v375_v30  ;;  %v772_v55 = vmul.f32 %v4200_v61, %v3630_v19  ;;  %v903_v54 = vmul.f32 %v4203_v50, %v3634_v20  ;;  %v3368_v42 = vld [vmem:[%s3613_s10 + $0x15a] sm:$0xff] }
  0x92   : > { %v1330_v32 = vadd.f32 %v1298_v17, %v1198_v33  ;;  %v670_v38 = vadd.f32 %v638_v43, %v538_v45  ;;  %v904_v0 = vmul.f32 %v4210_v56, %v3634_v20  ;;  %v1035_v15 = vmul.f32 %v4214_v51, %v3638_v21 }
  0x93   : > { %v1331_v27 = vadd.f32 %v1299_v4, %v1199_v53  ;;  %v671_v25 = vadd.f32 %v639_v16, %v539_v39  ;;  %v1036_v48 = vmul.f32 %v1395_v22, %v3638_v21  ;;  %v4252_v52 = vmax.f32 %v3303_v62, 0.0 }
  0x94   : > { %v1462_v49 = vadd.f32 %v1430_v47, %v1330_v32  ;;  %v803_v2 = vadd.f32 %v771_v37, %v670_v38  ;;  %v4255_v26 = vmax.f32 %v3304_v46, 0.0  ;;  %v4257_v23 = vmax.f32 %v3335_v24, 0.0  ;;  %v3305_v32 = vld [vmem:[%s3613_s10 + $0x168] sm:$0xff]  ;;  %v3306_v38 = vld [vmem:[%s3613_s10 + $0x170] sm:$0xff] }
  0x95   : > { %v1463_v1 = vadd.f32 %v1431_v36, %v1331_v27  ;;  %v804_v29 = vadd.f32 %v772_v55, %v671_v25  ;;  %v1168_v17 = vmul.f32 %v3645_v28, %v4252_v52  ;;  %v4262_v31 = vmax.f32 %v3336_v57, 0.0  ;;  %v3338_v57 = vld [vmem:[%s3613_s10 + $0x171] sm:$0xff] }
  0x96   : > { %v935_v4 = vadd.f32 %v903_v54, %v803_v2  ;;  %v1169_v59 = vmul.f32 %v3645_v28, %v4255_v26  ;;  %v1300_v40 = vmul.f32 %v3652_v35, %v4257_v23  ;;  %v1396_v47 = vmax.f32 %v3367_v63, 0.0 }
  0x97   : > { %v1483_v30 = vpack.c.bf16 %v1463_v1, %v1462_v49  ;;  %v936_v34 = vadd.f32 %v904_v0, %v804_v29  ;;  %v1301_v58 = vmul.f32 %v3652_v35, %v4262_v31  ;;  %v1397_v36 = vmax.f32 %v3368_v42, 0.0  ;;  %v3369_v49 = vld [vmem:[%s3613_s10 + $0x16a] sm:$0xff] }
  0x98   : > { %v1067_v60 = vadd.f32 %v1035_v15, %v935_v4  ;;  %v1432_v43 = vmul.f32 %v4224_v41, %v1396_v47  ;;  %v376_v33 = vmul.f32 %v4198_v44, %v3616_v13  ;;  %v377_v45 = vmul.f32 %v4200_v61, %v3616_v13 }
  0x99   : > { %3469 = vmatmul.mubr.msk.bf16.gmra.mrb[20].mxu0 %vm1489_vm1, %v1483_v30  ;;  %v1068_v16 = vadd.f32 %v1036_v48, %v936_v34  ;;  %v1433_v37 = vmul.f32 %v4224_v41, %v1397_v36  ;;  %v508_v62 = vmul.f32 %v4203_v50, %v3619_v14  ;;  %v509_v53 = vmul.f32 %v4210_v56, %v3619_v14  ;;  %v3337_v56 = vld [vmem:[%s3613_s10 + $0x169] sm:$0xff]  ;;  %v3370_v30 = vld [vmem:[%s3613_s10 + $0x172] sm:$0xff] }
  0x9a   : > { %v1200_v39 = vadd.f32 %v1168_v17, %v1067_v60  ;;  %v640_v44 = vmul.f32 %v4214_v51, %v3626_v18  ;;  %v641_v55 = vmul.f32 %v1395_v22, %v3626_v18  ;;  %v773_v61 = vmul.f32 %v4252_v52, %v3630_v19 }
  0x9b   : > { %v1201_v54 = vadd.f32 %v1169_v59, %v1068_v16  ;;  %v540_v46 = vadd.f32 %v508_v62, %v376_v33  ;;  %v541_v24 = vadd.f32 %v509_v53, %v377_v45  ;;  %v774_v50 = vmul.f32 %v4255_v26, %v3630_v19 }
  0x9c   : > { %v1332_v0 = vadd.f32 %v1300_v40, %v1200_v39  ;;  %v905_v15 = vmul.f32 %v4257_v23, %v3634_v20  ;;  %v906_v51 = vmul.f32 %v4262_v31, %v3634_v20  ;;  %v1037_v22 = vmul.f32 %v1396_v47, %v3638_v21 }
  0x9d   : > { %v1333_v27 = vadd.f32 %v1301_v58, %v1201_v54  ;;  %v672_v25 = vadd.f32 %v640_v44, %v540_v46  ;;  %v673_v48 = vadd.f32 %v641_v55, %v541_v24  ;;  %v1038_v63 = vmul.f32 %v1397_v36, %v3638_v21 }
  0x9e   : > { %v1464_v2 = vadd.f32 %v1432_v43, %v1332_v0  ;;  %v4299_v42 = vmax.f32 %v3305_v32, 0.0  ;;  %v4301_v1 = vmax.f32 %v3306_v38, 0.0  ;;  %v4303_v29 = vmax.f32 %v3337_v56, 0.0 }
  0x9f   : > { %v1465_v17 = vadd.f32 %v1433_v37, %v1333_v27  ;;  %v805_v4 = vadd.f32 %v773_v61, %v672_v25  ;;  %v806_v59 = vadd.f32 %v774_v50, %v673_v48  ;;  %v4305_v40 = vmax.f32 %v3338_v57, 0.0 }
  0xa0   : > { %v1170_v34 = vmul.f32 %v3645_v28, %v4299_v42  ;;  %v1171_v58 = vmul.f32 %v3645_v28, %v4301_v1  ;;  %v1302_v60 = vmul.f32 %v3652_v35, %v4303_v29  ;;  %v4314_v43 = vmax.f32 %v3369_v49, 0.0 }
  0xa1   : > { %v1484_v33 = vpack.c.bf16 %v1465_v17, %v1464_v2  ;;  %v937_v45 = vadd.f32 %v905_v15, %v805_v4  ;;  %v938_v16 = vadd.f32 %v906_v51, %v806_v59  ;;  %v1303_v37 = vmul.f32 %v3652_v35, %v4305_v40  ;;  %v3307_v15 = vld [vmem:[%s3613_s10 + $0x180] sm:$0xff] }
  0xa2   : > { %v1399_v62 = vmax.f32 %v3370_v30, 0.0  ;;  %v1434_v53 = vmul.f32 %v4224_v41, %v4314_v43  ;;  %v378_v39 = vmul.f32 %v4252_v52, %v3616_v13  ;;  %v379_v44 = vmul.f32 %v4255_v26, %v3616_v13  ;;  %v3339_v51 = vld [vmem:[%s3613_s10 + $0x181] sm:$0xff] }
  0xa3   : > { %3472 = vmatprep.mubr.msk.bf16.mxu0 %vm1489_vm1, %v1484_v33  ;;  %v1069_v55 = vadd.f32 %v1037_v22, %v937_v45  ;;  %v1070_v61 = vadd.f32 %v1038_v63, %v938_v16  ;;  %v510_v54 = vmul.f32 %v4257_v23, %v3619_v14  ;;  %v511_v46 = vmul.f32 %v4262_v31, %v3619_v14  ;;  %v3308_v23 = vld [vmem:[%s3613_s10 + $0x188] sm:$0xff] }
  0xa4   : > { %v1435_v24 = vmul.f32 %v4224_v41, %v1399_v62  ;;  %v642_v50 = vmul.f32 %v1396_v47, %v3626_v18  ;;  %v643_v52 = vmul.f32 %v1397_v36, %v3626_v18  ;;  %v775_v26 = vmul.f32 %v4299_v42, %v3630_v19  ;;  %v3340_v63 = vld [vmem:[%s3613_s10 + $0x189] sm:$0xff] }
  0xa5   : > { %v1202_v32 = vadd.f32 %v1170_v34, %v1069_v55  ;;  %v1203_v38 = vadd.f32 %v1171_v58, %v1070_v61  ;;  %v542_v56 = vadd.f32 %v510_v54, %v378_v39  ;;  %v543_v0 = vadd.f32 %v511_v46, %v379_v44  ;;  %v3371_v59 = vld [vmem:[%s3613_s10 + $0x182] sm:$0xff]  ;;  %v3372_v45 = vld [vmem:[%s3613_s10 + $0x18a] sm:$0xff] }
  0xa6   : > { %v776_v31 = vmul.f32 %v4301_v1, %v3630_v19  ;;  %v907_v47 = vmul.f32 %v4303_v29, %v3634_v20  ;;  %v908_v36 = vmul.f32 %v4305_v40, %v3634_v20  ;;  %v1039_v22 = vmul.f32 %v4314_v43, %v3638_v21 }
  0xa7   : > { %v1334_v57 = vadd.f32 %v1302_v60, %v1202_v32  ;;  %v1335_v27 = vadd.f32 %v1303_v37, %v1203_v38  ;;  %v674_v25 = vadd.f32 %v642_v50, %v542_v56  ;;  %v675_v48 = vadd.f32 %v643_v52, %v543_v0 }
  0xa8   : > { %v1040_v49 = vmul.f32 %v1399_v62, %v3638_v21  ;;  %v1136_v2 = vmax.f32 %v3307_v15, 0.0  ;;  %v1137_v17 = vmax.f32 %v3308_v23, 0.0  ;;  %v1268_v4 = vmax.f32 %v3339_v51, 0.0 }
  0xa9   : > { %v1466_v30 = vadd.f32 %v1434_v53, %v1334_v57  ;;  %v1467_v34 = vadd.f32 %v1435_v24, %v1335_v27  ;;  %v807_v58 = vadd.f32 %v775_v26, %v674_v25  ;;  %v808_v33 = vadd.f32 %v776_v31, %v675_v48  ;;  %v3309_v31 = vld [vmem:[%s3613_s10 + $0x198] sm:$0xff] }
  0xaa   : > { %v1172_v16 = vmul.f32 %v3645_v28, %v1136_v2  ;;  %v1173_v39 = vmul.f32 %v3645_v28, %v1137_v17  ;;  %v1269_v60 = vmax.f32 %v3340_v63, 0.0  ;;  %v1304_v37 = vmul.f32 %v3652_v35, %v1268_v4 }
  0xab   : > { %v1485_v44 = vpack.c.bf16 %v1467_v34, %v1466_v30  ;;  %v939_v55 = vadd.f32 %v907_v47, %v807_v58  ;;  %v940_v61 = vadd.f32 %v908_v36, %v808_v33  ;;  %v1400_v54 = vmax.f32 %v3371_v59, 0.0  ;;  %v3310_v47 = vld [vmem:[%s3613_s10 + $0x1a0] sm:$0xff] }
  0xac   : > { %v1305_v46 = vmul.f32 %v3652_v35, %v1269_v60  ;;  %v1401_v50 = vmax.f32 %v3372_v45, 0.0  ;;  %v380_v53 = vmul.f32 %v4299_v42, %v3616_v13  ;;  %v381_v24 = vmul.f32 %v4301_v1, %v3616_v13 }
  0xad   : > { %3473 = vmatmul.mubr.msk.bf16.gmra.mrb[24].mxu0 %vm1489_vm1, %v1485_v44  ;;  %v1071_v52 = vadd.f32 %v1039_v22, %v939_v55  ;;  %v1072_v26 = vadd.f32 %v1040_v49, %v940_v61  ;;  %v1436_v32 = vmul.f32 %v4224_v41, %v1400_v54  ;;  %v512_v38 = vmul.f32 %v4303_v29, %v3619_v14  ;;  %v3373_v49 = vld [vmem:[%s3613_s10 + $0x19a] sm:$0xff] }
  0xae   : > { %v1437_v56 = vmul.f32 %v4224_v41, %v1401_v50  ;;  %v513_v0 = vmul.f32 %v4305_v40, %v3619_v14  ;;  %v644_v42 = vmul.f32 %v4314_v43, %v3626_v18  ;;  %v645_v13 = vmul.f32 %v1399_v62, %v3626_v18  ;;  %v3341_v14 = vld [vmem:[%s3613_s10 + $0x199] sm:$0xff]  ;;  %v3342_v62 = vld [vmem:[%s3613_s10 + $0x1a1] sm:$0xff] }
  0xaf   : > { %v1204_v1 = vadd.f32 %v1172_v16, %v1071_v52  ;;  %v1205_v15 = vadd.f32 %v1173_v39, %v1072_v26  ;;  %v544_v23 = vadd.f32 %v512_v38, %v380_v53  ;;  %v777_v51 = vmul.f32 %v1136_v2, %v3630_v19  ;;  %v2801_v38 = vld [vmem:[%s5240_s5] sm:$0x3] }
  0xb0   : > { %v545_v29 = vadd.f32 %v513_v0, %v381_v24  ;;  %v778_v36 = vmul.f32 %v1137_v17, %v3630_v19  ;;  %v909_v22 = vmul.f32 %v1268_v4, %v3634_v20  ;;  %v910_v18 = vmul.f32 %v1269_v60, %v3634_v20  ;;  %v3374_v17 = vld [vmem:[%s3613_s10 + $0x1a2] sm:$0xff]  ;;  %3515 = vmatprep.subr.msk.bf16.mxu1 %vm1538_vm0, %v2801_v38 }
  0xb1   : > { %v1336_v40 = vadd.f32 %v1304_v37, %v1204_v1  ;;  %v1337_v43 = vadd.f32 %v1305_v46, %v1205_v15  ;;  %v676_v57 = vadd.f32 %v644_v42, %v544_v23  ;;  %v1041_v25 = vmul.f32 %v1400_v54, %v3638_v21 }
  0xb2   : > { %v677_v27 = vadd.f32 %v645_v13, %v545_v29  ;;  %v1138_v48 = vmax.f32 %v3309_v31, 0.0  ;;  %v1139_v63 = vmax.f32 %v3310_v47, 0.0  ;;  %v1270_v19 = vmax.f32 %v3341_v14, 0.0  ;;  %v1882_v13 = vld [vmem:[%s5239_s4] sm:$0xff] }
  0xb3   : > { %v1468_v2 = vadd.f32 %v1436_v32, %v1336_v40  ;;  %v1469_v59 = vadd.f32 %v1437_v56, %v1337_v43  ;;  %v809_v30 = vadd.f32 %v777_v51, %v676_v57  ;;  %v1042_v34 = vmul.f32 %v1401_v50, %v3638_v21  ;;  %v1703_v56 = vld [vmem:[%s5238_s3] sm:$0x3] }
  0xb4   : > { %v810_v4 = vadd.f32 %v778_v36, %v677_v27  ;;  %v1271_v58 = vmax.f32 %v3342_v62, 0.0  ;;  %v1174_v20 = vmul.f32 %v3645_v28, %v1138_v48  ;;  %v1402_v16 = vmax.f32 %v3373_v49, 0.0 }
  0xb5   : > { %v1486_v33 = vpack.c.bf16 %v1469_v59, %v1468_v2  ;;  %v941_v45 = vadd.f32 %v909_v22, %v809_v30  ;;  %v1175_v60 = vmul.f32 %v3645_v28, %v1139_v63  ;;  %v1403_v37 = vmax.f32 %v3374_v17, 0.0 }
  0xb6   : > { %v942_v39 = vadd.f32 %v910_v18, %v810_v4  ;;  %v1306_v55 = vmul.f32 %v3652_v35, %v1270_v19  ;;  %v1307_v54 = vmul.f32 %v3652_v35, %v1271_v58  ;;  %v1438_v21 = vmul.f32 %v4224_v41, %v1402_v16 }
  0xb7   : > { %3476 = vmatprep.mubr.msk.bf16.mxu0 %vm1489_vm1, %v1486_v33  ;;  %v1073_v44 = vadd.f32 %v1041_v25, %v941_v45  ;;  %v1439_v53 = vmul.f32 %v4224_v41, %v1403_v37  ;;  %v3536_v35 = vmov 0.0   ;;  %v2851_v41 = vsel %vm1538_vm0, %v2801_v38, 0 }
  0xb8   : > { %v1074_v61 = vadd.f32 %v1042_v34, %v942_v39  ;;  %1776 = vst.msk [vmem:[#allocation2] sm:$0xff] %vm1489_vm1, %v3536_v35  ;;  %1777 = vst.msk [vmem:[#allocation2 + $0x8] sm:$0xff] %vm1489_vm1, %v3536_v35  ;;  %3481 = vmatpush3.bf16.msra.mxu1 %v2851_v41  ;;  %v4432_v0 = vrot.slane %v1703_v56, %v3599_v5  ;;  %v4435_v42 = vrot.slane %v1703_v56, %v3602_v6 }
  0xb9   : > { %v1206_v46 = vadd.f32 %v1174_v20, %v1073_v44  ;;  %1779 = vst.msk [vmem:[#allocation2 + $0x10] sm:$0x3] %vm1778_vm2, %v3536_v35  ;;  %1783 = vst.msk [vmem:[#allocation2 + $0x1a8] sm:$0x3] %vm1778_vm2, %v3536_v35  ;;  %v4443_v47 = vrot.slane %v1882_v13, %v3599_v5  ;;  %v4446_v29 = vrot.slane %v1882_v13, %v3602_v6 }
  0xba   : > { %v1207_v50 = vadd.f32 %v1175_v60, %v1074_v61  ;;  %1786 = vst.msk [vmem:[#allocation2 + $0x18] sm:$0x1] %vm1785_vm3, %v3536_v35  ;;  %1787 = vst.msk [vmem:[#allocation2 + $0x30] sm:$0x1] %vm1785_vm3, %v3536_v35  ;;  %v4455_v63 = vrot.slane %v1882_v13, %v612_v7  ;;  %v4470_v39 = vrot.slane %v1882_v13, %v745_v8 }
  0xbb   : > { %v1338_v24 = vadd.f32 %v1306_v55, %v1206_v46  ;;  %1802 = vst.msk [vmem:[#allocation2 + $0x29] sm:$0x1] %vm1785_vm3, %v3536_v35  ;;  %1803 = vst.msk [vmem:[#allocation2 + $0x41] sm:$0x1] %vm1785_vm3, %v3536_v35  ;;  %v4474_v60 = vrot.slane %v1882_v13, %v877_v9  ;;  %v4478_v37 = vrot.slane %v1882_v13, %v1142_v11 }
  0xbc   : > { %v1339_v52 = vadd.f32 %v1307_v54, %v1207_v50  ;;  %1781 = vst.msk [vmem:[#allocation2 + $0x198] sm:$0xff] %vm1489_vm1, %v3536_v35  ;;  %1782 = vst.msk [vmem:[#allocation2 + $0x1a0] sm:$0xff] %vm1489_vm1, %v3536_v35  ;;  %v4482_v44 = vrot.slane %v1882_v13, %v1274_v12 }
  0xbd   : > { %v1470_v26 = vadd.f32 %v1438_v21, %v1338_v24  ;;  %1788 = vst.msk [vmem:[#allocation2 + $0x48] sm:$0x1] %vm1785_vm3, %v3536_v35  ;;  %1789 = vst.msk [vmem:[#allocation2 + $0x60] sm:$0x1] %vm1785_vm3, %v3536_v35  ;;  %v4490_v21 = vrot.slane %v1882_v13, %v1009_v10 }
  0xbe   : > { %v1471_v32 = vadd.f32 %v1439_v53, %v1339_v52  ;;  %1790 = vst.msk [vmem:[#allocation2 + $0x78] sm:$0x1] %vm1785_vm3, %v3536_v35  ;;  %1791 = vst.msk [vmem:[#allocation2 + $0x90] sm:$0x1] %vm1785_vm3, %v3536_v35 }
  0xbf   : > { %1792 = vst.msk [vmem:[#allocation2 + $0xa8] sm:$0x1] %vm1785_vm3, %v3536_v35  ;;  %1793 = vst.msk [vmem:[#allocation2 + $0xc0] sm:$0x1] %vm1785_vm3, %v3536_v35  ;;  %v1884_v40 = vld [vmem:[#allocation2] sm:$0xff]  ;;  %v1885_v25 = vld [vmem:[#allocation2 + $0x8] sm:$0xff] }
  0xc0   : > { %v1487_v28 = vpack.c.bf16 %v1471_v32, %v1470_v26  ;;  %1794 = vst.msk [vmem:[#allocation2 + $0xd8] sm:$0x1] %vm1785_vm3, %v3536_v35  ;;  %1795 = vst.msk [vmem:[#allocation2 + $0xf0] sm:$0x1] %vm1785_vm3, %v3536_v35  ;;  %v1984_v43 = vld [vmem:[#allocation2 + $0x1] sm:$0xff]  ;;  %v1985_v48 = vld [vmem:[#allocation2 + $0x9] sm:$0xff]  ;;  %v1920_v59 = vmul.f32 %v4443_v47, %v1884_v40  ;;  %v1921_v34 = vmul.f32 %v4443_v47, %v1885_v25 }
  0xc1   : > { %1796 = vst.msk [vmem:[#allocation2 + $0x108] sm:$0x1] %vm1785_vm3, %v3536_v35  ;;  %1797 = vst.msk [vmem:[#allocation2 + $0x120] sm:$0x1] %vm1785_vm3, %v3536_v35  ;;  %v2020_v30 = vmul.f32 %v4446_v29, %v1984_v43  ;;  %v2084_v17 = vld [vmem:[#allocation2 + $0x2] sm:$0xff]  ;;  %v2021_v58 = vmul.f32 %v4446_v29, %v1985_v48  ;;  %v2085_v7 = vld [vmem:[#allocation2 + $0xa] sm:$0xff] }
  0xc2   : > { %3477 = vmatmul.mubr.msk.bf16.gmra.mrb[28].mxu0 %vm1489_vm1, %v1487_v28  ;;  %1798 = vst.msk [vmem:[#allocation2 + $0x138] sm:$0x1] %vm1785_vm3, %v3536_v35  ;;  %1799 = vst.msk [vmem:[#allocation2 + $0x150] sm:$0x1] %vm1785_vm3, %v3536_v35  ;;  %v2120_v45 = vmul.f32 %v4455_v63, %v2084_v17  ;;  %v2121_v16 = vmul.f32 %v4455_v63, %v2085_v7 }
  0xc3   : > { %1800 = vst.msk [vmem:[#allocation2 + $0x168] sm:$0x1] %vm1785_vm3, %v3536_v35  ;;  %1801 = vst.msk [vmem:[#allocation2 + $0x180] sm:$0x1] %vm1785_vm3, %v3536_v35  ;;  %v2052_v33 = vadd.f32 %v2020_v30, %v1920_v59  ;;  %v2053_v20 = vadd.f32 %v2021_v58, %v1921_v34 }
  0xc4   : > { %1804 = vst.msk [vmem:[#allocation2 + $0x59] sm:$0x1] %vm1785_vm3, %v3536_v35  ;;  %1805 = vst.msk [vmem:[#allocation2 + $0x71] sm:$0x1] %vm1785_vm3, %v3536_v35 }
  0xc5   : > { %1806 = vst.msk [vmem:[#allocation2 + $0x89] sm:$0x1] %vm1785_vm3, %v3536_v35  ;;  %1807 = vst.msk [vmem:[#allocation2 + $0xa1] sm:$0x1] %vm1785_vm3, %v3536_v35  ;;  %v2152_v55 = vadd.f32 %v2120_v45, %v2052_v33  ;;  %v2153_v9 = vadd.f32 %v2121_v16, %v2053_v20  ;;  %v4529_v45 = vld [vmem:[%s5239_s4 + $0x8] ss:$0 sm:$0xff] }
  0xc6   : > { %1808 = vst.msk [vmem:[#allocation2 + $0xb9] sm:$0x1] %vm1785_vm3, %v3536_v35  ;;  %1809 = vst.msk [vmem:[#allocation2 + $0xd1] sm:$0x1] %vm1785_vm3, %v3536_v35 }
  0xc7   : > { %1810 = vst.msk [vmem:[#allocation2 + $0xe9] sm:$0x1] %vm1785_vm3, %v3536_v35  ;;  %1811 = vst.msk [vmem:[#allocation2 + $0x101] sm:$0x1] %vm1785_vm3, %v3536_v35 }
  0xc8   : > { %1812 = vst.msk [vmem:[#allocation2 + $0x119] sm:$0x1] %vm1785_vm3, %v3536_v35  ;;  %1813 = vst.msk [vmem:[#allocation2 + $0x131] sm:$0x1] %vm1785_vm3, %v3536_v35 }
  0xc9   : > { %1814 = vst.msk [vmem:[#allocation2 + $0x149] sm:$0x1] %vm1785_vm3, %v3536_v35  ;;  %1815 = vst.msk [vmem:[#allocation2 + $0x161] sm:$0x1] %vm1785_vm3, %v3536_v35 }
  0xca   : > { %1816 = vst.msk [vmem:[#allocation2 + $0x179] sm:$0x1] %vm1785_vm3, %v3536_v35  ;;  %1817 = vst.msk [vmem:[#allocation2 + $0x191] sm:$0x1] %vm1785_vm3, %v3536_v35 }
 0x105   : > { %v3450_v1 = vpop.f32.mrb[0].mxu0 }
 0x106   : > { %v1710_v15 = vmul.f32 %v3450_v1, %v4432_v0  ;;  %v1576_v23 = vpop.f32.mrb[1].mxu0 }
 0x107   : > { %v1708_v51 = vmul.f32 %v4432_v0, %v1576_v23  ;;  %v3451_v31 = vpop.f32.mrb[2].mxu0 }
 0x108   : > { %v1746_v36 = vadd.f32 %v4435_v42, %v1710_v15  ;;  %v1711_v22 = vmul.f32 %v3451_v31, %v4432_v0  ;;  %v1579_v14 = vpop.f32.mrb[3].mxu0 }
 0x109   : > { %v1744_v57 = vadd.f32 %v4435_v42, %v1708_v51  ;;  %v1709_v18 = vmul.f32 %v4432_v0, %v1579_v14 }
 0x10a   : > { %v1820_v62 = vmax.f32 %v1746_v36, 0.0  ;;  %v1747_v27 = vadd.f32 %v4435_v42, %v1711_v22 }
 0x10b   : > { %v1818_v49 = vmax.f32 %v1744_v57, 0.0  ;;  %v1745_v2 = vadd.f32 %v4435_v42, %v1709_v18 }
 0x10c   : > { %1852 = vst.msk [vmem:[#allocation2 + $0x31] sm:$0xff] %vm1489_vm1, %v1820_v62  ;;  %v1821_v19 = vmax.f32 %v1747_v27, 0.0 }
 0x10d   : > { %1850 = vst.msk [vmem:[#allocation2 + $0x19] sm:$0xff] %vm1489_vm1, %v1818_v49  ;;  %v1819_v4 = vmax.f32 %v1745_v2, 0.0 }
 0x10e   : > { %1853 = vst.msk [vmem:[#allocation2 + $0x39] sm:$0xff] %vm1489_vm1, %v1821_v19 }
 0x10f   : > { %1851 = vst.msk [vmem:[#allocation2 + $0x21] sm:$0xff] %vm1489_vm1, %v1819_v4 }
 0x113   : > { %v4484_v61 = vld [vmem:[#allocation2 + $0x30] sm:$0xff] }
 0x114   : > { %v4486_v54 = vld [vmem:[#allocation2 + $0x31] sm:$0xff]  ;;  %v2284_v8 = vld [vmem:[#allocation2 + $0x19] sm:$0xff]  ;;  %v2521_v3 = vmul.f32 %v4478_v37, %v4484_v61  ;;  %v2222_v38 = vmul.f32 %v4484_v61, %v4470_v39 }
 0x115   : > { %v2184_v46 = vld [vmem:[#allocation2 + $0x18] sm:$0xff]  ;;  %v2022_v24 = vmul.f32 %v2284_v8, %v4446_v29  ;;  %v2320_v32 = vmul.f32 %v4474_v60, %v2284_v8  ;;  %v2621_v10 = vmul.f32 %v4482_v44, %v4486_v54 }
 0x116   : > { %v2220_v50 = vmul.f32 %v4470_v39, %v2184_v46  ;;  %v4493_v11 = vld [vmem:[#allocation2 + $0x38] sm:$0xff]  ;;  %v1922_v12 = vmul.f32 %v2184_v46, %v4443_v47  ;;  %v2185_v52 = vld [vmem:[#allocation2 + $0x20] sm:$0xff] }
 0x117   : > { %v4495_v53 = vld [vmem:[#allocation2 + $0x39] sm:$0xff]  ;;  %v2285_v26 = vld [vmem:[#allocation2 + $0x21] sm:$0xff]  ;;  %v2221_v35 = vmul.f32 %v4470_v39, %v2185_v52  ;;  %v2522_v13 = vmul.f32 %v4478_v37, %v4493_v11  ;;  %v1923_v51 = vmul.f32 %v2185_v52, %v4443_v47  ;;  %v2223_v58 = vmul.f32 %v4493_v11, %v4470_v39 }
 0x118   : > { %v2384_v28 = vld [vmem:[#allocation2 + $0x1a] sm:$0xff]  ;;  %v2252_v41 = vadd.f32 %v2220_v50, %v2152_v55  ;;  %v2385_v56 = vld [vmem:[#allocation2 + $0x22] sm:$0xff]  ;;  %v2622_v1 = vmul.f32 %v4482_v44, %v4495_v53  ;;  %v2321_v15 = vmul.f32 %v4474_v60, %v2285_v26  ;;  %v2023_v31 = vmul.f32 %v2285_v26, %v4446_v29  ;;  %v2685_v55 = vld [vmem:[#allocation2 + $0x32] sm:$0xff] }
 0x119   : > { %v2420_v23 = vmul.f32 %v4490_v21, %v2384_v28  ;;  %v3454_v36 = vpop.f32.mrb[4].mxu0  ;;  %v2253_v22 = vadd.f32 %v2221_v35, %v2153_v9  ;;  %v2054_v40 = vadd.f32 %v2022_v24, %v1922_v12  ;;  %v2122_v43 = vmul.f32 %v2384_v28, %v4455_v63  ;;  %v2686_v46 = vld [vmem:[#allocation2 + $0x3a] sm:$0xff] }
 0x11a   : > { %v2352_v14 = vadd.f32 %v2320_v32, %v2252_v41  ;;  %v1714_v57 = vmul.f32 %v3454_v36, %v4432_v0  ;;  %v1592_v18 = vpop.f32.mrb[5].mxu0  ;;  %v2421_v62 = vmul.f32 %v4490_v21, %v2385_v56  ;;  %v2055_v27 = vadd.f32 %v2023_v31, %v1923_v51 }
 0x11b   : > { %v2123_v25 = vmul.f32 %v2385_v56, %v4455_v63  ;;  %v1712_v48 = vmul.f32 %v4432_v0, %v1592_v18  ;;  %v3455_v49 = vpop.f32.mrb[6].mxu0  ;;  %v2353_v2 = vadd.f32 %v2321_v15, %v2253_v22  ;;  %v2154_v30 = vadd.f32 %v2122_v43, %v2054_v40 }
 0x11c   : > { %v2452_v59 = vadd.f32 %v2420_v23, %v2352_v14  ;;  %v1750_v19 = vadd.f32 %v4435_v42, %v1714_v57  ;;  %v1715_v17 = vmul.f32 %v3455_v49, %v4432_v0  ;;  %v1595_v4 = vpop.f32.mrb[7].mxu0  ;;  %v2721_v35 = vmul.f32 %v4529_v45, %v2685_v55 }
 0x11d   : > { %v2155_v34 = vadd.f32 %v2123_v25, %v2055_v27  ;;  %v1748_v7 = vadd.f32 %v4435_v42, %v1712_v48  ;;  %v1713_v33 = vmul.f32 %v4432_v0, %v1595_v4  ;;  %v2453_v20 = vadd.f32 %v2421_v62, %v2353_v2 }
 0x11e   : > { %v2553_v16 = vadd.f32 %v2521_v3, %v2452_v59  ;;  %v1824_v8 = vmax.f32 %v1750_v19, 0.0  ;;  %v1751_v9 = vadd.f32 %v4435_v42, %v1715_v17  ;;  %v2254_v50 = vadd.f32 %v2222_v38, %v2154_v30 }
 0x11f   : > { %v2255_v12 = vadd.f32 %v2223_v58, %v2155_v34  ;;  %v1822_v24 = vmax.f32 %v1748_v7, 0.0  ;;  %v1749_v52 = vadd.f32 %v4435_v42, %v1713_v33  ;;  %v2554_v26 = vadd.f32 %v2522_v13, %v2453_v20 }
 0x120   : > { %v2653_v32 = vadd.f32 %v2621_v10, %v2553_v16  ;;  %1856 = vst.msk [vmem:[#allocation2 + $0x61] sm:$0xff] %vm1489_vm1, %v1824_v8  ;;  %v1825_v28 = vmax.f32 %v1751_v9, 0.0  ;;  %v2722_v41 = vmul.f32 %v4529_v45, %v2686_v46  ;;  %v2322_v3 = vmul.f32 %v4486_v54, %v4474_v60 }
 0x121   : > { %1854 = vst.msk [vmem:[#allocation2 + $0x49] sm:$0xff] %vm1489_vm1, %v1822_v24  ;;  %v1823_v56 = vmax.f32 %v1749_v52, 0.0  ;;  %v2654_v38 = vadd.f32 %v2622_v1, %v2554_v26  ;;  %v2323_v15 = vmul.f32 %v4495_v53, %v4474_v60  ;;  %v1924_v10 = vmul.f32 %v4484_v61, %v4443_v47 }
 0x122   : > { %1857 = vst.msk [vmem:[#allocation2 + $0x69] sm:$0xff] %vm1489_vm1, %v1825_v28  ;;  %v2354_v13 = vadd.f32 %v2322_v3, %v2254_v50  ;;  %v1925_v23 = vmul.f32 %v4493_v11, %v4443_v47  ;;  %v2024_v51 = vmul.f32 %v4486_v54, %v4446_v29  ;;  %v2753_v31 = vadd.f32 %v2721_v35, %v2653_v32 }
 0x123   : > { %1855 = vst.msk [vmem:[#allocation2 + $0x51] sm:$0xff] %vm1489_vm1, %v1823_v56  ;;  %v2754_v36 = vadd.f32 %v2722_v41, %v2654_v38  ;;  %v2355_v1 = vadd.f32 %v2323_v15, %v2255_v12  ;;  %v2025_v22 = vmul.f32 %v4495_v53, %v4446_v29  ;;  %v2124_v61 = vmul.f32 %v2685_v55, %v4455_v63 }
 0x124   : > { %v2056_v14 = vadd.f32 %v2024_v51, %v1924_v10  ;;  %v2422_v43 = vmul.f32 %v2685_v55, %v4490_v21  ;;  %v2423_v57 = vmul.f32 %v2686_v46, %v4490_v21  ;;  %v2125_v18 = vmul.f32 %v2686_v46, %v4455_v63 }
 0x125   : > { %v2785_v40 = vpack.c.bf16 %v2754_v36, %v2753_v31  ;;  %v2057_v11 = vadd.f32 %v2025_v22, %v1925_v23 }
 0x126   : > { %v2454_v54 = vadd.f32 %v2422_v43, %v2354_v13  ;;  %v2455_v62 = vadd.f32 %v2423_v57, %v2355_v1  ;;  %v2156_v49 = vadd.f32 %v2124_v61, %v2056_v14 }
 0x127   : > { %3482 = vmatprep.mubr.msk.bf16.mxu1 %vm1489_vm1, %v2785_v40  ;;  %v4556_v27 = vld [vmem:[#allocation2 + $0x60] sm:$0xff]  ;;  %v2157_v2 = vadd.f32 %v2125_v18, %v2057_v11 }
 0x128   : > { %v4558_v25 = vld [vmem:[#allocation2 + $0x61] sm:$0xff]  ;;  %v2587_v48 = vld [vmem:[#allocation2 + $0x49] sm:$0xff]  ;;  %v2525_v59 = vmul.f32 %v4478_v37, %v4556_v27  ;;  %v4572_v58 = vmul.f32 %v4556_v27, %v4470_v39 }
 0x129   : > { %v2487_v53 = vld [vmem:[#allocation2 + $0x48] sm:$0xff]  ;;  %v2625_v30 = vmul.f32 %v4482_v44, %v4558_v25  ;;  %v4576_v7 = vmul.f32 %v4558_v25, %v4474_v60  ;;  %v2623_v16 = vmul.f32 %v4482_v44, %v2587_v48  ;;  %v2324_v46 = vmul.f32 %v2587_v48, %v4474_v60 }
 0x12a   : > { %v2523_v19 = vmul.f32 %v4478_v37, %v2487_v53  ;;  %v2224_v17 = vmul.f32 %v2487_v53, %v4470_v39  ;;  %v4566_v4 = vld [vmem:[#allocation2 + $0x68] sm:$0xff]  ;;  %v2488_v33 = vld [vmem:[#allocation2 + $0x50] sm:$0xff]  ;;  %v1926_v26 = vmul.f32 %v2487_v53, %v4443_v47  ;;  %v2026_v61 = vmul.f32 %v2587_v48, %v4446_v29 }
 0x12b   : > { %v4568_v34 = vld [vmem:[#allocation2 + $0x69] sm:$0xff]  ;;  %v2588_v20 = vld [vmem:[#allocation2 + $0x51] sm:$0xff]  ;;  %v2526_v8 = vmul.f32 %v4478_v37, %v4566_v4  ;;  %v2524_v50 = vmul.f32 %v4478_v37, %v2488_v33  ;;  %v2225_v35 = vmul.f32 %v2488_v33, %v4470_v39  ;;  %v1927_v31 = vmul.f32 %v2488_v33, %v4443_v47 }
 0x12c   : > { %v2687_v55 = vld [vmem:[#allocation2 + $0x4a] sm:$0xff]  ;;  %v2626_v9 = vmul.f32 %v4482_v44, %v4568_v34  ;;  %v2555_v12 = vadd.f32 %v2523_v19, %v2454_v54  ;;  %v2624_v24 = vmul.f32 %v4482_v44, %v2588_v20  ;;  %v2688_v52 = vld [vmem:[#allocation2 + $0x52] sm:$0xff]  ;;  %v2256_v41 = vadd.f32 %v2224_v17, %v2156_v49 }
 0x12d   : > { %v2723_v32 = vmul.f32 %v4529_v45, %v2687_v55  ;;  %v2724_v28 = vmul.f32 %v4529_v45, %v2688_v52  ;;  %v2556_v3 = vadd.f32 %v2524_v50, %v2455_v62  ;;  %v2325_v38 = vmul.f32 %v2588_v20, %v4474_v60 }
 0x12e   : > { %v2655_v56 = vadd.f32 %v2623_v16, %v2555_v12  ;;  %v2424_v15 = vmul.f32 %v2687_v55, %v4490_v21  ;;  %v3458_v10 = vpop.f32.mrb[8].mxu0  ;;  %v2257_v13 = vadd.f32 %v2225_v35, %v2157_v2  ;;  %v2356_v23 = vadd.f32 %v2324_v46, %v2256_v41  ;;  %v2689_v16 = vld [vmem:[#allocation2 + $0x62] sm:$0xff] }
 0x12f   : > { %v2425_v51 = vmul.f32 %v2688_v52, %v4490_v21  ;;  %v1718_v36 = vmul.f32 %v3458_v10, %v4432_v0  ;;  %v1608_v1 = vpop.f32.mrb[9].mxu0  ;;  %v2656_v22 = vadd.f32 %v2624_v24, %v2556_v3  ;;  %v2027_v18 = vmul.f32 %v2588_v20, %v4446_v29  ;;  %v2690_v24 = vld [vmem:[#allocation2 + $0x6a] sm:$0xff] }
 0x130   : > { %v2755_v14 = vadd.f32 %v2723_v32, %v2655_v56  ;;  %v1716_v40 = vmul.f32 %v4432_v0, %v1608_v1  ;;  %v3459_v43 = vpop.f32.mrb[10].mxu0  ;;  %v2357_v57 = vadd.f32 %v2325_v38, %v2257_v13  ;;  %v2456_v11 = vadd.f32 %v2424_v15, %v2356_v23 }
 0x131   : > { %v1754_v54 = vadd.f32 %v4435_v42, %v1718_v36  ;;  %v1719_v62 = vmul.f32 %v3459_v43, %v4432_v0  ;;  %v1611_v53 = vpop.f32.mrb[11].mxu0  ;;  %v2756_v49 = vadd.f32 %v2724_v28, %v2656_v22  ;;  %v2058_v2 = vadd.f32 %v2026_v61, %v1926_v26 }
 0x132   : > { %v1752_v19 = vadd.f32 %v4435_v42, %v1716_v40  ;;  %v1717_v17 = vmul.f32 %v4432_v0, %v1611_v53  ;;  %v2457_v33 = vadd.f32 %v2425_v51, %v2357_v57  ;;  %v2557_v48 = vadd.f32 %v2525_v59, %v2456_v11 }
 0x133   : > { %v1828_v46 = vmax.f32 %v1754_v54, 0.0  ;;  %v1755_v50 = vadd.f32 %v4435_v42, %v1719_v62  ;;  %v2786_v12 = vpack.c.bf16 %v2756_v49, %v2755_v14  ;;  %v2059_v20 = vadd.f32 %v2027_v18, %v1927_v31 }
 0x134   : > { %v1826_v32 = vmax.f32 %v1752_v19, 0.0  ;;  %v1753_v35 = vadd.f32 %v4435_v42, %v1717_v17  ;;  %v2558_v41 = vadd.f32 %v2526_v8, %v2457_v33  ;;  %v2657_v3 = vadd.f32 %v2625_v30, %v2557_v48 }
 0x135   : > { %1860 = vst.msk [vmem:[#allocation2 + $0x91] sm:$0xff] %vm1489_vm1, %v1828_v46  ;;  %v1829_v26 = vmax.f32 %v1755_v50, 0.0  ;;  %3483 = vmatmul.mubr.msk.bf16.vlgmr.msra.gmra.mrb[0].mxu1 %vm1489_vm1, %v2786_v12  ;;  %v2725_v28 = vmul.f32 %v4529_v45, %v2689_v16  ;;  %v2126_v59 = vmul.f32 %v2687_v55, %v4455_v63  ;;  %v2127_v56 = vmul.f32 %v2688_v52, %v4455_v63 }
 0x136   : > { %1858 = vst.msk [vmem:[#allocation2 + $0x79] sm:$0xff] %vm1489_vm1, %v1826_v32  ;;  %v1827_v38 = vmax.f32 %v1753_v35, 0.0  ;;  %v2658_v15 = vadd.f32 %v2626_v9, %v2558_v41  ;;  %v2726_v10 = vmul.f32 %v4529_v45, %v2690_v24  ;;  %v2227_v30 = vmul.f32 %v4566_v4, %v4470_v39 }
 0x137   : > { %1861 = vst.msk [vmem:[#allocation2 + $0x99] sm:$0xff] %vm1489_vm1, %v1829_v26  ;;  %v2757_v8 = vadd.f32 %v2725_v28, %v2657_v3  ;;  %v2158_v13 = vadd.f32 %v2126_v59, %v2058_v2  ;;  %v2159_v23 = vadd.f32 %v2127_v56, %v2059_v20  ;;  %v2327_v51 = vmul.f32 %v4568_v34, %v4474_v60 }
 0x138   : > { %1859 = vst.msk [vmem:[#allocation2 + $0x81] sm:$0xff] %vm1489_vm1, %v1827_v38  ;;  %v2758_v55 = vadd.f32 %v2726_v10, %v2658_v15  ;;  %v1928_v52 = vmul.f32 %v4556_v27, %v4443_v47  ;;  %v1929_v9 = vmul.f32 %v4566_v4, %v4443_v47  ;;  %v2028_v31 = vmul.f32 %v4558_v25, %v4446_v29 }
 0x139   : > { %v2258_v36 = vadd.f32 %v4572_v58, %v2158_v13  ;;  %v2259_v1 = vadd.f32 %v2227_v30, %v2159_v23  ;;  %v2029_v22 = vmul.f32 %v4568_v34, %v4446_v29  ;;  %v2128_v14 = vmul.f32 %v2689_v16, %v4455_v63 }
 0x13a   : > { %v2787_v61 = vpack.c.bf16 %v2758_v55, %v2757_v8  ;;  %v2426_v40 = vmul.f32 %v2689_v16, %v4490_v21  ;;  %v2060_v43 = vadd.f32 %v2028_v31, %v1928_v52  ;;  %v2427_v4 = vmul.f32 %v2690_v24, %v4490_v21 }
 0x13b   : > { %v2358_v27 = vadd.f32 %v4576_v7, %v2258_v36  ;;  %v2359_v57 = vadd.f32 %v2327_v51, %v2259_v1  ;;  %v2061_v11 = vadd.f32 %v2029_v22, %v1929_v9  ;;  %v2129_v25 = vmul.f32 %v2690_v24, %v4455_v63 }
 0x13c   : > { %3486 = vmatprep.mubr.msk.bf16.mxu1 %vm1489_vm1, %v2787_v61  ;;  %v4632_v58 = vld [vmem:[#allocation2 + $0x90] sm:$0xff]  ;;  %v2160_v49 = vadd.f32 %v2128_v14, %v2060_v43 }
 0x13d   : > { %v4634_v18 = vld [vmem:[#allocation2 + $0x91] sm:$0xff]  ;;  %v2458_v34 = vadd.f32 %v2426_v40, %v2358_v27  ;;  %v2459_v54 = vadd.f32 %v2427_v4, %v2359_v57  ;;  %v2591_v53 = vld [vmem:[#allocation2 + $0x79] sm:$0xff]  ;;  %v2161_v7 = vadd.f32 %v2129_v25, %v2061_v11  ;;  %v2529_v33 = vmul.f32 %v4478_v37, %v4632_v58 }
 0x13e   : > { %v2491_v62 = vld [vmem:[#allocation2 + $0x78] sm:$0xff]  ;;  %v2627_v50 = vmul.f32 %v4482_v44, %v2591_v53  ;;  %v2328_v24 = vmul.f32 %v2591_v53, %v4474_v60  ;;  %v2629_v32 = vmul.f32 %v4482_v44, %v4634_v18  ;;  %v2030_v57 = vmul.f32 %v2591_v53, %v4446_v29 }
 0x13f   : > { %v2527_v2 = vmul.f32 %v4478_v37, %v2491_v62  ;;  %v2228_v19 = vmul.f32 %v2491_v62, %v4470_v39  ;;  %v4638_v17 = vld [vmem:[#allocation2 + $0x98] sm:$0xff]  ;;  %v2492_v16 = vld [vmem:[#allocation2 + $0x80] sm:$0xff]  ;;  %v1930_v9 = vmul.f32 %v2491_v62, %v4443_v47 }
 0x140   : > { %v4642_v48 = vld [vmem:[#allocation2 + $0x99] sm:$0xff]  ;;  %v2592_v46 = vld [vmem:[#allocation2 + $0x81] sm:$0xff]  ;;  %v2530_v20 = vmul.f32 %v4478_v37, %v4638_v17  ;;  %v2528_v35 = vmul.f32 %v4478_v37, %v2492_v16  ;;  %v2229_v38 = vmul.f32 %v2492_v16, %v4470_v39  ;;  %v1931_v14 = vmul.f32 %v2492_v16, %v4443_v47 }
 0x141   : > { %v2691_v12 = vld [vmem:[#allocation2 + $0x7a] sm:$0xff]  ;;  %v2559_v41 = vadd.f32 %v2527_v2, %v2458_v34  ;;  %v2628_v3 = vmul.f32 %v4482_v44, %v2592_v46  ;;  %v2692_v26 = vld [vmem:[#allocation2 + $0x82] sm:$0xff]  ;;  %v2630_v28 = vmul.f32 %v4482_v44, %v4642_v48  ;;  %v2260_v15 = vadd.f32 %v2228_v19, %v2160_v49 }
 0x142   : > { %v2727_v59 = vmul.f32 %v4529_v45, %v2691_v12  ;;  %v2728_v56 = vmul.f32 %v4529_v45, %v2692_v26  ;;  %v2560_v10 = vadd.f32 %v2528_v35, %v2459_v54  ;;  %v2329_v8 = vmul.f32 %v2592_v46, %v4474_v60  ;;  %v2694_v53 = vld [vmem:[#allocation2 + $0x9a] sm:$0xff] }
 0x143   : > { %v2659_v30 = vadd.f32 %v2627_v50, %v2559_v41  ;;  %v2428_v13 = vmul.f32 %v2691_v12, %v4490_v21  ;;  %v3462_v23 = vpop.f32.mrb[12].mxu0  ;;  %v2261_v51 = vadd.f32 %v2229_v38, %v2161_v7  ;;  %v2360_v55 = vadd.f32 %v2328_v24, %v2260_v15  ;;  %v2693_v24 = vld [vmem:[#allocation2 + $0x92] sm:$0xff] }
 0x144   : > { %v2429_v52 = vmul.f32 %v2692_v26, %v4490_v21  ;;  %v1722_v31 = vmul.f32 %v3462_v23, %v4432_v0  ;;  %v1624_v36 = vpop.f32.mrb[13].mxu0  ;;  %v2660_v1 = vadd.f32 %v2628_v3, %v2560_v10  ;;  %v2031_v54 = vmul.f32 %v2592_v46, %v4446_v29 }
 0x145   : > { %v2759_v22 = vadd.f32 %v2727_v59, %v2659_v30  ;;  %v1720_v61 = vmul.f32 %v4432_v0, %v1624_v36  ;;  %v3463_v40 = vpop.f32.mrb[14].mxu0  ;;  %v2361_v43 = vadd.f32 %v2329_v8, %v2261_v51  ;;  %v2460_v27 = vadd.f32 %v2428_v13, %v2360_v55 }
 0x146   : > { %v1758_v4 = vadd.f32 %v4435_v42, %v1722_v31  ;;  %v1723_v11 = vmul.f32 %v3463_v40, %v4432_v0  ;;  %v1627_v25 = vpop.f32.mrb[15].mxu0  ;;  %v2760_v34 = vadd.f32 %v2728_v56, %v2660_v1  ;;  %v2062_v35 = vadd.f32 %v2030_v57, %v1930_v9 }
 0x147   : > { %v1756_v62 = vadd.f32 %v4435_v42, %v1720_v61  ;;  %v1721_v49 = vmul.f32 %v4432_v0, %v1627_v25  ;;  %v2461_v2 = vadd.f32 %v2429_v52, %v2361_v43  ;;  %v2561_v7 = vadd.f32 %v2529_v33, %v2460_v27 }
 0x148   : > { %v1832_v19 = vmax.f32 %v1758_v4, 0.0  ;;  %v1759_v16 = vadd.f32 %v4435_v42, %v1723_v11  ;;  %v2788_v50 = vpack.c.bf16 %v2760_v34, %v2759_v22  ;;  %v2063_v38 = vadd.f32 %v2031_v54, %v1931_v14 }
 0x149   : > { %v1830_v41 = vmax.f32 %v1756_v62, 0.0  ;;  %v1757_v3 = vadd.f32 %v4435_v42, %v1721_v49  ;;  %v2562_v59 = vadd.f32 %v2530_v20, %v2461_v2  ;;  %v2661_v56 = vadd.f32 %v2629_v32, %v2561_v7 }
 0x14a   : > { %1864 = vst.msk [vmem:[#allocation2 + $0xc1] sm:$0xff] %vm1489_vm1, %v1832_v19  ;;  %v1833_v46 = vmax.f32 %v1759_v16, 0.0  ;;  %3487 = vmatmul.mubr.msk.bf16.gmra.mrb[4].mxu1 %vm1489_vm1, %v2788_v50  ;;  %v2130_v33 = vmul.f32 %v2691_v12, %v4455_v63  ;;  %v2131_v15 = vmul.f32 %v2692_v26, %v4455_v63  ;;  %v2729_v8 = vmul.f32 %v4529_v45, %v2693_v24 }
 0x14b   : > { %1862 = vst.msk [vmem:[#allocation2 + $0xa9] sm:$0xff] %vm1489_vm1, %v1830_v41  ;;  %v1831_v10 = vmax.f32 %v1757_v3, 0.0  ;;  %v2662_v30 = vadd.f32 %v2630_v28, %v2562_v59  ;;  %v2730_v13 = vmul.f32 %v4529_v45, %v2694_v53  ;;  %v2230_v23 = vmul.f32 %v4632_v58, %v4470_v39 }
 0x14c   : > { %1865 = vst.msk [vmem:[#allocation2 + $0xc9] sm:$0xff] %vm1489_vm1, %v1833_v46  ;;  %v2162_v20 = vadd.f32 %v2130_v33, %v2062_v35  ;;  %v2163_v32 = vadd.f32 %v2131_v15, %v2063_v38  ;;  %v2231_v12 = vmul.f32 %v4638_v17, %v4470_v39  ;;  %v2761_v26 = vadd.f32 %v2729_v8, %v2661_v56 }
 0x14d   : > { %1863 = vst.msk [vmem:[#allocation2 + $0xb1] sm:$0xff] %vm1489_vm1, %v1831_v10  ;;  %v2762_v51 = vadd.f32 %v2730_v13, %v2662_v30  ;;  %v2330_v28 = vmul.f32 %v4634_v18, %v4474_v60  ;;  %v2331_v55 = vmul.f32 %v4642_v48, %v4474_v60  ;;  %v1932_v31 = vmul.f32 %v4632_v58, %v4443_v47 }
 0x14e   : > { %v2262_v52 = vadd.f32 %v2230_v23, %v2162_v20  ;;  %v2263_v9 = vadd.f32 %v2231_v12, %v2163_v32  ;;  %v1933_v36 = vmul.f32 %v4638_v17, %v4443_v47  ;;  %v2430_v22 = vmul.f32 %v2693_v24, %v4490_v21 }
 0x14f   : > { %v2789_v1 = vpack.c.bf16 %v2762_v51, %v2761_v26  ;;  %v2032_v14 = vmul.f32 %v4634_v18, %v4446_v29  ;;  %v2033_v61 = vmul.f32 %v4642_v48, %v4446_v29  ;;  %v2431_v27 = vmul.f32 %v2694_v53, %v4490_v21 }
 0x150   : > { %v2362_v40 = vadd.f32 %v2330_v28, %v2262_v52  ;;  %v2363_v43 = vadd.f32 %v2331_v55, %v2263_v9  ;;  %v2132_v57 = vmul.f32 %v2693_v24, %v4455_v63  ;;  %v2133_v48 = vmul.f32 %v2694_v53, %v4455_v63 }
 0x151   : > { %3490 = vmatprep.mubr.msk.bf16.mxu1 %vm1489_vm1, %v2789_v1  ;;  %v2064_v58 = vadd.f32 %v2032_v14, %v1932_v31  ;;  %v2065_v4 = vadd.f32 %v2033_v61, %v1933_v36  ;;  %v4701_v17 = vld [vmem:[#allocation2 + $0xc0] sm:$0xff] }
 0x152   : > { %v4703_v11 = vld [vmem:[#allocation2 + $0xc1] sm:$0xff]  ;;  %v2462_v25 = vadd.f32 %v2430_v22, %v2362_v40  ;;  %v2463_v34 = vadd.f32 %v2431_v27, %v2363_v43  ;;  %v2595_v54 = vld [vmem:[#allocation2 + $0xa9] sm:$0xff]  ;;  %v2533_v7 = vmul.f32 %v4478_v37, %v4701_v17 }
 0x153   : > { %v2495_v18 = vld [vmem:[#allocation2 + $0xa8] sm:$0xff]  ;;  %v2631_v49 = vmul.f32 %v4482_v44, %v2595_v54  ;;  %v2633_v16 = vmul.f32 %v4482_v44, %v4703_v11  ;;  %v2164_v41 = vadd.f32 %v2132_v57, %v2064_v58  ;;  %v2165_v3 = vadd.f32 %v2133_v48, %v2065_v4 }
 0x154   : > { %v2531_v62 = vmul.f32 %v4478_v37, %v2495_v18  ;;  %v4708_v2 = vld [vmem:[#allocation2 + $0xc8] sm:$0xff]  ;;  %v2496_v50 = vld [vmem:[#allocation2 + $0xb0] sm:$0xff]  ;;  %v2232_v53 = vmul.f32 %v2495_v18, %v4470_v39  ;;  %v2332_v59 = vmul.f32 %v2595_v54, %v4474_v60 }
 0x155   : > { %v4712_v19 = vld [vmem:[#allocation2 + $0xc9] sm:$0xff]  ;;  %v2596_v24 = vld [vmem:[#allocation2 + $0xb1] sm:$0xff]  ;;  %v2532_v56 = vmul.f32 %v4478_v37, %v2496_v50  ;;  %v2534_v33 = vmul.f32 %v4478_v37, %v4708_v2  ;;  %v2233_v8 = vmul.f32 %v2496_v50, %v4470_v39 }
 0x156   : > { %v2695_v35 = vld [vmem:[#allocation2 + $0xaa] sm:$0xff]  ;;  %v2563_v46 = vadd.f32 %v2531_v62, %v2462_v25  ;;  %v2696_v38 = vld [vmem:[#allocation2 + $0xb2] sm:$0xff]  ;;  %v2634_v15 = vmul.f32 %v4482_v44, %v4712_v19  ;;  %v2632_v10 = vmul.f32 %v4482_v44, %v2596_v24  ;;  %v2264_v13 = vadd.f32 %v2232_v53, %v2164_v41 }
 0x157   : > { %v2731_v30 = vmul.f32 %v4529_v45, %v2695_v35  ;;  %v3466_v20 = vpop.f32.mrb[16].mxu0  ;;  %v2564_v32 = vadd.f32 %v2532_v56, %v2463_v34  ;;  %v2732_v12 = vmul.f32 %v4529_v45, %v2696_v38  ;;  %v2333_v26 = vmul.f32 %v2596_v24, %v4474_v60 }
 0x158   : > { %v2663_v23 = vadd.f32 %v2631_v49, %v2563_v46  ;;  %v1726_v51 = vmul.f32 %v3466_v20, %v4432_v0  ;;  %v1640_v28 = vpop.f32.mrb[17].mxu0  ;;  %v2265_v55 = vadd.f32 %v2233_v8, %v2165_v3  ;;  %v2364_v52 = vadd.f32 %v2332_v59, %v2264_v13  ;;  %v2697_v3 = vld [vmem:[#allocation2 + $0xc2] sm:$0xff]  ;;  %v2698_v46 = vld [vmem:[#allocation2 + $0xca] sm:$0xff] }
 0x159   : > { %v2432_v9 = vmul.f32 %v2695_v35, %v4490_v21  ;;  %v1724_v31 = vmul.f32 %v4432_v0, %v1640_v28  ;;  %v3467_v36 = vpop.f32.mrb[18].mxu0  ;;  %v2664_v1 = vadd.f32 %v2632_v10, %v2564_v32  ;;  %v2433_v14 = vmul.f32 %v2696_v38, %v4490_v21 }
 0x15a   : > { %v2763_v22 = vadd.f32 %v2731_v30, %v2663_v23  ;;  %v1762_v61 = vadd.f32 %v4435_v42, %v1726_v51  ;;  %v1727_v40 = vmul.f32 %v3467_v36, %v4432_v0  ;;  %v1643_v43 = vpop.f32.mrb[19].mxu0  ;;  %v2365_v27 = vadd.f32 %v2333_v26, %v2265_v55 }
 0x15b   : > { %v2464_v57 = vadd.f32 %v2432_v9, %v2364_v52  ;;  %v1760_v58 = vadd.f32 %v4435_v42, %v1724_v31  ;;  %v1725_v4 = vmul.f32 %v4432_v0, %v1643_v43  ;;  %v2764_v25 = vadd.f32 %v2732_v12, %v2664_v1 }
 0x15c   : > { %v1934_v34 = vmul.f32 %v2495_v18, %v4443_v47  ;;  %v1836_v48 = vmax.f32 %v1762_v61, 0.0  ;;  %v1763_v62 = vadd.f32 %v4435_v42, %v1727_v40  ;;  %v2465_v49 = vadd.f32 %v2433_v14, %v2365_v27 }
 0x15d   : > { %v2565_v41 = vadd.f32 %v2533_v7, %v2464_v57  ;;  %v1834_v53 = vmax.f32 %v1760_v58, 0.0  ;;  %v1761_v59 = vadd.f32 %v4435_v42, %v1725_v4  ;;  %v2790_v56 = vpack.c.bf16 %v2764_v25, %v2763_v22 }
 0x15e   : > { %v1935_v10 = vmul.f32 %v2496_v50, %v4443_v47  ;;  %1868 = vst.msk [vmem:[#allocation2 + $0xf1] sm:$0xff] %vm1489_vm1, %v1836_v48  ;;  %v1837_v30 = vmax.f32 %v1763_v62, 0.0  ;;  %v2566_v8 = vadd.f32 %v2534_v33, %v2465_v49  ;;  %v2034_v18 = vmul.f32 %v2595_v54, %v4446_v29 }
 0x15f   : > { %v2665_v13 = vadd.f32 %v2633_v16, %v2565_v41  ;;  %1866 = vst.msk [vmem:[#allocation2 + $0xd9] sm:$0xff] %vm1489_vm1, %v1834_v53  ;;  %v1835_v20 = vmax.f32 %v1761_v59, 0.0  ;;  %3491 = vmatmul.mubr.msk.bf16.gmra.mrb[8].mxu1 %vm1489_vm1, %v2790_v56  ;;  %v2733_v7 = vmul.f32 %v4529_v45, %v2697_v3  ;;  %v2035_v32 = vmul.f32 %v2596_v24, %v4446_v29 }
 0x160   : > { %v2134_v23 = vmul.f32 %v2695_v35, %v4455_v63  ;;  %1869 = vst.msk [vmem:[#allocation2 + $0xf9] sm:$0xff] %vm1489_vm1, %v1837_v30  ;;  %v2666_v50 = vadd.f32 %v2634_v15, %v2566_v8  ;;  %v2734_v12 = vmul.f32 %v4529_v45, %v2698_v46  ;;  %v2066_v33 = vadd.f32 %v2034_v18, %v1934_v34 }
 0x161   : > { %v2135_v16 = vmul.f32 %v2696_v38, %v4455_v63  ;;  %1867 = vst.msk [vmem:[#allocation2 + $0xe1] sm:$0xff] %vm1489_vm1, %v1835_v20  ;;  %v2765_v54 = vadd.f32 %v2733_v7, %v2665_v13  ;;  %v2067_v26 = vadd.f32 %v2035_v32, %v1935_v10  ;;  %v2234_v51 = vmul.f32 %v4701_v17, %v4470_v39 }
 0x162   : > { %v2235_v24 = vmul.f32 %v4708_v2, %v4470_v39  ;;  %v2766_v28 = vadd.f32 %v2734_v12, %v2666_v50  ;;  %v2166_v35 = vadd.f32 %v2134_v23, %v2066_v33  ;;  %v2334_v15 = vmul.f32 %v4703_v11, %v4474_v60 }
 0x163   : > { %v2335_v55 = vmul.f32 %v4712_v19, %v4474_v60  ;;  %v2167_v52 = vadd.f32 %v2135_v16, %v2067_v26  ;;  %v1936_v38 = vmul.f32 %v4701_v17, %v4443_v47  ;;  %v1937_v9 = vmul.f32 %v4708_v2, %v4443_v47 }
 0x164   : > { %v2036_v31 = vmul.f32 %v4703_v11, %v4446_v29  ;;  %v2791_v36 = vpack.c.bf16 %v2766_v28, %v2765_v54  ;;  %v2266_v1 = vadd.f32 %v2234_v51, %v2166_v35  ;;  %v2037_v22 = vmul.f32 %v4712_v19, %v4446_v29 }
 0x165   : > { %v2136_v14 = vmul.f32 %v2697_v3, %v4455_v63  ;;  %v2267_v61 = vadd.f32 %v2235_v24, %v2167_v52  ;;  %v2434_v40 = vmul.f32 %v2697_v3, %v4490_v21  ;;  %v2435_v43 = vmul.f32 %v2698_v46, %v4490_v21  ;;  %v4770_v17 = vld [vmem:[#allocation2 + $0xf0] sm:$0xff] }
 0x166   : > { %v2068_v27 = vadd.f32 %v2036_v31, %v1936_v38  ;;  %v4772_v57 = vld [vmem:[#allocation2 + $0xf1] sm:$0xff]  ;;  %3494 = vmatprep.mubr.msk.bf16.mxu1 %vm1489_vm1, %v2791_v36  ;;  %v2366_v11 = vadd.f32 %v2334_v15, %v2266_v1  ;;  %v4775_v58 = vld [vmem:[#allocation2 + $0xd9] sm:$0xff]  ;;  %v2069_v4 = vadd.f32 %v2037_v22, %v1937_v9  ;;  %v2137_v19 = vmul.f32 %v2698_v46, %v4455_v63 }
 0x167   : > { %v2499_v2 = vld [vmem:[#allocation2 + $0xd8] sm:$0xff]  ;;  %v2537_v25 = vmul.f32 %v4478_v37, %v4770_v17  ;;  %v2367_v34 = vadd.f32 %v2335_v55, %v2267_v61  ;;  %v2635_v62 = vmul.f32 %v4482_v44, %v4775_v58  ;;  %v2637_v49 = vmul.f32 %v4482_v44, %v4772_v57 }
 0x168   : > { %v2535_v48 = vmul.f32 %v4478_v37, %v2499_v2  ;;  %v2466_v41 = vadd.f32 %v2434_v40, %v2366_v11  ;;  %v2500_v3 = vld [vmem:[#allocation2 + $0xe0] sm:$0xff]  ;;  %v2168_v56 = vadd.f32 %v2136_v14, %v2068_v27  ;;  %v2169_v10 = vadd.f32 %v2137_v19, %v2069_v4  ;;  %v4795_v12 = vld [vmem:[#allocation2 + $0xf8] sm:$0xff] }
 0x169   : > { %v2600_v53 = vld [vmem:[#allocation2 + $0xe1] sm:$0xff]  ;;  %v2236_v46 = vmul.f32 %v2499_v2, %v4470_v39  ;;  %v2467_v30 = vadd.f32 %v2435_v43, %v2367_v34  ;;  %v2536_v8 = vmul.f32 %v4478_v37, %v2500_v3  ;;  %v2336_v20 = vmul.f32 %v4775_v58, %v4474_v60  ;;  %v4797_v33 = vld [vmem:[#allocation2 + $0xf9] sm:$0xff] }
 0x16a   : > { %v4785_v59 = vld [vmem:[#allocation2 + $0xda] sm:$0xff]  ;;  %v2636_v13 = vmul.f32 %v4482_v44, %v2600_v53  ;;  %v2700_v18 = vld [vmem:[#allocation2 + $0xe2] sm:$0xff]  ;;  %v2567_v7 = vadd.f32 %v2535_v48, %v2466_v41  ;;  %v2237_v23 = vmul.f32 %v2500_v3, %v4470_v39  ;;  %v2337_v26 = vmul.f32 %v2600_v53, %v4474_v60  ;;  %v4803_v24 = vld [vmem:[#allocation2 + $0xf2] sm:$0xff] }
 0x16b   : > { %v2735_v32 = vmul.f32 %v4529_v45, %v4785_v59  ;;  %v2268_v50 = vadd.f32 %v2236_v46, %v2168_v56  ;;  %v2568_v16 = vadd.f32 %v2536_v8, %v2467_v30  ;;  %v2736_v54 = vmul.f32 %v4529_v45, %v2700_v18  ;;  %v2702_v8 = vld [vmem:[#allocation2 + $0xfa] sm:$0xff] }
 0x16c   : > { %v2436_v51 = vmul.f32 %v4785_v59, %v4490_v21  ;;  %v3470_v28 = vpop.f32.mrb[20].mxu0  ;;  %v2667_v35 = vadd.f32 %v2635_v62, %v2567_v7  ;;  %v2269_v15 = vadd.f32 %v2237_v23, %v2169_v10  ;;  %v2437_v52 = vmul.f32 %v2700_v18, %v4490_v21 }
 0x16d   : > { %v2368_v55 = vadd.f32 %v2336_v20, %v2268_v50  ;;  %v1730_v38 = vmul.f32 %v3470_v28, %v4432_v0  ;;  %v1656_v9 = vpop.f32.mrb[21].mxu0  ;;  %v2668_v31 = vadd.f32 %v2636_v13, %v2568_v16  ;;  %v2538_v36 = vmul.f32 %v4478_v37, %v4795_v12 }
 0x16e   : > { %v2638_v1 = vmul.f32 %v4482_v44, %v4797_v33  ;;  %v1728_v22 = vmul.f32 %v4432_v0, %v1656_v9  ;;  %v3471_v14 = vpop.f32.mrb[22].mxu0  ;;  %v2369_v61 = vadd.f32 %v2337_v26, %v2269_v15  ;;  %v2737_v43 = vmul.f32 %v4529_v45, %v4803_v24 }
 0x16f   : > { %v2468_v40 = vadd.f32 %v2436_v51, %v2368_v55  ;;  %v1766_v27 = vadd.f32 %v4435_v42, %v1730_v38  ;;  %v1731_v11 = vmul.f32 %v3471_v14, %v4432_v0  ;;  %v1659_v4 = vpop.f32.mrb[23].mxu0  ;;  %v2767_v19 = vadd.f32 %v2735_v32, %v2667_v35 }
 0x170   : > { %v2768_v34 = vadd.f32 %v2736_v54, %v2668_v31  ;;  %v1764_v48 = vadd.f32 %v4435_v42, %v1728_v22  ;;  %v1729_v62 = vmul.f32 %v4432_v0, %v1659_v4  ;;  %v2469_v41 = vadd.f32 %v2437_v52, %v2369_v61 }
 0x171   : > { %v2569_v56 = vadd.f32 %v2537_v25, %v2468_v40  ;;  %v1840_v10 = vmax.f32 %v1766_v27, 0.0  ;;  %v1767_v46 = vadd.f32 %v4435_v42, %v1731_v11  ;;  %v1938_v13 = vmul.f32 %v2499_v2, %v4443_v47 }
 0x172   : > { %v2792_v30 = vpack.c.bf16 %v2768_v34, %v2767_v19  ;;  %v1838_v20 = vmax.f32 %v1764_v48, 0.0  ;;  %v1765_v7 = vadd.f32 %v4435_v42, %v1729_v62  ;;  %v2570_v23 = vadd.f32 %v2538_v36, %v2469_v41 }
 0x173   : > { %v2669_v50 = vadd.f32 %v2637_v49, %v2569_v56  ;;  %1872 = vst.msk [vmem:[#allocation2 + $0x121] sm:$0xff] %vm1489_vm1, %v1840_v10  ;;  %v1841_v32 = vmax.f32 %v1767_v46, 0.0  ;;  %v1939_v16 = vmul.f32 %v2500_v3, %v4443_v47  ;;  %v2038_v25 = vmul.f32 %v4775_v58, %v4446_v29 }
 0x174   : > { %3495 = vmatmul.mubr.msk.bf16.gmra.mrb[12].mxu1 %vm1489_vm1, %v2792_v30  ;;  %v2039_v54 = vmul.f32 %v2600_v53, %v4446_v29  ;;  %1870 = vst.msk [vmem:[#allocation2 + $0x109] sm:$0xff] %vm1489_vm1, %v1838_v20  ;;  %v1839_v2 = vmax.f32 %v1765_v7, 0.0  ;;  %v2670_v26 = vadd.f32 %v2638_v1, %v2570_v23  ;;  %v2738_v51 = vmul.f32 %v4529_v45, %v2702_v8 }
 0x175   : > { %v2138_v49 = vmul.f32 %v4785_v59, %v4455_v63  ;;  %1873 = vst.msk [vmem:[#allocation2 + $0x129] sm:$0xff] %vm1489_vm1, %v1841_v32  ;;  %v2070_v28 = vadd.f32 %v2038_v25, %v1938_v13  ;;  %v2139_v3 = vmul.f32 %v2700_v18, %v4455_v63  ;;  %v2769_v58 = vadd.f32 %v2737_v43, %v2669_v50 }
 0x176   : > { %v2071_v35 = vadd.f32 %v2039_v54, %v1939_v16  ;;  %1871 = vst.msk [vmem:[#allocation2 + $0x111] sm:$0xff] %vm1489_vm1, %v1839_v2  ;;  %v2770_v15 = vadd.f32 %v2738_v51, %v2670_v26  ;;  %v2238_v53 = vmul.f32 %v4770_v17, %v4470_v39  ;;  %v2239_v55 = vmul.f32 %v4795_v12, %v4470_v39 }
 0x177   : > { %v2170_v52 = vadd.f32 %v2138_v49, %v2070_v28  ;;  %v2338_v59 = vmul.f32 %v4772_v57, %v4474_v60  ;;  %v2339_v9 = vmul.f32 %v4797_v33, %v4474_v60  ;;  %v1940_v18 = vmul.f32 %v4770_v17, %v4443_v47 }
 0x178   : > { %v2171_v38 = vadd.f32 %v2139_v3, %v2071_v35  ;;  %v2793_v31 = vpack.c.bf16 %v2770_v15, %v2769_v58  ;;  %v1941_v36 = vmul.f32 %v4795_v12, %v4443_v47  ;;  %v2040_v1 = vmul.f32 %v4772_v57, %v4446_v29 }
 0x179   : > { %v2270_v22 = vadd.f32 %v2238_v53, %v2170_v52  ;;  %v2041_v61 = vmul.f32 %v4797_v33, %v4446_v29  ;;  %v2140_v40 = vmul.f32 %v4803_v24, %v4455_v63  ;;  %v2438_v43 = vmul.f32 %v4803_v24, %v4490_v21 }
 0x17a   : > { %v2271_v14 = vadd.f32 %v2239_v55, %v2171_v38  ;;  %3498 = vmatprep.mubr.msk.bf16.mxu1 %vm1489_vm1, %v2793_v31  ;;  %v2439_v17 = vmul.f32 %v2702_v8, %v4490_v21  ;;  %v2072_v27 = vadd.f32 %v2040_v1, %v1940_v18  ;;  %v2141_v12 = vmul.f32 %v2702_v8, %v4455_v63  ;;  %v4857_v11 = vld [vmem:[#allocation2 + $0x120] sm:$0xff] }
 0x17b   : > { %v2370_v57 = vadd.f32 %v2338_v59, %v2270_v22  ;;  %v4859_v19 = vld [vmem:[#allocation2 + $0x108] sm:$0xff]  ;;  %v2073_v34 = vadd.f32 %v2041_v61, %v1941_v36  ;;  %v2541_v48 = vmul.f32 %v4478_v37, %v4857_v11 }
 0x17c   : > { %v2371_v4 = vadd.f32 %v2339_v9, %v2271_v14  ;;  %v4861_v33 = vld [vmem:[#allocation2 + $0x109] sm:$0xff]  ;;  %v2539_v24 = vmul.f32 %v4478_v37, %v4859_v19  ;;  %v2172_v41 = vadd.f32 %v2140_v40, %v2072_v27  ;;  %v2240_v56 = vmul.f32 %v4859_v19, %v4470_v39  ;;  %v4891_v28 = vld [vmem:[#allocation2 + $0x121] sm:$0xff] }
 0x17d   : > { %v2639_v62 = vmul.f32 %v4482_v44, %v4861_v33  ;;  %v2470_v10 = vadd.f32 %v2438_v43, %v2370_v57  ;;  %v2504_v30 = vld [vmem:[#allocation2 + $0x110] sm:$0xff]  ;;  %v2173_v20 = vadd.f32 %v2141_v12, %v2073_v34  ;;  %v2340_v7 = vmul.f32 %v4861_v33, %v4474_v60  ;;  %v4885_v54 = vld [vmem:[#allocation2 + $0x128] sm:$0xff] }
 0x17e   : > { %v2471_v46 = vadd.f32 %v2439_v17, %v2371_v4  ;;  %v4871_v8 = vld [vmem:[#allocation2 + $0x111] sm:$0xff]  ;;  %v2540_v23 = vmul.f32 %v4478_v37, %v2504_v30  ;;  %v2241_v25 = vmul.f32 %v2504_v30, %v4470_v39  ;;  %v2272_v51 = vadd.f32 %v2240_v56, %v2172_v41  ;;  %v2606_v1 = vld [vmem:[#allocation2 + $0x129] sm:$0xff] }
 0x17f   : > { %v4873_v13 = vld [vmem:[#allocation2 + $0x10a] sm:$0xff]  ;;  %v2640_v50 = vmul.f32 %v4482_v44, %v4871_v8  ;;  %v4880_v32 = vld [vmem:[#allocation2 + $0x112] sm:$0xff]  ;;  %v2571_v2 = vadd.f32 %v2539_v24, %v2470_v10  ;;  %v2341_v49 = vmul.f32 %v4871_v8, %v4474_v60  ;;  %v2542_v59 = vmul.f32 %v4478_v37, %v4885_v54  ;;  %v2705_v34 = vld [vmem:[#allocation2 + $0x122] sm:$0xff] }
 0x180   : > { %v2739_v16 = vmul.f32 %v4529_v45, %v4873_v13  ;;  %v2740_v26 = vmul.f32 %v4529_v45, %v4880_v32  ;;  %v3474_v35 = vpop.f32.mrb[24].mxu0  ;;  %v2572_v3 = vadd.f32 %v2540_v23, %v2471_v46  ;;  %v2273_v58 = vadd.f32 %v2241_v25, %v2173_v20  ;;  %v2706_v24 = vld [vmem:[#allocation2 + $0x12a] sm:$0xff]  ;;  %v4914_v25 = vld [vmem:[%s5239_s4 + $0x8] ss:$0 sm:$0xff] }
 0x181   : > { %v2440_v15 = vmul.f32 %v4873_v13, %v4490_v21  ;;  %v2441_v53 = vmul.f32 %v4880_v32, %v4490_v21  ;;  %v1734_v55 = vmul.f32 %v3474_v35, %v4432_v0  ;;  %v1672_v52 = vpop.f32.mrb[25].mxu0  ;;  %v2671_v38 = vadd.f32 %v2639_v62, %v2571_v2 }
 0x182   : > { %v2372_v45 = vadd.f32 %v2340_v7, %v2272_v51  ;;  %v1732_v9 = vmul.f32 %v4432_v0, %v1672_v52  ;;  %v3475_v31 = vpop.f32.mrb[26].mxu0  ;;  %v2672_v18 = vadd.f32 %v2640_v50, %v2572_v3  ;;  %v2373_v36 = vadd.f32 %v2341_v49, %v2273_v58 }
 0x183   : > { %v2641_v22 = vmul.f32 %v4482_v44, %v4891_v28  ;;  %v1770_v14 = vadd.f32 %v4435_v42, %v1734_v55  ;;  %v1735_v61 = vmul.f32 %v3475_v31, %v4432_v0  ;;  %v1675_v40 = vpop.f32.mrb[27].mxu0  ;;  %v2771_v43 = vadd.f32 %v2739_v16, %v2671_v38 }
 0x184   : > { %v2472_v17 = vadd.f32 %v2440_v15, %v2372_v45  ;;  %v1768_v27 = vadd.f32 %v4435_v42, %v1732_v9  ;;  %v1733_v12 = vmul.f32 %v4432_v0, %v1675_v40  ;;  %v2772_v57 = vadd.f32 %v2740_v26, %v2672_v18 }
 0x185   : > { %v2473_v4 = vadd.f32 %v2441_v53, %v2373_v36  ;;  %v1844_v62 = vmax.f32 %v1770_v14, 0.0  ;;  %v1771_v41 = vadd.f32 %v4435_v42, %v1735_v61  ;;  %v2642_v10 = vmul.f32 %v4482_v44, %v2606_v1 }
 0x186   : > { %v2573_v56 = vadd.f32 %v2541_v48, %v2472_v17  ;;  %v1842_v46 = vmax.f32 %v1768_v27, 0.0  ;;  %v1769_v20 = vadd.f32 %v4435_v42, %v1733_v12  ;;  %v2794_v7 = vpack.c.bf16 %v2772_v57, %v2771_v43 }
 0x187   : > { %v2574_v23 = vadd.f32 %v2542_v59, %v2473_v4  ;;  %1876 = vst.msk [vmem:[#allocation2 + $0x151] sm:$0xff] %vm1489_vm1, %v1844_v62  ;;  %v1845_v50 = vmax.f32 %v1771_v41, 0.0  ;;  %v2741_v2 = vmul.f32 %v4914_v25, %v2705_v34  ;;  %v2742_v48 = vmul.f32 %v4914_v25, %v2706_v24 }
 0x188   : > { %v2673_v16 = vadd.f32 %v2641_v22, %v2573_v56  ;;  %1874 = vst.msk [vmem:[#allocation2 + $0x139] sm:$0xff] %vm1489_vm1, %v1842_v46  ;;  %v1843_v26 = vmax.f32 %v1769_v20, 0.0  ;;  %3499 = vmatmul.mubr.msk.bf16.gmra.mrb[16].mxu1 %vm1489_vm1, %v2794_v7  ;;  %v1942_v49 = vmul.f32 %v4859_v19, %v4443_v47  ;;  %v1943_v35 = vmul.f32 %v2504_v30, %v4443_v47 }
 0x189   : > { %v2674_v51 = vadd.f32 %v2642_v10, %v2574_v23  ;;  %1877 = vst.msk [vmem:[#allocation2 + $0x159] sm:$0xff] %vm1489_vm1, %v1845_v50  ;;  %v2042_v3 = vmul.f32 %v4861_v33, %v4446_v29  ;;  %v2043_v58 = vmul.f32 %v4871_v8, %v4446_v29  ;;  %v2142_v15 = vmul.f32 %v4873_v13, %v4455_v63 }
 0x18a   : > { %1875 = vst.msk [vmem:[#allocation2 + $0x141] sm:$0xff] %vm1489_vm1, %v1843_v26  ;;  %v2773_v53 = vadd.f32 %v2741_v2, %v2673_v16  ;;  %v2143_v19 = vmul.f32 %v4880_v32, %v4455_v63  ;;  %v2242_v30 = vmul.f32 %v4857_v11, %v4470_v39  ;;  %v2243_v33 = vmul.f32 %v4885_v54, %v4470_v39 }
 0x18b   : > { %v2774_v55 = vadd.f32 %v2742_v48, %v2674_v51  ;;  %v2074_v52 = vadd.f32 %v2042_v3, %v1942_v49  ;;  %v2075_v38 = vadd.f32 %v2043_v58, %v1943_v35  ;;  %v2342_v8 = vmul.f32 %v4891_v28, %v4474_v60 }
 0x18c   : > { %v1944_v13 = vmul.f32 %v4857_v11, %v4443_v47  ;;  %v1945_v31 = vmul.f32 %v4885_v54, %v4443_v47  ;;  %v2044_v32 = vmul.f32 %v4891_v28, %v4446_v29  ;;  %v2343_v18 = vmul.f32 %v2606_v1, %v4474_v60 }
 0x18d   : > { %v2795_v45 = vpack.c.bf16 %v2774_v55, %v2773_v53  ;;  %v2174_v59 = vadd.f32 %v2142_v15, %v2074_v52  ;;  %v2175_v9 = vadd.f32 %v2143_v19, %v2075_v38  ;;  %v2442_v36 = vmul.f32 %v2705_v34, %v4490_v21 }
 0x18e   : > { %v2045_v22 = vmul.f32 %v2606_v1, %v4446_v29  ;;  %v2144_v14 = vmul.f32 %v2705_v34, %v4455_v63  ;;  %v4950_v61 = vld [vmem:[#allocation2 + $0x150] sm:$0xff]  ;;  %v2443_v43 = vmul.f32 %v2706_v24, %v4490_v21  ;;  %v2076_v28 = vadd.f32 %v2044_v32, %v1944_v13 }
 0x18f   : > { %3502 = vmatprep.mubr.msk.bf16.mxu1 %vm1489_vm1, %v2795_v45  ;;  %v2274_v11 = vadd.f32 %v2242_v30, %v2174_v59  ;;  %v2275_v40 = vadd.f32 %v2243_v33, %v2175_v9  ;;  %v4953_v54 = vld [vmem:[#allocation2 + $0x138] sm:$0xff]  ;;  %v2145_v12 = vmul.f32 %v2706_v24, %v4455_v63  ;;  %v2545_v1 = vmul.f32 %v4478_v37, %v4950_v61 }
 0x190   : > { %v4955_v17 = vld [vmem:[#allocation2 + $0x139] sm:$0xff]  ;;  %v2077_v27 = vadd.f32 %v2045_v22, %v1945_v31  ;;  %v2244_v57 = vmul.f32 %v4953_v54, %v4470_v39  ;;  %v2543_v41 = vmul.f32 %v4478_v37, %v4953_v54  ;;  %v2176_v23 = vadd.f32 %v2144_v14, %v2076_v28  ;;  %v2609_v19 = vld [vmem:[#allocation2 + $0x151] sm:$0xff] }
 0x191   : > { %v2374_v4 = vadd.f32 %v2342_v8, %v2274_v11  ;;  %v2375_v34 = vadd.f32 %v2343_v18, %v2275_v40  ;;  %v4962_v62 = vld [vmem:[#allocation2 + $0x140] sm:$0xff]  ;;  %v2643_v10 = vmul.f32 %v4482_v44, %v4955_v17  ;;  %v2344_v50 = vmul.f32 %v4955_v17, %v4474_v60  ;;  %v4982_v51 = vld [vmem:[#allocation2 + $0x158] sm:$0xff] }
 0x192   : > { %v4966_v56 = vld [vmem:[#allocation2 + $0x141] sm:$0xff]  ;;  %v2544_v24 = vmul.f32 %v4478_v37, %v4962_v62  ;;  %v2177_v48 = vadd.f32 %v2145_v12, %v2077_v27  ;;  %v2245_v26 = vmul.f32 %v4962_v62, %v4470_v39  ;;  %v2276_v3 = vadd.f32 %v2244_v57, %v2176_v23  ;;  %v2610_v40 = vld [vmem:[#allocation2 + $0x159] sm:$0xff] }
 0x193   : > { %v4970_v46 = vld [vmem:[#allocation2 + $0x13a] sm:$0xff]  ;;  %v2644_v20 = vmul.f32 %v4482_v44, %v4966_v56  ;;  %v4976_v7 = vld [vmem:[#allocation2 + $0x142] sm:$0xff]  ;;  %v2474_v16 = vadd.f32 %v2442_v36, %v2374_v4  ;;  %v2475_v2 = vadd.f32 %v2443_v43, %v2375_v34  ;;  %v2345_v58 = vmul.f32 %v4966_v56, %v4474_v60 }
 0x194   : > { %v2743_v49 = vmul.f32 %v4914_v25, %v4970_v46  ;;  %v2744_v35 = vmul.f32 %v4914_v25, %v4976_v7  ;;  %v2277_v52 = vadd.f32 %v2245_v26, %v2177_v48  ;;  %v2444_v38 = vmul.f32 %v4970_v46, %v4490_v21 }
 0x195   : > { %v3478_v15 = vpop.f32.mrb[28].mxu0  ;;  %v2575_v53 = vadd.f32 %v2543_v41, %v2474_v16  ;;  %v2576_v55 = vadd.f32 %v2544_v24, %v2475_v2  ;;  %v2376_v33 = vadd.f32 %v2344_v50, %v2276_v3  ;;  %v2445_v8 = vmul.f32 %v4976_v7, %v4490_v21  ;;  %v2709_v16 = vld [vmem:[#allocation2 + $0x152] sm:$0xff]  ;;  %v2710_v2 = vld [vmem:[#allocation2 + $0x15a] sm:$0xff] }
 0x196   : > { %v1738_v30 = vmul.f32 %v3478_v15, %v4432_v0  ;;  %v1688_v45 = vpop.f32.mrb[29].mxu0  ;;  %v2546_v13 = vmul.f32 %v4478_v37, %v4982_v51  ;;  %v2377_v18 = vadd.f32 %v2345_v58, %v2277_v52  ;;  %v2645_v43 = vmul.f32 %v4482_v44, %v2609_v19 }
 0x197   : > { %v1736_v59 = vmul.f32 %v4432_v0, %v1688_v45  ;;  %v3479_v9 = vpop.f32.mrb[30].mxu0  ;;  %v2675_v31 = vadd.f32 %v2643_v10, %v2575_v53  ;;  %v2676_v32 = vadd.f32 %v2644_v20, %v2576_v55  ;;  %v2476_v11 = vadd.f32 %v2444_v38, %v2376_v33 }
 0x198   : > { %v1774_v36 = vadd.f32 %v4435_v42, %v1738_v30  ;;  %v1739_v22 = vmul.f32 %v3479_v9, %v4432_v0  ;;  %v1691_v14 = vpop.f32.mrb[31].mxu0  ;;  %v2477_v41 = vadd.f32 %v2445_v8, %v2377_v18  ;;  %v2646_v50 = vmul.f32 %v4482_v44, %v2610_v40 }
 0x199   : > { %v1772_v28 = vadd.f32 %v4435_v42, %v1736_v59  ;;  %v1737_v27 = vmul.f32 %v4432_v0, %v1691_v14  ;;  %v2775_v12 = vadd.f32 %v2743_v49, %v2675_v31  ;;  %v2776_v57 = vadd.f32 %v2744_v35, %v2676_v32 }
 0x19a   : > { %v1848_v4 = vmax.f32 %v1774_v36, 0.0  ;;  %v1775_v34 = vadd.f32 %v4435_v42, %v1739_v22  ;;  %v2577_v10 = vadd.f32 %v2545_v1, %v2476_v11  ;;  %v2578_v26 = vadd.f32 %v2546_v13, %v2477_v41 }
 0x19b   : > { %v1846_v24 = vmax.f32 %v1772_v28, 0.0  ;;  %v1773_v20 = vadd.f32 %v4435_v42, %v1737_v27  ;;  %v2796_v23 = vpack.c.bf16 %v2776_v57, %v2775_v12  ;;  %v1946_v49 = vmul.f32 %v4953_v54, %v4443_v47 }
 0x19c   : > { %1880 = vst.msk [vmem:[#allocation2 + $0x181] sm:$0xff] %vm1489_vm1, %v1848_v4  ;;  %v1849_v48 = vmax.f32 %v1775_v34, 0.0  ;;  %v2677_v0 = vadd.f32 %v2645_v43, %v2577_v10  ;;  %v1947_v42 = vmul.f32 %v4962_v62, %v4443_v47  ;;  %v2046_v1 = vmul.f32 %v4955_v17, %v4446_v29 }
 0x19d   : > { %1878 = vst.msk [vmem:[#allocation2 + $0x169] sm:$0xff] %vm1489_vm1, %v1846_v24  ;;  %v1847_v35 = vmax.f32 %v1773_v20, 0.0  ;;  %3503 = vmatmul.mubr.msk.bf16.gmra.mrb[20].mxu1 %vm1489_vm1, %v2796_v23  ;;  %v2047_v3 = vmul.f32 %v4966_v56, %v4446_v29  ;;  %v2678_v58 = vadd.f32 %v2646_v50, %v2578_v26  ;;  %v2745_v15 = vmul.f32 %v4914_v25, %v2709_v16 }
 0x19e   : > { %1881 = vst.msk [vmem:[#allocation2 + $0x189] sm:$0xff] %vm1489_vm1, %v1849_v48  ;;  %v2746_v54 = vmul.f32 %v4914_v25, %v2710_v2  ;;  %v2146_v53 = vmul.f32 %v4970_v46, %v4455_v63  ;;  %v2078_v55 = vadd.f32 %v2046_v1, %v1946_v49  ;;  %v2147_v17 = vmul.f32 %v4976_v7, %v4455_v63 }
 0x19f   : > { %1879 = vst.msk [vmem:[#allocation2 + $0x171] sm:$0xff] %vm1489_vm1, %v1847_v35  ;;  %v2079_v62 = vadd.f32 %v2047_v3, %v1947_v42  ;;  %v2777_v52 = vadd.f32 %v2745_v15, %v2677_v0  ;;  %v2246_v56 = vmul.f32 %v4950_v61, %v4470_v39  ;;  %v2247_v30 = vmul.f32 %v4982_v51, %v4470_v39 }
 0x1a0   : > { %v2778_v38 = vadd.f32 %v2746_v54, %v2678_v58  ;;  %v2178_v45 = vadd.f32 %v2146_v53, %v2078_v55  ;;  %v2346_v8 = vmul.f32 %v2609_v19, %v4474_v60  ;;  %v1948_v46 = vmul.f32 %v4950_v61, %v4443_v47 }
 0x1a1   : > { %v2179_v33 = vadd.f32 %v2147_v17, %v2079_v62  ;;  %v1949_v59 = vmul.f32 %v4982_v51, %v4443_v47  ;;  %v2048_v7 = vmul.f32 %v2609_v19, %v4446_v29  ;;  %v2049_v9 = vmul.f32 %v2610_v40, %v4446_v29 }
 0x1a2   : > { %v2797_v13 = vpack.c.bf16 %v2778_v38, %v2777_v52  ;;  %v2278_v31 = vadd.f32 %v2246_v56, %v2178_v45  ;;  %v2347_v18 = vmul.f32 %v2610_v40, %v4474_v60  ;;  %v2148_v36 = vmul.f32 %v2709_v16, %v4455_v63 }
 0x1a3   : > { %v2279_v32 = vadd.f32 %v2247_v30, %v2179_v33  ;;  %v5038_v22 = vld [vmem:[#allocation2 + $0x180] sm:$0xff]  ;;  %v2446_v61 = vmul.f32 %v2709_v16, %v4490_v21  ;;  %v2447_v51 = vmul.f32 %v2710_v2, %v4490_v21  ;;  %v2080_v43 = vadd.f32 %v2048_v7, %v1948_v46 }
 0x1a4   : > { %v5040_v14 = vld [vmem:[#allocation2 + $0x181] sm:$0xff]  ;;  %3506 = vmatprep.mubr.msk.bf16.mxu1 %vm1489_vm1, %v2797_v13  ;;  %v2611_v19 = vld [vmem:[#allocation2 + $0x169] sm:$0xff]  ;;  %v2081_v28 = vadd.f32 %v2049_v9, %v1949_v59  ;;  %v2378_v27 = vadd.f32 %v2346_v8, %v2278_v31  ;;  %v2149_v40 = vmul.f32 %v2710_v2, %v4455_v63  ;;  %v2549_v57 = vmul.f32 %v4478_v37, %v5038_v22 }
 0x1a5   : > { %v2511_v11 = vld [vmem:[#allocation2 + $0x168] sm:$0xff]  ;;  %v2379_v12 = vadd.f32 %v2347_v18, %v2279_v32  ;;  %v2180_v24 = vadd.f32 %v2148_v36, %v2080_v43  ;;  %v2649_v23 = vmul.f32 %v4482_v44, %v5040_v14  ;;  %v2647_v2 = vmul.f32 %v4482_v44, %v2611_v19 }
 0x1a6   : > { %v2512_v4 = vld [vmem:[#allocation2 + $0x170] sm:$0xff]  ;;  %v2547_v34 = vmul.f32 %v4478_v37, %v2511_v11  ;;  %v2248_v20 = vmul.f32 %v2511_v11, %v4470_v39  ;;  %v2478_v50 = vadd.f32 %v2446_v61, %v2378_v27  ;;  %v2181_v0 = vadd.f32 %v2149_v40, %v2081_v28  ;;  %v2514_v54 = vld [vmem:[#allocation2 + $0x188] sm:$0xff] }
 0x1a7   : > { %v2612_v41 = vld [vmem:[#allocation2 + $0x171] sm:$0xff]  ;;  %v2479_v16 = vadd.f32 %v2447_v51, %v2379_v12  ;;  %v2548_v48 = vmul.f32 %v4478_v37, %v2512_v4  ;;  %v2249_v49 = vmul.f32 %v2512_v4, %v4470_v39  ;;  %v2348_v42 = vmul.f32 %v2611_v19, %v4474_v60  ;;  %v2614_v46 = vld [vmem:[#allocation2 + $0x189] sm:$0xff] }
 0x1a8   : > { %v2711_v10 = vld [vmem:[#allocation2 + $0x16a] sm:$0xff]  ;;  %v2712_v26 = vld [vmem:[#allocation2 + $0x172] sm:$0xff]  ;;  %v2280_v35 = vadd.f32 %v2248_v20, %v2180_v24  ;;  %v2579_v1 = vadd.f32 %v2547_v34, %v2478_v50  ;;  %v2648_v58 = vmul.f32 %v4482_v44, %v2612_v41  ;;  %v2349_v55 = vmul.f32 %v2612_v41, %v4474_v60  ;;  %v2713_v36 = vld [vmem:[#allocation2 + $0x182] sm:$0xff] }
 0x1a9   : > { %v2580_v3 = vadd.f32 %v2548_v48, %v2479_v16  ;;  %v2747_v15 = vmul.f32 %v4914_v25, %v2711_v10  ;;  %v2281_v53 = vadd.f32 %v2249_v49, %v2181_v0  ;;  %v2448_v17 = vmul.f32 %v2711_v10, %v4490_v21  ;;  %v2714_v27 = vld [vmem:[#allocation2 + $0x18a] sm:$0xff]  ;;  %v2515_v20 = vld [vmem:[#allocation2 + $0x198] sm:$0xff] }
 0x1aa   : > { %v2380_v62 = vadd.f32 %v2348_v42, %v2280_v35  ;;  %v2679_v52 = vadd.f32 %v2647_v2, %v2579_v1  ;;  %v2748_v56 = vmul.f32 %v4914_v25, %v2712_v26  ;;  %v2449_v30 = vmul.f32 %v2712_v26, %v4490_v21  ;;  %v2615_v0 = vld [vmem:[#allocation2 + $0x199] sm:$0xff]  ;;  %v2616_v42 = vld [vmem:[#allocation2 + $0x1a1] sm:$0xff] }
 0x1ab   : > { %v2680_v38 = vadd.f32 %v2648_v58, %v2580_v3  ;;  %v2381_v45 = vadd.f32 %v2349_v55, %v2281_v53  ;;  %v2550_v8 = vmul.f32 %v4478_v37, %v2514_v54  ;;  %v1950_v13 = vmul.f32 %v2511_v11, %v4443_v47  ;;  %v2716_v53 = vld [vmem:[#allocation2 + $0x1a2] sm:$0xff] }
 0x1ac   : > { %v2480_v33 = vadd.f32 %v2448_v17, %v2380_v62  ;;  %v2779_v59 = vadd.f32 %v2747_v15, %v2679_v52  ;;  %v1951_v9 = vmul.f32 %v2512_v4, %v4443_v47  ;;  %v2050_v31 = vmul.f32 %v2611_v19, %v4446_v29 }
 0x1ad   : > { %v2780_v7 = vadd.f32 %v2748_v56, %v2680_v38  ;;  %v2481_v32 = vadd.f32 %v2449_v30, %v2381_v45  ;;  %v2051_v61 = vmul.f32 %v2612_v41, %v4446_v29  ;;  %v2150_v51 = vmul.f32 %v2711_v10, %v4455_v63 }
 0x1ae   : > { %v2581_v18 = vadd.f32 %v2549_v57, %v2480_v33  ;;  %v2650_v28 = vmul.f32 %v4482_v44, %v2614_v46  ;;  %v2082_v12 = vadd.f32 %v2050_v31, %v1950_v13  ;;  %v2151_v24 = vmul.f32 %v2712_v26, %v4455_v63  ;;  %v2516_v63 = vld [vmem:[#allocation2 + $0x1a0] sm:$0xff] }
 0x1af   : > { %v2798_v43 = vpack.c.bf16 %v2780_v7, %v2779_v59  ;;  %v2582_v40 = vadd.f32 %v2550_v8, %v2481_v32  ;;  %v2083_v34 = vadd.f32 %v2051_v61, %v1951_v9  ;;  %v2749_v47 = vmul.f32 %v4914_v25, %v2713_v36  ;;  %v3014_v33 = vld [vmem:[%s5241_s6] sm:$0x3] }
 0x1b0   : > { %v2681_v11 = vadd.f32 %v2649_v23, %v2581_v18  ;;  %v2182_v19 = vadd.f32 %v2150_v51, %v2082_v12  ;;  %v2250_v29 = vmul.f32 %v5038_v22, %v4470_v39  ;;  %v2750_v4 = vmul.f32 %v4914_v25, %v2714_v27 }
 0x1b1   : > { %3507 = vmatmul.mubr.msk.bf16.gmra.mrb[24].mxu1 %vm1489_vm1, %v2798_v43  ;;  %v2682_v57 = vadd.f32 %v2650_v28, %v2582_v40  ;;  %v2183_v41 = vadd.f32 %v2151_v24, %v2083_v34  ;;  %v2251_v10 = vmul.f32 %v2514_v54, %v4470_v39  ;;  %v2350_v23 = vmul.f32 %v5040_v14, %v4474_v60  ;;  %v2715_v54 = vld [vmem:[#allocation2 + $0x19a] sm:$0xff] }
 0x1b2   : > { %v2282_v50 = vadd.f32 %v2250_v29, %v2182_v19  ;;  %v2781_v16 = vadd.f32 %v2749_v47, %v2681_v11  ;;  %v2351_v26 = vmul.f32 %v2614_v46, %v4474_v60  ;;  %v2450_v22 = vmul.f32 %v2713_v36, %v4490_v21 }
 0x1b3   : > { %v2782_v48 = vadd.f32 %v2750_v4, %v2682_v57  ;;  %v2283_v2 = vadd.f32 %v2251_v10, %v2183_v41  ;;  %v2551_v35 = vmul.f32 %v4478_v37, %v2515_v20  ;;  %v2451_v3 = vmul.f32 %v2714_v27, %v4490_v21 }
 0x1b4   : > { %v2382_v49 = vadd.f32 %v2350_v23, %v2282_v50  ;;  %v2552_v58 = vmul.f32 %v4478_v37, %v2516_v63  ;;  %v2651_v15 = vmul.f32 %v4482_v44, %v2615_v0  ;;  %v2652_v55 = vmul.f32 %v4482_v44, %v2616_v42 }
 0x1b5   : > { %v2799_v1 = vpack.c.bf16 %v2782_v48, %v2781_v16  ;;  %v2383_v39 = vadd.f32 %v2351_v26, %v2283_v2  ;;  %v2751_v52 = vmul.f32 %v4914_v25, %v2715_v54  ;;  %v2752_v38 = vmul.f32 %v4914_v25, %v2716_v53 }
 0x1b6   : > { %v2482_v14 = vadd.f32 %v2450_v22, %v2382_v49  ;;  %v5093_v8 = vrot.slane %v3014_v33, %v3599_v5  ;;  %v5097_v44 = vrot.slane %v3014_v33, %v3602_v6 }
 0x1b7   : > { %3510 = vmatprep.mubr.msk.bf16.mxu1 %vm1489_vm1, %v2799_v1  ;;  %v2483_v60 = vadd.f32 %v2451_v3, %v2383_v39 }
 0x1b8   : > { %v2583_v62 = vadd.f32 %v2551_v35, %v2482_v14 }
 0x1b9   : > { %v2584_v17 = vadd.f32 %v2552_v58, %v2483_v60 }
 0x1ba   : > { %v2683_v21 = vadd.f32 %v2651_v15, %v2583_v62 }
 0x1bb   : > { %v2684_v56 = vadd.f32 %v2652_v55, %v2584_v17 }
 0x1bc   : > { %v2783_v37 = vadd.f32 %v2751_v52, %v2683_v21 }
 0x1bd   : > { %v2784_v30 = vadd.f32 %v2752_v38, %v2684_v56 }
 0x1bf   : > { %v2800_v45 = vpack.c.bf16 %v2784_v30, %v2783_v37 }
 0x1c1   : > { %3511 = vmatmul.mubr.msk.bf16.gmra.mrb[28].mxu1 %vm1489_vm1, %v2800_v45 }
 0x208   : > { %v3484_v46 = vpop.f32.mrb[0].mxu1 }
 0x209   : > { %v3021_v25 = vmul.f32 %v3484_v46, %v5093_v8  ;;  %v2887_v13 = vpop.f32.mrb[1].mxu1 }
 0x20a   : > { %v3019_v5 = vmul.f32 %v5093_v8, %v2887_v13  ;;  %v3485_v59 = vpop.f32.mrb[2].mxu1 }
 0x20b   : > { %v3057_v6 = vadd.f32 %v5097_v44, %v3021_v25  ;;  %v3022_v7 = vmul.f32 %v3485_v59, %v5093_v8  ;;  %v2890_v9 = vpop.f32.mrb[3].mxu1 }
 0x20c   : > { %v3055_v31 = vadd.f32 %v5097_v44, %v3019_v5  ;;  %v3020_v32 = vmul.f32 %v5093_v8, %v2890_v9 }
 0x20d   : > { %3090 = vst.msk [vmem:[%s5103_s9 + $0x10] sm:$0xff] %vm3087_vm4, %v3057_v6  ;;  %v3058_v18 = vadd.f32 %v5097_v44, %v3022_v7 }
 0x20e   : > { %3088 = vst.msk [vmem:[%s5103_s9] sm:$0xff] %vm3087_vm4, %v3055_v31  ;;  %v3056_v36 = vadd.f32 %v5097_v44, %v3020_v32 }
 0x20f   : > { %3091 = vst.msk [vmem:[%s5103_s9 + $0x18] sm:$0xff] %vm3087_vm4, %v3058_v18 }
 0x210   : > { %3089 = vst.msk [vmem:[%s5103_s9 + $0x8] sm:$0xff] %vm3087_vm4, %v3056_v36 }
 0x21d   : > { %v3488_v61 = vpop.f32.mrb[4].mxu1 }
 0x21e   : > { %v3025_v51 = vmul.f32 %v3488_v61, %v5093_v8  ;;  %v2903_v43 = vpop.f32.mrb[5].mxu1 }
 0x21f   : > { %v3023_v28 = vmul.f32 %v5093_v8, %v2903_v43  ;;  %v3489_v27 = vpop.f32.mrb[6].mxu1 }
 0x220   : > { %v3061_v12 = vadd.f32 %v5097_v44, %v3025_v51  ;;  %v3026_v40 = vmul.f32 %v3489_v27, %v5093_v8  ;;  %v2906_v11 = vpop.f32.mrb[7].mxu1 }
 0x221   : > { %v3059_v34 = vadd.f32 %v5097_v44, %v3023_v28  ;;  %v3024_v24 = vmul.f32 %v5093_v8, %v2906_v11 }
 0x222   : > { %3094 = vst.msk [vmem:[%s5103_s9 + $0x30] sm:$0xff] %vm3087_vm4, %v3061_v12  ;;  %v3062_v47 = vadd.f32 %v5097_v44, %v3026_v40 }
 0x223   : > { %3092 = vst.msk [vmem:[%s5103_s9 + $0x20] sm:$0xff] %vm3087_vm4, %v3059_v34  ;;  %v3060_v19 = vadd.f32 %v5097_v44, %v3024_v24 }
 0x224   : > { %3095 = vst.msk [vmem:[%s5103_s9 + $0x38] sm:$0xff] %vm3087_vm4, %v3062_v47 }
 0x225   : > { %3093 = vst.msk [vmem:[%s5103_s9 + $0x28] sm:$0xff] %vm3087_vm4, %v3060_v19 }
 0x232   : > { %v3492_v29 = vpop.f32.mrb[8].mxu1 }
 0x233   : > { %v3029_v57 = vmul.f32 %v3492_v29, %v5093_v8  ;;  %v2919_v4 = vpop.f32.mrb[9].mxu1 }
 0x234   : > { %v3027_v41 = vmul.f32 %v5093_v8, %v2919_v4  ;;  %v3493_v10 = vpop.f32.mrb[10].mxu1 }
 0x235   : > { %v3065_v20 = vadd.f32 %v5097_v44, %v3029_v57  ;;  %v3030_v50 = vmul.f32 %v3493_v10, %v5093_v8  ;;  %v2922_v23 = vpop.f32.mrb[11].mxu1 }
 0x236   : > { %v3063_v63 = vadd.f32 %v5097_v44, %v3027_v41  ;;  %v3028_v16 = vmul.f32 %v5093_v8, %v2922_v23 }
 0x237   : > { %3098 = vst.msk [vmem:[%s5103_s9 + $0x50] sm:$0xff] %vm3087_vm4, %v3065_v20  ;;  %v3066_v48 = vadd.f32 %v5097_v44, %v3030_v50 }
 0x238   : > { %3096 = vst.msk [vmem:[%s5103_s9 + $0x40] sm:$0xff] %vm3087_vm4, %v3063_v63  ;;  %v3064_v2 = vadd.f32 %v5097_v44, %v3028_v16 }
 0x239   : > { %3099 = vst.msk [vmem:[%s5103_s9 + $0x58] sm:$0xff] %vm3087_vm4, %v3066_v48 }
 0x23a   : > { %3097 = vst.msk [vmem:[%s5103_s9 + $0x48] sm:$0xff] %vm3087_vm4, %v3064_v2 }
 0x247   : > { %v3496_v26 = vpop.f32.mrb[12].mxu1 }
 0x248   : > { %v3033_v0 = vmul.f32 %v3496_v26, %v5093_v8  ;;  %v2935_v49 = vpop.f32.mrb[13].mxu1 }
 0x249   : > { %v3031_v22 = vmul.f32 %v5093_v8, %v2935_v49  ;;  %v3497_v35 = vpop.f32.mrb[14].mxu1 }
 0x24a   : > { %v3069_v42 = vadd.f32 %v5097_v44, %v3033_v0  ;;  %v3034_v1 = vmul.f32 %v3497_v35, %v5093_v8  ;;  %v2938_v39 = vpop.f32.mrb[15].mxu1 }
 0x24b   : > { %v3067_v3 = vadd.f32 %v5097_v44, %v3031_v22  ;;  %v3032_v58 = vmul.f32 %v5093_v8, %v2938_v39 }
 0x24c   : > { %3102 = vst.msk [vmem:[%s5103_s9 + $0x70] sm:$0xff] %vm3087_vm4, %v3069_v42  ;;  %v3070_v14 = vadd.f32 %v5097_v44, %v3034_v1 }
 0x24d   : > { %3100 = vst.msk [vmem:[%s5103_s9 + $0x60] sm:$0xff] %vm3087_vm4, %v3067_v3  ;;  %v3068_v15 = vadd.f32 %v5097_v44, %v3032_v58 }
 0x24e   : > { %3103 = vst.msk [vmem:[%s5103_s9 + $0x78] sm:$0xff] %vm3087_vm4, %v3070_v14 }
 0x24f   : > { %3101 = vst.msk [vmem:[%s5103_s9 + $0x68] sm:$0xff] %vm3087_vm4, %v3068_v15 }
 0x25b   : > { %v3500_v54 = vpop.f32.mrb[16].mxu1 }
 0x25c   : > { %v3037_v53 = vmul.f32 %v3500_v54, %v5093_v8  ;;  %v2951_v60 = vpop.f32.mrb[17].mxu1 }
 0x25d   : > { %v3035_v55 = vmul.f32 %v5093_v8, %v2951_v60  ;;  %v3501_v62 = vpop.f32.mrb[18].mxu1 }
 0x25e   : > { %v3073_v17 = vadd.f32 %v5097_v44, %v3037_v53  ;;  %v3038_v52 = vmul.f32 %v3501_v62, %v5093_v8  ;;  %v2954_v38 = vpop.f32.mrb[19].mxu1 }
 0x25f   : > { %v3071_v21 = vadd.f32 %v5097_v44, %v3035_v55  ;;  %v3036_v56 = vmul.f32 %v5093_v8, %v2954_v38 }
 0x260   : > { %3106 = vst.msk [vmem:[%s5103_s9 + $0x90] sm:$0xff] %vm3087_vm4, %v3073_v17  ;;  %v3074_v37 = vadd.f32 %v5097_v44, %v3038_v52 }
 0x261   : > { %3104 = vst.msk [vmem:[%s5103_s9 + $0x80] sm:$0xff] %vm3087_vm4, %v3071_v21  ;;  %v3072_v30 = vadd.f32 %v5097_v44, %v3036_v56 }
 0x262   : > { %3107 = vst.msk [vmem:[%s5103_s9 + $0x98] sm:$0xff] %vm3087_vm4, %v3074_v37 }
 0x263   : > { %3105 = vst.msk [vmem:[%s5103_s9 + $0x88] sm:$0xff] %vm3087_vm4, %v3072_v30 }
 0x270   : > { %v3504_v45 = vpop.f32.mrb[20].mxu1 }
 0x271   : > { %v3041_v33 = vmul.f32 %v3504_v45, %v5093_v8  ;;  %v2967_v46 = vpop.f32.mrb[21].mxu1 }
 0x272   : > { %v3039_v25 = vmul.f32 %v5093_v8, %v2967_v46  ;;  %v3505_v13 = vpop.f32.mrb[22].mxu1 }
 0x273   : > { %v3077_v5 = vadd.f32 %v5097_v44, %v3041_v33  ;;  %v3042_v59 = vmul.f32 %v3505_v13, %v5093_v8  ;;  %v2970_v6 = vpop.f32.mrb[23].mxu1 }
 0x274   : > { %v3075_v7 = vadd.f32 %v5097_v44, %v3039_v25  ;;  %v3040_v9 = vmul.f32 %v5093_v8, %v2970_v6 }
 0x275   : > { %3110 = vst.msk [vmem:[%s5103_s9 + $0xb0] sm:$0xff] %vm3087_vm4, %v3077_v5  ;;  %v3078_v31 = vadd.f32 %v5097_v44, %v3042_v59 }
 0x276   : > { %3108 = vst.msk [vmem:[%s5103_s9 + $0xa0] sm:$0xff] %vm3087_vm4, %v3075_v7  ;;  %v3076_v32 = vadd.f32 %v5097_v44, %v3040_v9 }
 0x277   : > { %3111 = vst.msk [vmem:[%s5103_s9 + $0xb8] sm:$0xff] %vm3087_vm4, %v3078_v31 }
 0x278   : > { %3109 = vst.msk [vmem:[%s5103_s9 + $0xa8] sm:$0xff] %vm3087_vm4, %v3076_v32 }
 0x284   : > { %v3508_v18 = vpop.f32.mrb[24].mxu1 }
 0x285   : > { %v3045_v36 = vmul.f32 %v3508_v18, %v5093_v8  ;;  %v2983_v61 = vpop.f32.mrb[25].mxu1 }
 0x286   : > { %v3043_v51 = vmul.f32 %v5093_v8, %v2983_v61  ;;  %v3509_v43 = vpop.f32.mrb[26].mxu1 }
 0x287   : > { %v3081_v28 = vadd.f32 %v5097_v44, %v3045_v36  ;;  %v3046_v27 = vmul.f32 %v3509_v43, %v5093_v8  ;;  %v2986_v12 = vpop.f32.mrb[27].mxu1 }
 0x288   : > { %v3079_v40 = vadd.f32 %v5097_v44, %v3043_v51  ;;  %v3044_v11 = vmul.f32 %v5093_v8, %v2986_v12 }
 0x289   : > { %3114 = vst.msk [vmem:[%s5103_s9 + $0xd0] sm:$0xff] %vm3087_vm4, %v3081_v28  ;;  %v3082_v34 = vadd.f32 %v5097_v44, %v3046_v27 }
 0x28a   : > { %3112 = vst.msk [vmem:[%s5103_s9 + $0xc0] sm:$0xff] %vm3087_vm4, %v3079_v40  ;;  %v3080_v24 = vadd.f32 %v5097_v44, %v3044_v11 }
 0x28b   : > { %3115 = vst.msk [vmem:[%s5103_s9 + $0xd8] sm:$0xff] %vm3087_vm4, %v3082_v34 }
 0x28c   : > { %3113 = vst.msk [vmem:[%s5103_s9 + $0xc8] sm:$0xff] %vm3087_vm4, %v3080_v24 }
 0x294   : > { %v3512_v47 = vpop.f32.mrb[28].mxu1 }
 0x295   : > { %v3049_v19 = vmul.f32 %v3512_v47, %v5093_v8  ;;  %v2999_v29 = vpop.f32.mrb[29].mxu1 }
 0x296   : > { %v3047_v57 = vmul.f32 %v5093_v8, %v2999_v29  ;;  %v3513_v4 = vpop.f32.mrb[30].mxu1 }
 0x297   : > { %v3085_v41 = vadd.f32 %v5097_v44, %v3049_v19  ;;  %v3050_v10 = vmul.f32 %v3513_v4, %v5093_v8  ;;  %v3002_v20 = vpop.f32.mrb[31].mxu1 }
 0x298   : > { %v3083_v50 = vadd.f32 %v5097_v44, %v3047_v57  ;;  %v3048_v23 = vmul.f32 %v5093_v8, %v3002_v20 }
 0x299   : > { %3118 = vst.msk [vmem:[%s5103_s9 + $0xf0] sm:$0xff] %vm3087_vm4, %v3085_v41  ;;  %v3086_v63 = vadd.f32 %v5097_v44, %v3050_v10 }
 0x29a   : > { %3116 = vst.msk [vmem:[%s5103_s9 + $0xe0] sm:$0xff] %vm3087_vm4, %v3083_v50  ;;  %v3084_v16 = vadd.f32 %v5097_v44, %v3048_v23 }
 0x29b   : > { %3119 = vst.msk [vmem:[%s5103_s9 + $0xf8] sm:$0xff] %vm3087_vm4, %v3086_v63 }
 0x29c   : > { %3117 = vst.msk [vmem:[%s5103_s9 + $0xe8] sm:$0xff] %vm3087_vm4, %v3084_v16 }
 0x29d PF: > { %s17_s24 = sadd.s32 1, %s3534_s24  }
 0x29e   : > { %p14_p4 = scmp.ge.s32.totalorder %s17_s24, 4  }
 0x2a0   :  { %16 = sbr.rel (!%p14_p4) target bundleno = 1 (0x1), region = 83 }

</bundles_post_ra>
